<compile_context>
chip_gen: v6e
topology: v6e:2x2x1
jax: 0.10.0
libtpu: 0.0.40
codegen_flags: <defaults>
</compile_context>

<pallas_src>
import functools

import jax
import jax.numpy as jnp
from jax.experimental import pallas as pl
from jax.experimental.pallas import tpu as pltpu

LEAKY_SLOPE = 0.2
BN_EPS = 1e-5


# ---------------------------------------------------------------------------
# Fused whole-network kernel
# ---------------------------------------------------------------------------
def fused_ae_kernel(*refs, layer_cfg, latent_dim):
    """refs = (x_ref, *param_refs, z_out_ref, rs_out_ref).

    layer_cfg is a static tuple of (has_bn, act, store_latent) per layer;
    param_refs are consumed in order: w, b[, gamma, beta] per layer.
    """
    x_ref = refs[0]
    z_ref = refs[-2]
    rs_ref = refs[-1]
    params = refs[1:-2]

    h = x_ref[...]  # (B, flat) f32
    idx = 0
    for has_bn, act, store_latent in layer_cfg:
        w = params[idx][...]        # bf16 (in_pad, out_pad)
        b = params[idx + 1][...]    # f32  (1, out_pad)
        idx += 2

        # MXU matmul: bf16 inputs, f32 accumulation.
        y = jnp.dot(h.astype(jnp.bfloat16), w,
                    preferred_element_type=jnp.float32) + b

        if has_bn:
            gamma = params[idx][...]
            beta = params[idx + 1][...]
            idx += 2
            # BatchNorm1d training-mode forward: batch stats, biased variance.
            mean = jnp.mean(y, axis=0, keepdims=True)
            var = jnp.mean(jnp.square(y - mean), axis=0, keepdims=True)
            y = (y - mean) * jax.lax.rsqrt(var + BN_EPS)
            y = y * gamma + beta

        if act == "leaky":
            y = jnp.where(y >= 0, y, LEAKY_SLOPE * y)
        else:  # "sigmoid"
            y = jax.nn.sigmoid(y)

        h = y
        if store_latent:
            # Only the first `latent_dim` lanes of the padded latent are real.
            z_ref[...] = h[:, :latent_dim]

    rs_ref[...] = h


def ae_forward(params, img, *, img_shape, latent_dim, layer_cfg):
    b = img.shape[0]
    x = img.reshape(b, -1)  # flatten NCHW -> (B, C*H*W)
    flat = x.shape[1]

    kernel = functools.partial(fused_ae_kernel,
                               layer_cfg=layer_cfg, latent_dim=latent_dim)
    n_inputs = 1 + len(params)
    vmem = pl.BlockSpec(memory_space=pltpu.MemorySpace.VMEM)

    encoder_z, y = pl.pallas_call(
        kernel,
        out_shape=(
            jax.ShapeDtypeStruct((b, latent_dim), jnp.float32),
            jax.ShapeDtypeStruct((b, flat), jnp.float32),
        ),
        in_specs=[vmem] * n_inputs,
        out_specs=(vmem, vmem),
        compiler_params=pltpu.CompilerParams(
            vmem_limit_bytes=32 * 1024 * 1024),
    )(x, *params)

    rs_img = y.reshape(-1, img_shape[0], img_shape[1], img_shape[2])
    return encoder_z, rs_img


# ---------------------------------------------------------------------------
# Parameter construction (deterministic, PyTorch-like uniform init)
# ---------------------------------------------------------------------------
def _init_linear(key, in_dim, out_dim, pad_in, pad_out):
    kw, kb = jax.random.split(key)
    bound = 1.0 / jnp.sqrt(jnp.float32(in_dim))
    w = jax.random.uniform(kw, (in_dim, out_dim), jnp.float32, -bound, bound)
    b = jax.random.uniform(kb, (1, out_dim), jnp.float32, -bound, bound)
    if (pad_in, pad_out) != (in_dim, out_dim):
        w = jnp.zeros((pad_in, pad_out), jnp.float32).at[:in_dim, :out_dim].set(w)
        b = jnp.zeros((1, pad_out), jnp.float32).at[:, :out_dim].set(b)
    return w.astype(jnp.bfloat16), b


def make_ae_params(key, img_shape, latent_dim):
    """Returns (flat param list in kernel order, static layer_cfg)."""
    flat = int(img_shape[0] * img_shape[1] * img_shape[2])
    lat_pad = ((latent_dim + 127) // 128) * 128  # lane-dense padded latent

    # (in, out, pad_in, pad_out, has_bn, act, store_latent)
    specs = [
        # --- encoder ---
        (flat, 1024, flat, 1024, False, "leaky", False),
        (1024, 512, 1024, 512, True, "leaky", False),
        (512, 256, 512, 256, True, "leaky", False),
        (256, 128, 256, 128, True, "leaky", False),
        (128, latent_dim, 128, lat_pad, False, "leaky", True),
        # --- decoder ---
        (latent_dim, 128, lat_pad, 128, False, "leaky", False),
        (128, 256, 128, 256, True, "leaky", False),
        (256, 512, 256, 512, True, "leaky", False),
        (512, 1024, 512, 1024, True, "leaky", False),
        (1024, flat, 1024, flat, False, "sigmoid", False),
    ]

    keys = jax.random.split(key, len(specs))
    flat_params = []
    layer_cfg = []
    for k, (di, do, pi, po, has_bn, act, store_latent) in zip(keys, specs):
        w, b = _init_linear(k, di, do, pi, po)
        flat_params += [w, b]
        if has_bn:
            # BatchNorm1d default init: gamma=1, beta=0.
            flat_params += [jnp.ones((1, po), jnp.float32),
                            jnp.zeros((1, po), jnp.float32)]
        layer_cfg.append((has_bn, act, store_latent))
    # TODO(synk): running_mean/running_var buffer updates (training side-effect)
    # are not modeled; forward uses batch statistics like the PyTorch default.
    return flat_params, tuple(layer_cfg)


# ---------------------------------------------------------------------------
if __name__ == "__main__":
    img_shape = (1, 16, 16)   # (C, H, W) -> flat = 256
    latent_dim = 32
    batch = 8

    key = jax.random.PRNGKey(0)
    k_params, k_img = jax.random.split(key)
    params, layer_cfg = make_ae_params(k_params, img_shape, latent_dim)
    img = jax.random.uniform(k_img, (batch,) + img_shape, jnp.float32)

    fwd = jax.jit(functools.partial(
        ae_forward, img_shape=img_shape, latent_dim=latent_dim,
        layer_cfg=layer_cfg))
    encoder_z, rs_img = fwd(params, img)
    jax.block_until_ready((encoder_z, rs_img))

    assert encoder_z.shape == (batch, latent_dim)
    assert rs_img.shape == (batch,) + img_shape
    assert bool(jnp.all(jnp.isfinite(encoder_z)))
    assert bool(jnp.all(jnp.isfinite(rs_img)))
    assert bool(jnp.all(rs_img >= 0.0)) and bool(jnp.all(rs_img <= 1.0))
    print("KERNEL_OK")
</pallas_src>

<mosaic_0001>
module attributes {stable_mosaic.version = 11 : i64} {
  func.func @fused_ae_kernel(%arg0: memref<8x256xf32, #tpu.memory_space<vmem>>, %arg1: memref<256x1024xbf16, #tpu.memory_space<vmem>>, %arg2: memref<1x1024xf32, #tpu.memory_space<vmem>>, %arg3: memref<1024x512xbf16, #tpu.memory_space<vmem>>, %arg4: memref<1x512xf32, #tpu.memory_space<vmem>>, %arg5: memref<1x512xf32, #tpu.memory_space<vmem>>, %arg6: memref<1x512xf32, #tpu.memory_space<vmem>>, %arg7: memref<512x256xbf16, #tpu.memory_space<vmem>>, %arg8: memref<1x256xf32, #tpu.memory_space<vmem>>, %arg9: memref<1x256xf32, #tpu.memory_space<vmem>>, %arg10: memref<1x256xf32, #tpu.memory_space<vmem>>, %arg11: memref<256x128xbf16, #tpu.memory_space<vmem>>, %arg12: memref<1x128xf32, #tpu.memory_space<vmem>>, %arg13: memref<1x128xf32, #tpu.memory_space<vmem>>, %arg14: memref<1x128xf32, #tpu.memory_space<vmem>>, %arg15: memref<128x128xbf16, #tpu.memory_space<vmem>>, %arg16: memref<1x128xf32, #tpu.memory_space<vmem>>, %arg17: memref<128x128xbf16, #tpu.memory_space<vmem>>, %arg18: memref<1x128xf32, #tpu.memory_space<vmem>>, %arg19: memref<128x256xbf16, #tpu.memory_space<vmem>>, %arg20: memref<1x256xf32, #tpu.memory_space<vmem>>, %arg21: memref<1x256xf32, #tpu.memory_space<vmem>>, %arg22: memref<1x256xf32, #tpu.memory_space<vmem>>, %arg23: memref<256x512xbf16, #tpu.memory_space<vmem>>, %arg24: memref<1x512xf32, #tpu.memory_space<vmem>>, %arg25: memref<1x512xf32, #tpu.memory_space<vmem>>, %arg26: memref<1x512xf32, #tpu.memory_space<vmem>>, %arg27: memref<512x1024xbf16, #tpu.memory_space<vmem>>, %arg28: memref<1x1024xf32, #tpu.memory_space<vmem>>, %arg29: memref<1x1024xf32, #tpu.memory_space<vmem>>, %arg30: memref<1x1024xf32, #tpu.memory_space<vmem>>, %arg31: memref<1024x256xbf16, #tpu.memory_space<vmem>>, %arg32: memref<1x256xf32, #tpu.memory_space<vmem>>, %arg33: memref<8x32xf32, #tpu.memory_space<vmem>>, %arg34: memref<8x256xf32, #tpu.memory_space<vmem>>) attributes {dimension_semantics = [], scalar_prefetch = 0 : i64, scratch_operands = 0 : i64, tpu.core_type = #tpu.core_type<tc>} {
    %c0 = arith.constant 0 : index
    %c0_0 = arith.constant 0 : index
    %0 = vector.load %arg0[%c0, %c0_0] : memref<8x256xf32, #tpu.memory_space<vmem>>, vector<8x256xf32>
    %c0_1 = arith.constant 0 : index
    %c0_2 = arith.constant 0 : index
    %1 = vector.load %arg1[%c0_1, %c0_2] : memref<256x1024xbf16, #tpu.memory_space<vmem>>, vector<256x1024xbf16>
    %c0_3 = arith.constant 0 : index
    %c0_4 = arith.constant 0 : index
    %2 = vector.load %arg2[%c0_3, %c0_4] : memref<1x1024xf32, #tpu.memory_space<vmem>>, vector<1x1024xf32>
    %3 = arith.truncf %0 : vector<8x256xf32> to vector<8x256xbf16>
    %cst = arith.constant dense<0.000000e+00> : vector<8x1024xf32>
    %4 = tpu.matmul %3, %1, %cst {dimension_numbers = #tpu.dot_dimension_numbers<[1], [0], [0], [1], [0, 0, 1, 1], [], []>} : vector<8x256xbf16>, vector<256x1024xbf16>, vector<8x1024xf32> -> vector<8x1024xf32>
    %5 = vector.broadcast %2 : vector<1x1024xf32> to vector<8x1024xf32>
    %6 = arith.addf %4, %5 : vector<8x1024xf32>
    %cst_5 = arith.constant 0.000000e+00 : f32
    %7 = vector.broadcast %cst_5 : f32 to vector<8x1024xf32>
    %8 = arith.cmpf oge, %6, %7 : vector<8x1024xf32>
    %cst_6 = arith.constant 2.000000e-01 : f32
    %9 = vector.broadcast %cst_6 : f32 to vector<8x1024xf32>
    %10 = arith.mulf %9, %6 : vector<8x1024xf32>
    %11 = arith.select %8, %6, %10 : vector<8x1024xi1>, vector<8x1024xf32>
    %c0_7 = arith.constant 0 : index
    %c0_8 = arith.constant 0 : index
    %12 = vector.load %arg3[%c0_7, %c0_8] : memref<1024x512xbf16, #tpu.memory_space<vmem>>, vector<1024x512xbf16>
    %c0_9 = arith.constant 0 : index
    %c0_10 = arith.constant 0 : index
    %13 = vector.load %arg4[%c0_9, %c0_10] : memref<1x512xf32, #tpu.memory_space<vmem>>, vector<1x512xf32>
    %14 = arith.truncf %11 : vector<8x1024xf32> to vector<8x1024xbf16>
    %cst_11 = arith.constant dense<0.000000e+00> : vector<8x512xf32>
    %15 = tpu.matmul %14, %12, %cst_11 {dimension_numbers = #tpu.dot_dimension_numbers<[1], [0], [0], [1], [0, 0, 1, 1], [], []>} : vector<8x1024xbf16>, vector<1024x512xbf16>, vector<8x512xf32> -> vector<8x512xf32>
    %16 = vector.broadcast %13 : vector<1x512xf32> to vector<8x512xf32>
    %17 = arith.addf %15, %16 : vector<8x512xf32>
    %c0_12 = arith.constant 0 : index
    %c0_13 = arith.constant 0 : index
    %18 = vector.load %arg5[%c0_12, %c0_13] : memref<1x512xf32, #tpu.memory_space<vmem>>, vector<1x512xf32>
    %c0_14 = arith.constant 0 : index
    %c0_15 = arith.constant 0 : index
    %19 = vector.load %arg6[%c0_14, %c0_15] : memref<1x512xf32, #tpu.memory_space<vmem>>, vector<1x512xf32>
    %cst_16 = arith.constant dense<0.000000e+00> : vector<512xf32>
    %20 = vector.multi_reduction <add>, %17, %cst_16 [0] : vector<8x512xf32> to vector<512xf32>
    %21 = vector.shape_cast %20 : vector<512xf32> to vector<1x512xf32>
    %cst_17 = arith.constant 8.000000e+00 : f32
    %22 = vector.broadcast %cst_17 : f32 to vector<1x512xf32>
    %23 = arith.divf %21, %22 : vector<1x512xf32>
    %24 = vector.broadcast %23 : vector<1x512xf32> to vector<8x512xf32>
    %25 = arith.subf %17, %24 : vector<8x512xf32>
    %26 = arith.mulf %25, %25 : vector<8x512xf32>
    %cst_18 = arith.constant dense<0.000000e+00> : vector<512xf32>
    %27 = vector.multi_reduction <add>, %26, %cst_18 [0] : vector<8x512xf32> to vector<512xf32>
    %28 = vector.shape_cast %27 : vector<512xf32> to vector<1x512xf32>
    %cst_19 = arith.constant 8.000000e+00 : f32
    %29 = vector.broadcast %cst_19 : f32 to vector<1x512xf32>
    %30 = arith.divf %28, %29 : vector<1x512xf32>
    %31 = vector.broadcast %23 : vector<1x512xf32> to vector<8x512xf32>
    %32 = arith.subf %17, %31 : vector<8x512xf32>
    %cst_20 = arith.constant 9.99999974E-6 : f32
    %33 = vector.broadcast %cst_20 : f32 to vector<1x512xf32>
    %34 = arith.addf %30, %33 : vector<1x512xf32>
    %35 = math.rsqrt %34 : vector<1x512xf32>
    %36 = vector.broadcast %35 : vector<1x512xf32> to vector<8x512xf32>
    %37 = arith.mulf %32, %36 : vector<8x512xf32>
    %38 = vector.broadcast %18 : vector<1x512xf32> to vector<8x512xf32>
    %39 = arith.mulf %37, %38 : vector<8x512xf32>
    %40 = vector.broadcast %19 : vector<1x512xf32> to vector<8x512xf32>
    %41 = arith.addf %39, %40 : vector<8x512xf32>
    %cst_21 = arith.constant 0.000000e+00 : f32
    %42 = vector.broadcast %cst_21 : f32 to vector<8x512xf32>
    %43 = arith.cmpf oge, %41, %42 : vector<8x512xf32>
    %cst_22 = arith.constant 2.000000e-01 : f32
    %44 = vector.broadcast %cst_22 : f32 to vector<8x512xf32>
    %45 = arith.mulf %44, %41 : vector<8x512xf32>
    %46 = arith.select %43, %41, %45 : vector<8x512xi1>, vector<8x512xf32>
    %c0_23 = arith.constant 0 : index
    %c0_24 = arith.constant 0 : index
    %47 = vector.load %arg7[%c0_23, %c0_24] : memref<512x256xbf16, #tpu.memory_space<vmem>>, vector<512x256xbf16>
    %c0_25 = arith.constant 0 : index
    %c0_26 = arith.constant 0 : index
    %48 = vector.load %arg8[%c0_25, %c0_26] : memref<1x256xf32, #tpu.memory_space<vmem>>, vector<1x256xf32>
    %49 = arith.truncf %46 : vector<8x512xf32> to vector<8x512xbf16>
    %cst_27 = arith.constant dense<0.000000e+00> : vector<8x256xf32>
    %50 = tpu.matmul %49, %47, %cst_27 {dimension_numbers = #tpu.dot_dimension_numbers<[1], [0], [0], [1], [0, 0, 1, 1], [], []>} : vector<8x512xbf16>, vector<512x256xbf16>, vector<8x256xf32> -> vector<8x256xf32>
    %51 = vector.broadcast %48 : vector<1x256xf32> to vector<8x256xf32>
    %52 = arith.addf %50, %51 : vector<8x256xf32>
    %c0_28 = arith.constant 0 : index
    %c0_29 = arith.constant 0 : index
    %53 = vector.load %arg9[%c0_28, %c0_29] : memref<1x256xf32, #tpu.memory_space<vmem>>, vector<1x256xf32>
    %c0_30 = arith.constant 0 : index
    %c0_31 = arith.constant 0 : index
    %54 = vector.load %arg10[%c0_30, %c0_31] : memref<1x256xf32, #tpu.memory_space<vmem>>, vector<1x256xf32>
    %cst_32 = arith.constant dense<0.000000e+00> : vector<256xf32>
    %55 = vector.multi_reduction <add>, %52, %cst_32 [0] : vector<8x256xf32> to vector<256xf32>
    %56 = vector.shape_cast %55 : vector<256xf32> to vector<1x256xf32>
    %cst_33 = arith.constant 8.000000e+00 : f32
    %57 = vector.broadcast %cst_33 : f32 to vector<1x256xf32>
    %58 = arith.divf %56, %57 : vector<1x256xf32>
    %59 = vector.broadcast %58 : vector<1x256xf32> to vector<8x256xf32>
    %60 = arith.subf %52, %59 : vector<8x256xf32>
    %61 = arith.mulf %60, %60 : vector<8x256xf32>
    %cst_34 = arith.constant dense<0.000000e+00> : vector<256xf32>
    %62 = vector.multi_reduction <add>, %61, %cst_34 [0] : vector<8x256xf32> to vector<256xf32>
    %63 = vector.shape_cast %62 : vector<256xf32> to vector<1x256xf32>
    %cst_35 = arith.constant 8.000000e+00 : f32
    %64 = vector.broadcast %cst_35 : f32 to vector<1x256xf32>
    %65 = arith.divf %63, %64 : vector<1x256xf32>
    %66 = vector.broadcast %58 : vector<1x256xf32> to vector<8x256xf32>
    %67 = arith.subf %52, %66 : vector<8x256xf32>
    %cst_36 = arith.constant 9.99999974E-6 : f32
    %68 = vector.broadcast %cst_36 : f32 to vector<1x256xf32>
    %69 = arith.addf %65, %68 : vector<1x256xf32>
    %70 = math.rsqrt %69 : vector<1x256xf32>
    %71 = vector.broadcast %70 : vector<1x256xf32> to vector<8x256xf32>
    %72 = arith.mulf %67, %71 : vector<8x256xf32>
    %73 = vector.broadcast %53 : vector<1x256xf32> to vector<8x256xf32>
    %74 = arith.mulf %72, %73 : vector<8x256xf32>
    %75 = vector.broadcast %54 : vector<1x256xf32> to vector<8x256xf32>
    %76 = arith.addf %74, %75 : vector<8x256xf32>
    %cst_37 = arith.constant 0.000000e+00 : f32
    %77 = vector.broadcast %cst_37 : f32 to vector<8x256xf32>
    %78 = arith.cmpf oge, %76, %77 : vector<8x256xf32>
    %cst_38 = arith.constant 2.000000e-01 : f32
    %79 = vector.broadcast %cst_38 : f32 to vector<8x256xf32>
    %80 = arith.mulf %79, %76 : vector<8x256xf32>
    %81 = arith.select %78, %76, %80 : vector<8x256xi1>, vector<8x256xf32>
    %c0_39 = arith.constant 0 : index
    %c0_40 = arith.constant 0 : index
    %82 = vector.load %arg11[%c0_39, %c0_40] : memref<256x128xbf16, #tpu.memory_space<vmem>>, vector<256x128xbf16>
    %c0_41 = arith.constant 0 : index
    %c0_42 = arith.constant 0 : index
    %83 = vector.load %arg12[%c0_41, %c0_42] : memref<1x128xf32, #tpu.memory_space<vmem>>, vector<1x128xf32>
    %84 = arith.truncf %81 : vector<8x256xf32> to vector<8x256xbf16>
    %cst_43 = arith.constant dense<0.000000e+00> : vector<8x128xf32>
    %85 = tpu.matmul %84, %82, %cst_43 {dimension_numbers = #tpu.dot_dimension_numbers<[1], [0], [0], [1], [0, 0, 1, 1], [], []>} : vector<8x256xbf16>, vector<256x128xbf16>, vector<8x128xf32> -> vector<8x128xf32>
    %86 = vector.broadcast %83 : vector<1x128xf32> to vector<8x128xf32>
    %87 = arith.addf %85, %86 : vector<8x128xf32>
    %c0_44 = arith.constant 0 : index
    %c0_45 = arith.constant 0 : index
    %88 = vector.load %arg13[%c0_44, %c0_45] : memref<1x128xf32, #tpu.memory_space<vmem>>, vector<1x128xf32>
    %c0_46 = arith.constant 0 : index
    %c0_47 = arith.constant 0 : index
    %89 = vector.load %arg14[%c0_46, %c0_47] : memref<1x128xf32, #tpu.memory_space<vmem>>, vector<1x128xf32>
    %cst_48 = arith.constant dense<0.000000e+00> : vector<128xf32>
    %90 = vector.multi_reduction <add>, %87, %cst_48 [0] : vector<8x128xf32> to vector<128xf32>
    %91 = vector.shape_cast %90 : vector<128xf32> to vector<1x128xf32>
    %cst_49 = arith.constant 8.000000e+00 : f32
    %92 = vector.broadcast %cst_49 : f32 to vector<1x128xf32>
    %93 = arith.divf %91, %92 : vector<1x128xf32>
    %94 = vector.broadcast %93 : vector<1x128xf32> to vector<8x128xf32>
    %95 = arith.subf %87, %94 : vector<8x128xf32>
    %96 = arith.mulf %95, %95 : vector<8x128xf32>
    %cst_50 = arith.constant dense<0.000000e+00> : vector<128xf32>
    %97 = vector.multi_reduction <add>, %96, %cst_50 [0] : vector<8x128xf32> to vector<128xf32>
    %98 = vector.shape_cast %97 : vector<128xf32> to vector<1x128xf32>
    %cst_51 = arith.constant 8.000000e+00 : f32
    %99 = vector.broadcast %cst_51 : f32 to vector<1x128xf32>
    %100 = arith.divf %98, %99 : vector<1x128xf32>
    %101 = vector.broadcast %93 : vector<1x128xf32> to vector<8x128xf32>
    %102 = arith.subf %87, %101 : vector<8x128xf32>
    %cst_52 = arith.constant 9.99999974E-6 : f32
    %103 = vector.broadcast %cst_52 : f32 to vector<1x128xf32>
    %104 = arith.addf %100, %103 : vector<1x128xf32>
    %105 = math.rsqrt %104 : vector<1x128xf32>
    %106 = vector.broadcast %105 : vector<1x128xf32> to vector<8x128xf32>
    %107 = arith.mulf %102, %106 : vector<8x128xf32>
    %108 = vector.broadcast %88 : vector<1x128xf32> to vector<8x128xf32>
    %109 = arith.mulf %107, %108 : vector<8x128xf32>
    %110 = vector.broadcast %89 : vector<1x128xf32> to vector<8x128xf32>
    %111 = arith.addf %109, %110 : vector<8x128xf32>
    %cst_53 = arith.constant 0.000000e+00 : f32
    %112 = vector.broadcast %cst_53 : f32 to vector<8x128xf32>
    %113 = arith.cmpf oge, %111, %112 : vector<8x128xf32>
    %cst_54 = arith.constant 2.000000e-01 : f32
    %114 = vector.broadcast %cst_54 : f32 to vector<8x128xf32>
    %115 = arith.mulf %114, %111 : vector<8x128xf32>
    %116 = arith.select %113, %111, %115 : vector<8x128xi1>, vector<8x128xf32>
    %c0_55 = arith.constant 0 : index
    %c0_56 = arith.constant 0 : index
    %117 = vector.load %arg15[%c0_55, %c0_56] : memref<128x128xbf16, #tpu.memory_space<vmem>>, vector<128x128xbf16>
    %c0_57 = arith.constant 0 : index
    %c0_58 = arith.constant 0 : index
    %118 = vector.load %arg16[%c0_57, %c0_58] : memref<1x128xf32, #tpu.memory_space<vmem>>, vector<1x128xf32>
    %119 = arith.truncf %116 : vector<8x128xf32> to vector<8x128xbf16>
    %cst_59 = arith.constant dense<0.000000e+00> : vector<8x128xf32>
    %120 = tpu.matmul %119, %117, %cst_59 {dimension_numbers = #tpu.dot_dimension_numbers<[1], [0], [0], [1], [0, 0, 1, 1], [], []>} : vector<8x128xbf16>, vector<128x128xbf16>, vector<8x128xf32> -> vector<8x128xf32>
    %121 = vector.broadcast %118 : vector<1x128xf32> to vector<8x128xf32>
    %122 = arith.addf %120, %121 : vector<8x128xf32>
    %cst_60 = arith.constant 0.000000e+00 : f32
    %123 = vector.broadcast %cst_60 : f32 to vector<8x128xf32>
    %124 = arith.cmpf oge, %122, %123 : vector<8x128xf32>
    %cst_61 = arith.constant 2.000000e-01 : f32
    %125 = vector.broadcast %cst_61 : f32 to vector<8x128xf32>
    %126 = arith.mulf %125, %122 : vector<8x128xf32>
    %127 = arith.select %124, %122, %126 : vector<8x128xi1>, vector<8x128xf32>
    %128 = vector.extract_strided_slice %127 {offsets = [0, 0], sizes = [8, 32], strides = [1, 1]} : vector<8x128xf32> to vector<8x32xf32>
    %c0_62 = arith.constant 0 : index
    %c0_63 = arith.constant 0 : index
    %129 = vector.load %arg33[%c0_62, %c0_63] : memref<8x32xf32, #tpu.memory_space<vmem>>, vector<8x32xf32>
    tpu.vector_store %arg33[%c0_62, %c0_63], %128 {strides = array<i32>} : memref<8x32xf32, #tpu.memory_space<vmem>>, vector<8x32xf32>,
    %c0_64 = arith.constant 0 : index
    %c0_65 = arith.constant 0 : index
    %130 = vector.load %arg17[%c0_64, %c0_65] : memref<128x128xbf16, #tpu.memory_space<vmem>>, vector<128x128xbf16>
    %c0_66 = arith.constant 0 : index
    %c0_67 = arith.constant 0 : index
    %131 = vector.load %arg18[%c0_66, %c0_67] : memref<1x128xf32, #tpu.memory_space<vmem>>, vector<1x128xf32>
    %132 = arith.truncf %127 : vector<8x128xf32> to vector<8x128xbf16>
    %cst_68 = arith.constant dense<0.000000e+00> : vector<8x128xf32>
    %133 = tpu.matmul %132, %130, %cst_68 {dimension_numbers = #tpu.dot_dimension_numbers<[1], [0], [0], [1], [0, 0, 1, 1], [], []>} : vector<8x128xbf16>, vector<128x128xbf16>, vector<8x128xf32> -> vector<8x128xf32>
    %134 = vector.broadcast %131 : vector<1x128xf32> to vector<8x128xf32>
    %135 = arith.addf %133, %134 : vector<8x128xf32>
    %cst_69 = arith.constant 0.000000e+00 : f32
    %136 = vector.broadcast %cst_69 : f32 to vector<8x128xf32>
    %137 = arith.cmpf oge, %135, %136 : vector<8x128xf32>
    %cst_70 = arith.constant 2.000000e-01 : f32
    %138 = vector.broadcast %cst_70 : f32 to vector<8x128xf32>
    %139 = arith.mulf %138, %135 : vector<8x128xf32>
    %140 = arith.select %137, %135, %139 : vector<8x128xi1>, vector<8x128xf32>
    %c0_71 = arith.constant 0 : index
    %c0_72 = arith.constant 0 : index
    %141 = vector.load %arg19[%c0_71, %c0_72] : memref<128x256xbf16, #tpu.memory_space<vmem>>, vector<128x256xbf16>
    %c0_73 = arith.constant 0 : index
    %c0_74 = arith.constant 0 : index
    %142 = vector.load %arg20[%c0_73, %c0_74] : memref<1x256xf32, #tpu.memory_space<vmem>>, vector<1x256xf32>
    %143 = arith.truncf %140 : vector<8x128xf32> to vector<8x128xbf16>
    %cst_75 = arith.constant dense<0.000000e+00> : vector<8x256xf32>
    %144 = tpu.matmul %143, %141, %cst_75 {dimension_numbers = #tpu.dot_dimension_numbers<[1], [0], [0], [1], [0, 0, 1, 1], [], []>} : vector<8x128xbf16>, vector<128x256xbf16>, vector<8x256xf32> -> vector<8x256xf32>
    %145 = vector.broadcast %142 : vector<1x256xf32> to vector<8x256xf32>
    %146 = arith.addf %144, %145 : vector<8x256xf32>
    %c0_76 = arith.constant 0 : index
    %c0_77 = arith.constant 0 : index
    %147 = vector.load %arg21[%c0_76, %c0_77] : memref<1x256xf32, #tpu.memory_space<vmem>>, vector<1x256xf32>
    %c0_78 = arith.constant 0 : index
    %c0_79 = arith.constant 0 : index
    %148 = vector.load %arg22[%c0_78, %c0_79] : memref<1x256xf32, #tpu.memory_space<vmem>>, vector<1x256xf32>
    %cst_80 = arith.constant dense<0.000000e+00> : vector<256xf32>
    %149 = vector.multi_reduction <add>, %146, %cst_80 [0] : vector<8x256xf32> to vector<256xf32>
    %150 = vector.shape_cast %149 : vector<256xf32> to vector<1x256xf32>
    %cst_81 = arith.constant 8.000000e+00 : f32
    %151 = vector.broadcast %cst_81 : f32 to vector<1x256xf32>
    %152 = arith.divf %150, %151 : vector<1x256xf32>
    %153 = vector.broadcast %152 : vector<1x256xf32> to vector<8x256xf32>
    %154 = arith.subf %146, %153 : vector<8x256xf32>
    %155 = arith.mulf %154, %154 : vector<8x256xf32>
    %cst_82 = arith.constant dense<0.000000e+00> : vector<256xf32>
    %156 = vector.multi_reduction <add>, %155, %cst_82 [0] : vector<8x256xf32> to vector<256xf32>
    %157 = vector.shape_cast %156 : vector<256xf32> to vector<1x256xf32>
    %cst_83 = arith.constant 8.000000e+00 : f32
    %158 = vector.broadcast %cst_83 : f32 to vector<1x256xf32>
    %159 = arith.divf %157, %158 : vector<1x256xf32>
    %160 = vector.broadcast %152 : vector<1x256xf32> to vector<8x256xf32>
    %161 = arith.subf %146, %160 : vector<8x256xf32>
    %cst_84 = arith.constant 9.99999974E-6 : f32
    %162 = vector.broadcast %cst_84 : f32 to vector<1x256xf32>
    %163 = arith.addf %159, %162 : vector<1x256xf32>
    %164 = math.rsqrt %163 : vector<1x256xf32>
    %165 = vector.broadcast %164 : vector<1x256xf32> to vector<8x256xf32>
    %166 = arith.mulf %161, %165 : vector<8x256xf32>
    %167 = vector.broadcast %147 : vector<1x256xf32> to vector<8x256xf32>
    %168 = arith.mulf %166, %167 : vector<8x256xf32>
    %169 = vector.broadcast %148 : vector<1x256xf32> to vector<8x256xf32>
    %170 = arith.addf %168, %169 : vector<8x256xf32>
    %cst_85 = arith.constant 0.000000e+00 : f32
    %171 = vector.broadcast %cst_85 : f32 to vector<8x256xf32>
    %172 = arith.cmpf oge, %170, %171 : vector<8x256xf32>
    %cst_86 = arith.constant 2.000000e-01 : f32
    %173 = vector.broadcast %cst_86 : f32 to vector<8x256xf32>
    %174 = arith.mulf %173, %170 : vector<8x256xf32>
    %175 = arith.select %172, %170, %174 : vector<8x256xi1>, vector<8x256xf32>
    %c0_87 = arith.constant 0 : index
    %c0_88 = arith.constant 0 : index
    %176 = vector.load %arg23[%c0_87, %c0_88] : memref<256x512xbf16, #tpu.memory_space<vmem>>, vector<256x512xbf16>
    %c0_89 = arith.constant 0 : index
    %c0_90 = arith.constant 0 : index
    %177 = vector.load %arg24[%c0_89, %c0_90] : memref<1x512xf32, #tpu.memory_space<vmem>>, vector<1x512xf32>
    %178 = arith.truncf %175 : vector<8x256xf32> to vector<8x256xbf16>
    %cst_91 = arith.constant dense<0.000000e+00> : vector<8x512xf32>
    %179 = tpu.matmul %178, %176, %cst_91 {dimension_numbers = #tpu.dot_dimension_numbers<[1], [0], [0], [1], [0, 0, 1, 1], [], []>} : vector<8x256xbf16>, vector<256x512xbf16>, vector<8x512xf32> -> vector<8x512xf32>
    %180 = vector.broadcast %177 : vector<1x512xf32> to vector<8x512xf32>
    %181 = arith.addf %179, %180 : vector<8x512xf32>
    %c0_92 = arith.constant 0 : index
    %c0_93 = arith.constant 0 : index
    %182 = vector.load %arg25[%c0_92, %c0_93] : memref<1x512xf32, #tpu.memory_space<vmem>>, vector<1x512xf32>
    %c0_94 = arith.constant 0 : index
    %c0_95 = arith.constant 0 : index
    %183 = vector.load %arg26[%c0_94, %c0_95] : memref<1x512xf32, #tpu.memory_space<vmem>>, vector<1x512xf32>
    %cst_96 = arith.constant dense<0.000000e+00> : vector<512xf32>
    %184 = vector.multi_reduction <add>, %181, %cst_96 [0] : vector<8x512xf32> to vector<512xf32>
    %185 = vector.shape_cast %184 : vector<512xf32> to vector<1x512xf32>
    %cst_97 = arith.constant 8.000000e+00 : f32
    %186 = vector.broadcast %cst_97 : f32 to vector<1x512xf32>
    %187 = arith.divf %185, %186 : vector<1x512xf32>
    %188 = vector.broadcast %187 : vector<1x512xf32> to vector<8x512xf32>
    %189 = arith.subf %181, %188 : vector<8x512xf32>
    %190 = arith.mulf %189, %189 : vector<8x512xf32>
    %cst_98 = arith.constant dense<0.000000e+00> : vector<512xf32>
    %191 = vector.multi_reduction <add>, %190, %cst_98 [0] : vector<8x512xf32> to vector<512xf32>
    %192 = vector.shape_cast %191 : vector<512xf32> to vector<1x512xf32>
    %cst_99 = arith.constant 8.000000e+00 : f32
    %193 = vector.broadcast %cst_99 : f32 to vector<1x512xf32>
    %194 = arith.divf %192, %193 : vector<1x512xf32>
    %195 = vector.broadcast %187 : vector<1x512xf32> to vector<8x512xf32>
    %196 = arith.subf %181, %195 : vector<8x512xf32>
    %cst_100 = arith.constant 9.99999974E-6 : f32
    %197 = vector.broadcast %cst_100 : f32 to vector<1x512xf32>
    %198 = arith.addf %194, %197 : vector<1x512xf32>
    %199 = math.rsqrt %198 : vector<1x512xf32>
    %200 = vector.broadcast %199 : vector<1x512xf32> to vector<8x512xf32>
    %201 = arith.mulf %196, %200 : vector<8x512xf32>
    %202 = vector.broadcast %182 : vector<1x512xf32> to vector<8x512xf32>
    %203 = arith.mulf %201, %202 : vector<8x512xf32>
    %204 = vector.broadcast %183 : vector<1x512xf32> to vector<8x512xf32>
    %205 = arith.addf %203, %204 : vector<8x512xf32>
    %cst_101 = arith.constant 0.000000e+00 : f32
    %206 = vector.broadcast %cst_101 : f32 to vector<8x512xf32>
    %207 = arith.cmpf oge, %205, %206 : vector<8x512xf32>
    %cst_102 = arith.constant 2.000000e-01 : f32
    %208 = vector.broadcast %cst_102 : f32 to vector<8x512xf32>
    %209 = arith.mulf %208, %205 : vector<8x512xf32>
    %210 = arith.select %207, %205, %209 : vector<8x512xi1>, vector<8x512xf32>
    %c0_103 = arith.constant 0 : index
    %c0_104 = arith.constant 0 : index
    %211 = vector.load %arg27[%c0_103, %c0_104] : memref<512x1024xbf16, #tpu.memory_space<vmem>>, vector<512x1024xbf16>
    %c0_105 = arith.constant 0 : index
    %c0_106 = arith.constant 0 : index
    %212 = vector.load %arg28[%c0_105, %c0_106] : memref<1x1024xf32, #tpu.memory_space<vmem>>, vector<1x1024xf32>
    %213 = arith.truncf %210 : vector<8x512xf32> to vector<8x512xbf16>
    %cst_107 = arith.constant dense<0.000000e+00> : vector<8x1024xf32>
    %214 = tpu.matmul %213, %211, %cst_107 {dimension_numbers = #tpu.dot_dimension_numbers<[1], [0], [0], [1], [0, 0, 1, 1], [], []>} : vector<8x512xbf16>, vector<512x1024xbf16>, vector<8x1024xf32> -> vector<8x1024xf32>
    %215 = vector.broadcast %212 : vector<1x1024xf32> to vector<8x1024xf32>
    %216 = arith.addf %214, %215 : vector<8x1024xf32>
    %c0_108 = arith.constant 0 : index
    %c0_109 = arith.constant 0 : index
    %217 = vector.load %arg29[%c0_108, %c0_109] : memref<1x1024xf32, #tpu.memory_space<vmem>>, vector<1x1024xf32>
    %c0_110 = arith.constant 0 : index
    %c0_111 = arith.constant 0 : index
    %218 = vector.load %arg30[%c0_110, %c0_111] : memref<1x1024xf32, #tpu.memory_space<vmem>>, vector<1x1024xf32>
    %cst_112 = arith.constant dense<0.000000e+00> : vector<1024xf32>
    %219 = vector.multi_reduction <add>, %216, %cst_112 [0] : vector<8x1024xf32> to vector<1024xf32>
    %220 = vector.shape_cast %219 : vector<1024xf32> to vector<1x1024xf32>
    %cst_113 = arith.constant 8.000000e+00 : f32
    %221 = vector.broadcast %cst_113 : f32 to vector<1x1024xf32>
    %222 = arith.divf %220, %221 : vector<1x1024xf32>
    %223 = vector.broadcast %222 : vector<1x1024xf32> to vector<8x1024xf32>
    %224 = arith.subf %216, %223 : vector<8x1024xf32>
    %225 = arith.mulf %224, %224 : vector<8x1024xf32>
    %cst_114 = arith.constant dense<0.000000e+00> : vector<1024xf32>
    %226 = vector.multi_reduction <add>, %225, %cst_114 [0] : vector<8x1024xf32> to vector<1024xf32>
    %227 = vector.shape_cast %226 : vector<1024xf32> to vector<1x1024xf32>
    %cst_115 = arith.constant 8.000000e+00 : f32
    %228 = vector.broadcast %cst_115 : f32 to vector<1x1024xf32>
    %229 = arith.divf %227, %228 : vector<1x1024xf32>
    %230 = vector.broadcast %222 : vector<1x1024xf32> to vector<8x1024xf32>
    %231 = arith.subf %216, %230 : vector<8x1024xf32>
    %cst_116 = arith.constant 9.99999974E-6 : f32
    %232 = vector.broadcast %cst_116 : f32 to vector<1x1024xf32>
    %233 = arith.addf %229, %232 : vector<1x1024xf32>
    %234 = math.rsqrt %233 : vector<1x1024xf32>
    %235 = vector.broadcast %234 : vector<1x1024xf32> to vector<8x1024xf32>
    %236 = arith.mulf %231, %235 : vector<8x1024xf32>
    %237 = vector.broadcast %217 : vector<1x1024xf32> to vector<8x1024xf32>
    %238 = arith.mulf %236, %237 : vector<8x1024xf32>
    %239 = vector.broadcast %218 : vector<1x1024xf32> to vector<8x1024xf32>
    %240 = arith.addf %238, %239 : vector<8x1024xf32>
    %cst_117 = arith.constant 0.000000e+00 : f32
    %241 = vector.broadcast %cst_117 : f32 to vector<8x1024xf32>
    %242 = arith.cmpf oge, %240, %241 : vector<8x1024xf32>
    %cst_118 = arith.constant 2.000000e-01 : f32
    %243 = vector.broadcast %cst_118 : f32 to vector<8x1024xf32>
    %244 = arith.mulf %243, %240 : vector<8x1024xf32>
    %245 = arith.select %242, %240, %244 : vector<8x1024xi1>, vector<8x1024xf32>
    %c0_119 = arith.constant 0 : index
    %c0_120 = arith.constant 0 : index
    %246 = vector.load %arg31[%c0_119, %c0_120] : memref<1024x256xbf16, #tpu.memory_space<vmem>>, vector<1024x256xbf16>
    %c0_121 = arith.constant 0 : index
    %c0_122 = arith.constant 0 : index
    %247 = vector.load %arg32[%c0_121, %c0_122] : memref<1x256xf32, #tpu.memory_space<vmem>>, vector<1x256xf32>
    %248 = arith.truncf %245 : vector<8x1024xf32> to vector<8x1024xbf16>
    %cst_123 = arith.constant dense<0.000000e+00> : vector<8x256xf32>
    %249 = tpu.matmul %248, %246, %cst_123 {dimension_numbers = #tpu.dot_dimension_numbers<[1], [0], [0], [1], [0, 0, 1, 1], [], []>} : vector<8x1024xbf16>, vector<1024x256xbf16>, vector<8x256xf32> -> vector<8x256xf32>
    %250 = vector.broadcast %247 : vector<1x256xf32> to vector<8x256xf32>
    %251 = arith.addf %249, %250 : vector<8x256xf32>
    %252 = arith.negf %251 : vector<8x256xf32>
    %253 = math.exp %252 : vector<8x256xf32>
    %cst_124 = arith.constant 1.000000e+00 : f32
    %254 = vector.broadcast %cst_124 : f32 to vector<8x256xf32>
    %255 = arith.addf %254, %253 : vector<8x256xf32>
    %256 = arith.divf %254, %255 : vector<8x256xf32>
    %c0_125 = arith.constant 0 : index
    %c0_126 = arith.constant 0 : index
    %257 = vector.load %arg34[%c0_125, %c0_126] : memref<8x256xf32, #tpu.memory_space<vmem>>, vector<8x256xf32>
    tpu.vector_store %arg34[%c0_125, %c0_126], %256 {strides = array<i32>} : memref<8x256xf32, #tpu.memory_space<vmem>>, vector<8x256xf32>,
    return
  }
}

</mosaic_0001>

<bundles_post_ra>
// kernel: ae_forward.1
= control target key start
LH: loop header
LB: loop body
LE: loop exit
PB: predicated region body
PF: predicated region fallthrough
CT: control target
= control target key end

     0   :  { %s10912_s6 = smov 1   ;;  %s10913_s10 = smov 2   ;;  %s11522_s0 = inlined_call_operand.smem [shape: u32[35], index: -1, kind: input, shape index: {}] }
   0x1   :  { %s10986_s5 = sld [smem:[%s11522_s0]]   ;;  %s10914_s14 = smov 3  }
   0x2   :  { %s10991_s9 = sld [smem:[%s11522_s0 + %s10912_s6]]   ;;  %s10915_s18 = smov 4  }
   0x3   :  { %s10996_s13 = sld [smem:[%s11522_s0 + %s10913_s10]]   ;;  %s10916_s22 = smov 5  }
   0x4   :  { %s11001_s17 = sld [smem:[%s11522_s0 + %s10914_s14]]   ;;  %s10917_s26 = smov 6  }
   0x5   :  { %s11006_s21 = sld [smem:[%s11522_s0 + %s10915_s18]]   ;;  %s10918_s30 = smov 7  }
   0x6   :  { %s11011_s25 = sld [smem:[%s11522_s0 + %s10916_s22]]   ;;  %s10919_s4 = smov 8  }
   0x7   :  { %11525 = sst [smem:[#allocation47_spill]] %s10986_s5  ;;  %s10920_s10 = smov 9  }
   0x8   :  { %s11016_s29 = sld [smem:[%s11522_s0 + %s10917_s26]]   ;;  %s10921_s15 = smov 10  }
   0x9   :  { %11526 = sst [smem:[#allocation48_spill]] %s10996_s13  ;;  %s10922_s20 = smov 11  }
   0xa   :  { %s11021_s3 = sld [smem:[%s11522_s0 + %s10918_s30]]   ;;  %s10923_s26 = smov 12  }
   0xb   :  { %s11026_s8 = sld [smem:[%s11522_s0 + %s10919_s4]]   ;;  %s10924_s1 = smov 13  }
   0xc   :  { %s11031_s14 = sld [smem:[%s11522_s0 + %s10920_s10]]   ;;  %s10925_s7 = smov 14  }
   0xd   :  { %s11036_s19 = sld [smem:[%s11522_s0 + %s10921_s15]]   ;;  %s10926_s15 = smov 15  }
   0xe   :  { %s11041_s24 = sld [smem:[%s11522_s0 + %s10922_s20]]   ;;  %s10927_s22 = smov 16  }
   0xf   :  { %s11046_s30 = sld [smem:[%s11522_s0 + %s10923_s26]]   ;;  %s10928_s28 = smov 17  }
  0x10   :  { %s11051_s6 = sld [smem:[%s11522_s0 + %s10924_s1]]  }
  0x11   :  { %s11056_s12 = sld [smem:[%s11522_s0 + %s10925_s7]]   ;;  %s10929_s7 = smov 18  }
  0x12   :  { %s11061_s20 = sld [smem:[%s11522_s0 + %s10926_s15]]   ;;  %s10930_s15 = smov 19  }
  0x13   :  { %s11066_s27 = sld [smem:[%s11522_s0 + %s10927_s22]]   ;;  %s10931_s22 = smov 20  }
  0x14   :  { %11527 = sst [smem:[#allocation49_spill]] %s11041_s24 }
  0x15   :  { %s11071_s4 = sld [smem:[%s11522_s0 + %s10928_s28]]   ;;  %s10932_s28 = smov 21  }
  0x16   :  { %11528 = sst [smem:[#allocation50_spill]] %s11051_s6 }
  0x17   :  { %s11076_s24 = sld [smem:[%s11522_s0 + %s10929_s7]]   ;;  %s10933_s7 = smov 22  }
  0x18   :  { %11529 = sst [smem:[#allocation51_spill]] %s11061_s20 }
  0x19   :  { %s11081_s13 = sld [smem:[%s11522_s0 + %s10930_s15]]   ;;  %s10934_s15 = smov 23  }
  0x1a   :  { %s11086_s5 = sld [smem:[%s11522_s0 + %s10931_s22]]   ;;  %s10935_s22 = smov 24  }
  0x1b   :  { %11530 = sst [smem:[#allocation52_spill]] %s11071_s4 }
  0x1c   :  { %s11091_s4 = sld [smem:[%s11522_s0 + %s10932_s28]]   ;;  %s10936_s28 = smov 25  }
  0x1d   :  { %s11096_s20 = sld [smem:[%s11522_s0 + %s10933_s7]]   ;;  %s10937_s7 = smov 26  }
  0x1f   :  { %11531 = sst [smem:[#allocation53_spill]] %s11081_s13 }
  0x20   :  { %11532 = sst [smem:[#allocation54_spill]] %s11086_s5 }
  0x21   :  { %s11101_s13 = sld [smem:[%s11522_s0 + %s10934_s15]]   ;;  %s10938_s15 = smov 27  }
  0x22   :  { %11533 = sst [smem:[#allocation55_spill]] %s11091_s4 }
  0x23   :  { %11534 = sst [smem:[#allocation56_spill]] %s11096_s20 }
  0x24   :  { %s11106_s5 = sld [smem:[%s11522_s0 + %s10935_s22]]   ;;  %s10939_s22 = smov 28  }
  0x25   :  { %s11111_s4 = sld [smem:[%s11522_s0 + %s10936_s28]]   ;;  %s10940_s28 = smov 29  }
  0x26   :  { %s11116_s20 = sld [smem:[%s11522_s0 + %s10937_s7]]   ;;  %s10941_s7 = smov 30  }
  0x27   :  { %s11121_s6 = sld [smem:[%s11522_s0 + %s10938_s15]]   ;;  %s10942_s15 = smov 31  }
  0x2a   :  { %11535 = sst [smem:[#allocation57_spill]] %s11106_s5 }
  0x2b   :  { %11536 = sst [smem:[#allocation58_spill]] %s11111_s4 }
  0x2c   :  { %11537 = sst [smem:[#allocation59_spill]] %s11116_s20 }
  0x2d   :  { %11538 = sst [smem:[#allocation60_spill]] %s11121_s6 }
  0x2e   :  { %s11126_s5 = sld [smem:[%s11522_s0 + %s10939_s22]]   ;;  %s10943_s22 = smov 32  }
  0x2f   :  { %s11131_s4 = sld [smem:[%s11522_s0 + %s10940_s28]]   ;;  %s10944_s28 = smov 33  }
  0x30   :  { %s11136_s20 = sld [smem:[%s11522_s0 + %s10941_s7]]   ;;  %s10945_s7 = smov 34  }
  0x31   :  { %s11141_s6 = sld [smem:[%s11522_s0 + %s10942_s15]]  }
  0x34   :  { %11539 = sst [smem:[#allocation61_spill]] %s11126_s5 }
  0x35   :  { %11540 = sst [smem:[#allocation62_spill]] %s11131_s4 }
  0x36   :  { %11541 = sst [smem:[#allocation63_spill]] %s11136_s20 }
  0x37   :  { %s11146_s5 = sld [smem:[%s11522_s0 + %s10943_s22]]  }
  0x38   :  { %s11151_s4 = sld [smem:[%s11522_s0 + %s10944_s28]]  }
  0x39   :  { %s11156_s20 = sld [smem:[%s11522_s0 + %s10945_s7]]  }
  0x3a   :  { %75 = vsyncpa [#allocation3], 0 }
  0x3b   :  { %76 = vsyncpa [#allocation6], 0 }
  0x3c   :  { %77 = vsyncpa [#allocation9], 0 }
  0x3d   :  { %78 = vsyncpa [#allocation12], 0 }
  0x3e   :  { %79 = vsyncpa [#allocation15], 0 }
  0x3f   :  { %80 = vsyncpa [#allocation18], 0 }
  0x40   :  { %81 = vsyncpa [#allocation21], 0 }
  0x41   :  { %82 = vsyncpa [#allocation24], 0 }
  0x42   :  { %83 = vsyncpa [#allocation27], 0 }
  0x43   :  { %84 = vsyncpa [#allocation30], 0 }
  0x44   :  { %85 = vsyncpa [#allocation33], 0 }
  0x45   :  { %86 = vsyncpa [#allocation4], 0  ;;  %s10946_s15 = smov [#allocation5]  }
  0x46   :  { %s108_s16 = sshll.u32 %s10946_s15, 4  ;;  %s109_s16 = int_to_ptr.vmem [resolvable:$true] %s108_s16 }
  0x47   :  { %s10476_s18 = scalar_lea.vmem %s109_s16, 32768  ;;  %p10481_p1 = scmp.lt.s32.totalorder %s109_s16, %s109_s16 }
  0x48   :  { %p10477_p0 = scmp.ne.s32.totalorder %s109_s16, %s10476_s18  ;;  %p10482_p2 = scmp.lt.s32.totalorder %s10476_s18, %s10476_s18 }
  0x4a   :  { %p10483_p3 = por %p10482_p2, %p10481_p1 }
  0x4c   :  { %p10484_p4 = pnand %p10483_p3, %p10477_p0 }
  0x4e   :  { %10487 = shalt.err (!%p10484_p4)
}
  0x4f   :  { %s10947_s0 = smov 256   ;;  %s10948_s22 = smov 16  }
  0x50   :  { %114 = dma.hbm_to_vmem [thread:$0]  %s11001_s17, 32768, %s109_s16, [#allocation6], %s10947_s0, %s10947_s0, %s10948_s22  }
  0x51   :  { %s10949_s23 = smov [#allocation8]   ;;  %s10950_s28 = smov [#allocation11]  }
  0x52   :  { %s131_s26 = sshll.u32 %s10949_s23, 4  ;;  %s150_s1 = sshll.u32 %s10950_s28, 4  ;;  %s132_s26 = int_to_ptr.vmem [resolvable:$true] %s131_s26  ;;  %s151_s1 = int_to_ptr.vmem [resolvable:$true] %s150_s1 }
  0x53   :  { %s10496_s2 = scalar_lea.vmem %s132_s26, 64  ;;  %p10501_p6 = scmp.lt.s32.totalorder %s132_s26, %s132_s26 }
  0x54   :  { %p10497_p5 = scmp.ne.s32.totalorder %s132_s26, %s10496_s2  ;;  %p10502_p7 = scmp.lt.s32.totalorder %s10496_s2, %s10496_s2 }
  0x56   :  { %p10503_p8 = por %p10502_p7, %p10501_p6 }
  0x58   :  { %p10504_p9 = pnand %p10503_p8, %p10497_p5 }
  0x5a   :  { %10507 = shalt.err (!%p10504_p9)
}
  0x5b   :  { %134 = dma.hbm_to_vmem [thread:$0]  %s11011_s25, 64, %s132_s26, [#allocation9]  }
  0x5c   :  { %s10516_s7 = scalar_lea.vmem %s151_s1, 8192  ;;  %p10521_p11 = scmp.lt.s32.totalorder %s151_s1, %s151_s1 }
  0x5d   :  { %p10517_p10 = scmp.ne.s32.totalorder %s151_s1, %s10516_s7  ;;  %p10522_p12 = scmp.lt.s32.totalorder %s10516_s7, %s10516_s7 }
  0x5f   :  { %p10523_p13 = por %p10522_p12, %p10521_p11 }
  0x61   :  { %p10524_p0 = pnand %p10523_p13, %p10517_p10 }
  0x63   :  { %10527 = shalt.err (!%p10524_p0)
}
  0x64   :  { %s10951_s17 = smov 128   ;;  %s10952_s10 = smov 8  }
  0x65   :  { %156 = dma.hbm_to_vmem [thread:$0]  %s11021_s3, 8192, %s151_s1, [#allocation12], %s10951_s17, %s10951_s17, %s10952_s10  }
  0x66   :  { %s10953_s11 = smov [#allocation14]   ;;  %s10954_s16 = smov [#allocation17]  }
  0x67   :  { %s173_s15 = sshll.u32 %s10953_s11, 4  ;;  %s195_s25 = sshll.u32 %s10954_s16, 4  ;;  %s174_s15 = int_to_ptr.vmem [resolvable:$true] %s173_s15  ;;  %s196_s25 = int_to_ptr.vmem [resolvable:$true] %s195_s25 }
  0x68   :  { %s10536_s18 = scalar_lea.vmem %s174_s15, 32  ;;  %p10541_p2 = scmp.lt.s32.totalorder %s174_s15, %s174_s15 }
  0x69   :  { %p10537_p1 = scmp.ne.s32.totalorder %s174_s15, %s10536_s18  ;;  %p10542_p3 = scmp.lt.s32.totalorder %s10536_s18, %s10536_s18 }
  0x6b   :  { %p10543_p4 = por %p10542_p3, %p10541_p2 }
  0x6d   :  { %p10544_p5 = pnand %p10543_p4, %p10537_p1 }
  0x6f   :  { %10547 = shalt.err (!%p10544_p5)
}
  0x70   :  { %176 = dma.hbm_to_vmem [thread:$0]  %s11031_s14, 32, %s174_s15, [#allocation15]  }
  0x71   :  { %s10556_s23 = scalar_lea.vmem %s196_s25, 16  ;;  %s10560_s26 = scalar_lea.vmem %s196_s25, 32 }
  0x72   :  { %p10557_p6 = scmp.ne.s32.totalorder %s196_s25, %s10556_s23  ;;  %p10561_p7 = scmp.lt.s32.totalorder %s196_s25, %s196_s25 }
  0x73   :  { %p10562_p8 = scmp.lt.s32.totalorder %s10560_s26, %s10556_s23 }
  0x75   :  { %p10563_p9 = por %p10562_p8, %p10561_p7 }
  0x77   :  { %p10564_p10 = pnand %p10563_p9, %p10557_p6 }
  0x79   :  { %10567 = shalt.err (!%p10564_p10)
}
  0x7a   :  { %198 = dma.hbm_to_vmem [thread:$0]  %s11046_s30, 16, %s196_s25, [#allocation18]  }
  0x7b   :  { %s10955_s3 = smov [#allocation20]   ;;  %s10956_s1 = smov [#allocation23]  }
  0x7c   :  { %s215_s28 = sshll.u32 %s10955_s3, 4  ;;  %s237_s2 = sshll.u32 %s10956_s1, 4  ;;  %s216_s28 = int_to_ptr.vmem [resolvable:$true] %s215_s28  ;;  %s238_s2 = int_to_ptr.vmem [resolvable:$true] %s237_s2 }
  0x7d   :  { %s10576_s7 = scalar_lea.vmem %s216_s28, 16  ;;  %s10580_s11 = scalar_lea.vmem %s216_s28, 32 }
  0x7e   :  { %p10577_p11 = scmp.ne.s32.totalorder %s216_s28, %s10576_s7  ;;  %p10581_p12 = scmp.lt.s32.totalorder %s216_s28, %s216_s28 }
  0x7f   :  { %p10582_p13 = scmp.lt.s32.totalorder %s10580_s11, %s10576_s7 }
  0x81   :  { %p10583_p0 = por %p10582_p13, %p10581_p12 }
  0x83   :  { %p10584_p1 = pnand %p10583_p0, %p10577_p11 }
  0x85   :  { %10587 = shalt.err (!%p10584_p1)
}
  0x86   :  { %218 = dma.hbm_to_vmem [thread:$0]  %s11056_s12, 16, %s216_s28, [#allocation21]  }
  0x87   :  { %s10596_s14 = scalar_lea.vmem %s238_s2, 16  ;;  %s10600_s15 = scalar_lea.vmem %s238_s2, 32 }
  0x88   :  { %p10597_p2 = scmp.ne.s32.totalorder %s238_s2, %s10596_s14  ;;  %p10601_p3 = scmp.lt.s32.totalorder %s238_s2, %s238_s2 }
  0x89   :  { %p10602_p4 = scmp.lt.s32.totalorder %s10600_s15, %s10596_s14 }
  0x8b   :  { %p10603_p5 = por %p10602_p4, %p10601_p3 }
  0x8d   :  { %p10604_p6 = pnand %p10603_p5, %p10597_p2 }
  0x8f   :  { %10607 = shalt.err (!%p10604_p6)
}
  0x90   :  { %240 = dma.hbm_to_vmem [thread:$0]  %s11066_s27, 16, %s238_s2, [#allocation24]  }
  0x91   :  { %s10957_s30 = smov [#allocation26]   ;;  %s10958_s25 = smov [#allocation29]  }
  0x92   :  { %s259_s16 = sshll.u32 %s10957_s30, 4  ;;  %s286_s18 = sshll.u32 %s10958_s25, 4  ;;  %s260_s16 = int_to_ptr.vmem [resolvable:$true] %s259_s16  ;;  %s287_s18 = int_to_ptr.vmem [resolvable:$true] %s286_s18 }
  0x93   :  { %s10616_s23 = scalar_lea.vmem %s260_s16, 16  ;;  %s10620_s26 = scalar_lea.vmem %s260_s16, 32 }
  0x94   :  { %p10617_p7 = scmp.ne.s32.totalorder %s260_s16, %s10616_s23  ;;  %p10621_p8 = scmp.lt.s32.totalorder %s260_s16, %s260_s16 }
  0x95   :  { %p10622_p9 = scmp.lt.s32.totalorder %s10620_s26, %s10616_s23 }
  0x97   :  { %p10623_p10 = por %p10622_p9, %p10621_p8 }
  0x99   :  { %p10624_p11 = pnand %p10623_p10, %p10617_p7 }
  0x9b   :  { %10627 = shalt.err (!%p10624_p11)
}
  0x9c   :  { %262 = dma.hbm_to_vmem [thread:$0]  %s11076_s24, 16, %s260_s16, [#allocation27]  }
  0x9d   :  { %s10636_s12 = scalar_lea.vmem %s287_s18, 8192  ;;  %p10641_p13 = scmp.lt.s32.totalorder %s287_s18, %s287_s18 }
  0x9e   :  { %p10637_p12 = scmp.ne.s32.totalorder %s287_s18, %s10636_s12  ;;  %p10642_p0 = scmp.lt.s32.totalorder %s10636_s12, %s10636_s12 }
  0xa0   :  { %p10643_p1 = por %p10642_p0, %p10641_p13 }
  0xa2   :  { %p10644_p2 = pnand %p10643_p1, %p10637_p12 }
  0xa4   :  { %10647 = shalt.err (!%p10644_p2)
}
  0xa5   :  { %292 = dma.hbm_to_vmem [thread:$0]  %s11101_s13, 8192, %s287_s18, [#allocation30], %s10947_s0, %s10947_s0, %s10948_s22  }
  0xa6   :  { %s10959_s27 = smov [#allocation2]  }
  0xa7   :  { %s94_s3 = sshll.u32 %s10959_s27, 4  ;;  %s95_s3 = int_to_ptr.vmem [resolvable:$true] %s94_s3 }
  0xa8   :  { %s10656_s28 = scalar_lea.vmem %s95_s3, 16384  ;;  %p10661_p4 = scmp.lt.s32.totalorder %s95_s3, %s95_s3 }
  0xa9   :  { %p10657_p3 = scmp.ne.s32.totalorder %s95_s3, %s10656_s28  ;;  %p10662_p5 = scmp.lt.s32.totalorder %s10656_s28, %s10656_s28 }
  0xab   :  { %p10663_p6 = por %p10662_p5, %p10661_p4 }
  0xad   :  { %p10664_p7 = pnand %p10663_p6, %p10657_p3 }
  0xaf   :  { %10667 = shalt.err (!%p10664_p7)
}
  0xb0   :  { %s10960_s24 = smov 512   ;;  %s10961_s1 = smov 32  }
  0xb1   :  { %100 = dma.hbm_to_vmem [thread:$0]  %s10991_s9, 16384, %s95_s3, [#allocation3], %s10960_s24, %s10960_s24, %s10961_s1  }
  0xb2   :  { %s10962_s2 = smov [#allocation7]   ;;  %s10963_s13 = smov [#allocation10]  }
  0xb3   :  { %s121_s7 = sshll.u32 %s10962_s2, 4  ;;  %s141_s0 = sshll.u32 %s10963_s13, 4  ;;  %s122_s7 = int_to_ptr.vmem [resolvable:$true] %s121_s7  ;;  %s142_s0 = int_to_ptr.vmem [resolvable:$true] %s141_s0 }
  0xb4   :  { %s10676_s22 = scalar_lea.vmem %s122_s7, 64  ;;  %p10681_p9 = scmp.lt.s32.totalorder %s122_s7, %s122_s7 }
  0xb5   :  { %p10677_p8 = scmp.ne.s32.totalorder %s122_s7, %s10676_s22  ;;  %p10682_p10 = scmp.lt.s32.totalorder %s10676_s22, %s10676_s22 }
  0xb7   :  { %p10683_p11 = por %p10682_p10, %p10681_p9 }
  0xb9   :  { %p10684_p12 = pnand %p10683_p11, %p10677_p8 }
  0xbb   :  { %10687 = shalt.err (!%p10684_p12)
}
  0xbc   :  { %124 = dma.hbm_to_vmem [thread:$0]  %s11006_s21, 64, %s122_s7, [#allocation6]  }
  0xbd   :  { %s10696_s11 = scalar_lea.vmem %s142_s0, 64  ;;  %p10701_p0 = scmp.lt.s32.totalorder %s142_s0, %s142_s0 }
  0xbe   :  { %p10697_p13 = scmp.ne.s32.totalorder %s142_s0, %s10696_s11  ;;  %p10702_p1 = scmp.lt.s32.totalorder %s10696_s11, %s10696_s11 }
  0xc0   :  { %p10703_p2 = por %p10702_p1, %p10701_p0 }
  0xc2   :  { %p10704_p3 = pnand %p10703_p2, %p10697_p13 }
  0xc4   :  { %10707 = shalt.err (!%p10704_p3)
}
  0xc5   :  { %144 = dma.hbm_to_vmem [thread:$0]  %s11016_s29, 64, %s142_s0, [#allocation9]  }
  0xc6   :  { %s10964_s9 = smov [#allocation13]   ;;  %s10965_s15 = smov [#allocation16]  }
  0xc7   :  { %s163_s14 = sshll.u32 %s10964_s9, 4  ;;  %s183_s30 = sshll.u32 %s10965_s15, 4  ;;  %s164_s14 = int_to_ptr.vmem [resolvable:$true] %s163_s14  ;;  %s184_s30 = int_to_ptr.vmem [resolvable:$true] %s183_s30 }
  0xc8   :  { %s10716_s16 = scalar_lea.vmem %s164_s14, 32  ;;  %p10721_p5 = scmp.lt.s32.totalorder %s164_s14, %s164_s14 }
  0xc9   :  { %p10717_p4 = scmp.ne.s32.totalorder %s164_s14, %s10716_s16  ;;  %p10722_p6 = scmp.lt.s32.totalorder %s10716_s16, %s10716_s16 }
  0xcb   :  { %p10723_p7 = por %p10722_p6, %p10721_p5 }
  0xcd   :  { %p10724_p8 = pnand %p10723_p7, %p10717_p4 }
  0xcf   :  { %10727 = shalt.err (!%p10724_p8)
}
  0xd0   :  { %166 = dma.hbm_to_vmem [thread:$0]  %s11026_s8, 32, %s164_s14, [#allocation12]  }
  0xd1   :  { %s10736_s21 = scalar_lea.vmem %s184_s30, 32  ;;  %p10741_p10 = scmp.lt.s32.totalorder %s184_s30, %s184_s30 }
  0xd2   :  { %p10737_p9 = scmp.ne.s32.totalorder %s184_s30, %s10736_s21  ;;  %p10742_p11 = scmp.lt.s32.totalorder %s10736_s21, %s10736_s21 }
  0xd4   :  { %p10743_p12 = por %p10742_p11, %p10741_p10 }
  0xd6   :  { %p10744_p13 = pnand %p10743_p12, %p10737_p9 }
  0xd8   :  { %10747 = shalt.err (!%p10744_p13)
}
  0xd9   :  { %186 = dma.hbm_to_vmem [thread:$0]  %s11036_s19, 32, %s184_s30, [#allocation15]  }
  0xda   :  { %s10966_s29 = smov [#allocation19]   ;;  %s10967_s18 = smov [#allocation22]  }
  0xdb   :  { %s205_s25 = sshll.u32 %s10966_s29, 4  ;;  %s224_s23 = sshll.u32 %s10967_s18, 4  ;;  %s206_s25 = int_to_ptr.vmem [resolvable:$true] %s205_s25  ;;  %s225_s23 = int_to_ptr.vmem [resolvable:$true] %s224_s23 }
  0xdc   :  { %s10756_s26 = scalar_lea.vmem %s206_s25, 16  ;;  %s10760_s12 = scalar_lea.vmem %s206_s25, 32 }
  0xdd   :  { %p10757_p0 = scmp.ne.s32.totalorder %s206_s25, %s10756_s26  ;;  %p10761_p1 = scmp.lt.s32.totalorder %s206_s25, %s206_s25 }
  0xde   :  { %p10762_p2 = scmp.lt.s32.totalorder %s10760_s12, %s10756_s26 }
  0xe0   :  { %p10763_p3 = por %p10762_p2, %p10761_p1 }
  0xe2   :  { %p10764_p4 = pnand %p10763_p3, %p10757_p0 }
  0xe4   :  { %10767 = shalt.err (!%p10764_p4)
}
  0xe5   :  { %s11542_s8 = sld [smem:[#allocation50_spill]]  ;;  %s10776_s27 = scalar_lea.vmem %s225_s23, 1024 }
  0xe6   :  { %p10777_p5 = scmp.ne.s32.totalorder %s225_s23, %s10776_s27  ;;  %p10781_p6 = scmp.lt.s32.totalorder %s225_s23, %s225_s23 }
  0xe7   :  { %p10782_p7 = scmp.lt.s32.totalorder %s10776_s27, %s10776_s27 }
  0xe9   :  { %p10783_p8 = por %p10782_p7, %p10781_p6 }
  0xeb   :  { %208 = dma.hbm_to_vmem [thread:$0]  %s11542_s8, 16, %s206_s25, [#allocation18]  }
  0xec   :  { %p10784_p9 = pnand %p10783_p8, %p10777_p5 }
  0xee   :  { %10787 = shalt.err (!%p10784_p9)
}
  0xef   :  { %s10968_s19 = smov 64   ;;  %s11543_s3 = sld [smem:[#allocation51_spill]] }
  0xf0   :  { %s10969_s28 = smov 4   ;;  %s10970_s2 = smov [#allocation25]  }
  0xf1   :  { %s246_s7 = sshll.u32 %s10970_s2, 4  ;;  %s10971_s13 = smov [#allocation28]   ;;  %s247_s7 = int_to_ptr.vmem [resolvable:$true] %s246_s7 }
  0xf2   :  { %s268_s0 = sshll.u32 %s10971_s13, 4  ;;  %s10796_s22 = scalar_lea.vmem %s247_s7, 1024  ;;  %s269_s0 = int_to_ptr.vmem [resolvable:$true] %s268_s0 }
  0xf3   :  { %p10797_p10 = scmp.ne.s32.totalorder %s247_s7, %s10796_s22  ;;  %p10801_p11 = scmp.lt.s32.totalorder %s247_s7, %s247_s7 }
  0xf4   :  { %p10802_p12 = scmp.lt.s32.totalorder %s10796_s22, %s10796_s22 }
  0xf5   :  { %230 = dma.hbm_to_vmem [thread:$0]  %s11543_s3, 1024, %s225_s23, [#allocation21], %s10968_s19, %s10968_s19, %s10969_s28  }
  0xf6   :  { %p10803_p13 = por %p10802_p12, %p10801_p11 }
  0xf8   :  { %p10804_p0 = pnand %p10803_p13, %p10797_p10 }
  0xfa   :  { %10807 = shalt.err (!%p10804_p0)
}
  0xfb   :  { %s11544_s11 = sld [smem:[#allocation52_spill]]  ;;  %s10816_s9 = scalar_lea.vmem %s269_s0, 2048 }
  0xfc   :  { %p10817_p1 = scmp.ne.s32.totalorder %s269_s0, %s10816_s9  ;;  %p10821_p2 = scmp.lt.s32.totalorder %s269_s0, %s269_s0 }
  0xfd   :  { %p10822_p3 = scmp.lt.s32.totalorder %s10816_s9, %s10816_s9 }
  0xff   :  { %p10823_p4 = por %p10822_p3, %p10821_p2 }
 0x101   :  { %252 = dma.hbm_to_vmem [thread:$0]  %s11544_s11, 1024, %s247_s7, [#allocation24], %s10968_s19, %s10968_s19, %s10969_s28  }
 0x102   :  { %p10824_p5 = pnand %p10823_p4, %p10817_p1 }
 0x104   :  { %10827 = shalt.err (!%p10824_p5)
}
 0x105   :  { %s11545_s14 = sld [smem:[#allocation53_spill]]  ;;  %s10972_s15 = smov [#allocation31]  }
 0x106   :  { %s304_s30 = sshll.u32 %s10972_s15, 4  ;;  %s10973_s16 = smov [#allocation32]   ;;  %s305_s30 = int_to_ptr.vmem [resolvable:$true] %s304_s30 }
 0x107   :  { %s322_s21 = sshll.u32 %s10973_s16, 4  ;;  %s10836_s29 = scalar_lea.vmem %s305_s30, 32768  ;;  %s323_s21 = int_to_ptr.vmem [resolvable:$true] %s322_s21 }
 0x108   :  { %p10837_p6 = scmp.ne.s32.totalorder %s305_s30, %s10836_s29  ;;  %p10841_p7 = scmp.lt.s32.totalorder %s305_s30, %s305_s30 }
 0x109   :  { %p10842_p8 = scmp.lt.s32.totalorder %s10836_s29, %s10836_s29 }
 0x10b   :  { %274 = dma.hbm_to_vmem [thread:$0]  %s11545_s14, 2048, %s269_s0, [#allocation27], %s10951_s17, %s10951_s17, %s10952_s10  }
 0x10c   :  { %p10843_p9 = por %p10842_p8, %p10841_p7 }
 0x10e   :  { %p10844_p10 = pnand %p10843_p9, %p10837_p6 }
 0x110   :  { %10847 = shalt.err (!%p10844_p10)
}
 0x111   :  { %s11546_s25 = sld [smem:[#allocation60_spill]]  ;;  %s10856_s18 = scalar_lea.vmem %s323_s21, 16384 }
 0x112   :  { %p10857_p11 = scmp.ne.s32.totalorder %s323_s21, %s10856_s18  ;;  %p10861_p12 = scmp.lt.s32.totalorder %s323_s21, %s323_s21 }
 0x113   :  { %p10862_p13 = scmp.lt.s32.totalorder %s10856_s18, %s10856_s18 }
 0x115   :  { %p10863_p0 = por %p10862_p13, %p10861_p12 }
 0x117   :  { %310 = dma.hbm_to_vmem [thread:$0]  %s11546_s25, 32768, %s305_s30, [#allocation30], %s10960_s24, %s10960_s24, %s10961_s1  }
 0x118   :  { %p10864_p1 = pnand %p10863_p0, %p10857_p11 }
 0x11a   :  { %10867 = shalt.err (!%p10864_p1)
}
 0x11b   :  { %328 = dma.hbm_to_vmem [thread:$0]  %s11141_s6, 16384, %s323_s21, [#allocation33], %s10951_s17, %s10951_s17, %s10952_s10  }
 0x11c   :  { %10888 = dma.done.wait [#allocation3], 16384  }
 0x11d   :  { %10889 = vsyncadd [#allocation3], 4294950912 }
 0x11e   :  { %10890 = dma.done.wait [#allocation6], 32832  }
 0x11f   :  { %10891 = vsyncadd [#allocation6], 4294934464 }
 0x120   :  { %10892 = dma.done.wait [#allocation9], 128  }
 0x121   :  { %10893 = vsyncadd [#allocation9], 4294967168 }
 0x122   :  { %10894 = dma.done.wait [#allocation12], 8224  }
 0x123   :  { %10895 = vsyncadd [#allocation12], 4294959072 }
 0x124   :  { %10896 = dma.done.wait [#allocation15], 64  }
 0x125   :  { %10897 = vsyncadd [#allocation15], 4294967232 }
 0x126   :  { %10898 = dma.done.wait [#allocation18], 32  }
 0x127   :  { %10899 = vsyncadd [#allocation18], 4294967264 }
 0x128   :  { %10900 = dma.done.wait [#allocation21], 1040  }
 0x129   :  { %10901 = vsyncadd [#allocation21], 4294966256 }
 0x12a   :  { %10902 = dma.done.wait [#allocation24], 1040  }
 0x12b   :  { %10903 = vsyncadd [#allocation24], 4294966256 }
 0x12c   :  { %10904 = dma.done.wait [#allocation27], 2064  }
 0x12d   :  { %10905 = vsyncadd [#allocation27], 4294965232 }
 0x12e   :  { %10906 = dma.done.wait [#allocation30], 40960  }
 0x12f   :  { %10907 = vsyncadd [#allocation30], 4294926336 }
 0x130   :  { %10908 = dma.done.wait [#allocation33], 16384  }
 0x131   :  { %10909 = vsyncadd [#allocation33], 4294950912  ;;  %v450_v0 = vld [vmem:[#allocation2 + $0x1c0] sm:$0xff]  ;;  %v451_v2 = vld [vmem:[#allocation2 + $0x1c8] sm:$0xff]  ;;  %s11547_s6 = sld [smem:[#allocation47_spill]]  ;;  %vm10975_vm14 = vmmov 0  }
 0x132   :  { %v454_v1 = vld [vmem:[#allocation2 + $0x1e0] sm:$0xff]  ;;  %v455_v4 = vld [vmem:[#allocation2 + $0x1e8] sm:$0xff]  ;;  %s11548_s17 = sld [smem:[#allocation48_spill]]  ;;  %s10977_s28 = smov [#allocation34]  }
 0x133   :  { %v8554_v3 = vcombine.high %v450_v0, %v454_v1  ;;  %v8553_v5 = vcombine.low %v450_v0, %v454_v1  ;;  %v442_v6 = vld [vmem:[#allocation2 + $0x180] sm:$0xff]  ;;  %v8556_v8 = vcombine.high %v451_v2, %v455_v4  ;;  %v8555_v9 = vcombine.low %v451_v2, %v455_v4  ;;  %v443_v11 = vld [vmem:[#allocation2 + $0x188] sm:$0xff]  ;;  %s11549_s10 = sld [smem:[#allocation49_spill]]  ;;  %s8440_s2 = sshll.u32 %s10977_s28, 4  ;;  %s8441_s2 = int_to_ptr.vmem [resolvable:$true] %s8440_s2 }
 0x134   :  { %v446_v7 = vld [vmem:[#allocation2 + $0x1a0] sm:$0xff]  ;;  %v447_v12 = vld [vmem:[#allocation2 + $0x1a8] sm:$0xff]  ;;  %s11550_s24 = sld [smem:[#allocation54_spill]]  ;;  %s10868_s7 = scalar_lea.vmem %s8441_s2, 128 }
 0x135   :  { %v8546_v10 = vcombine.high %v442_v6, %v446_v7  ;;  %v434_v13 = vld [vmem:[#allocation2 + $0x140] sm:$0xff]  ;;  %1206 = vmatprep.subr.bf16.mxu0 %v8554_v3  ;;  %v8548_v14 = vcombine.high %v443_v11, %v447_v12  ;;  %v435_v16 = vld [vmem:[#allocation2 + $0x148] sm:$0xff]  ;;  %1247 = vmatprep.subr.bf16.mxu1 %v8556_v8  ;;  %v8545_v18 = vcombine.low %v442_v6, %v446_v7  ;;  %s11551_s1 = sld [smem:[#allocation55_spill]]  ;;  %p10869_p2 = scmp.ne.s32.totalorder %s8441_s2, %s10868_s7 }
 0x136   :  { %v438_v15 = vld [vmem:[#allocation2 + $0x160] sm:$0xff]  ;;  %v439_v17 = vld [vmem:[#allocation2 + $0x168] sm:$0xff]  ;;  %1207 = vmatpush1.bf16.msra.mxu0 %v8553_v5  ;;  %1248 = vmatpush1.bf16.msra.mxu1 %v8555_v9  ;;  %v8547_v19 = vcombine.low %v443_v11, %v447_v12  ;;  %s11552_s23 = sld [smem:[#allocation56_spill]]  ;;  %p10873_p3 = scmp.lt.s32.totalorder %s8441_s2, %s8441_s2 }
 0x137   :  { %1208 = vmatprep.subr.bf16.mxu0 %v8546_v10  ;;  %v8538_v20 = vcombine.high %v434_v13, %v438_v15  ;;  %1249 = vmatprep.subr.bf16.mxu1 %v8548_v14  ;;  %v8540_v21 = vcombine.high %v435_v16, %v439_v17  ;;  %v426_v22 = vld [vmem:[#allocation2 + $0x100] sm:$0xff]  ;;  %v427_v24 = vld [vmem:[#allocation2 + $0x108] sm:$0xff]  ;;  %v8537_v26 = vcombine.low %v434_v13, %v438_v15  ;;  %s11553_s26 = sld [smem:[#allocation57_spill]]  ;;  %p10874_p4 = scmp.lt.s32.totalorder %s10868_s7, %s10868_s7 }
 0x138   :  { %v430_v23 = vld [vmem:[#allocation2 + $0x120] sm:$0xff]  ;;  %v431_v25 = vld [vmem:[#allocation2 + $0x128] sm:$0xff]  ;;  %v8539_v27 = vcombine.low %v435_v16, %v439_v17  ;;  %s11554_s12 = sld [smem:[#allocation58_spill]] }
 0x139   :  { %v8530_v28 = vcombine.high %v426_v22, %v430_v23  ;;  %v8532_v29 = vcombine.high %v427_v24, %v431_v25  ;;  %v418_v30 = vld [vmem:[#allocation2 + $0xc0] sm:$0xff]  ;;  %v419_v32 = vld [vmem:[#allocation2 + $0xc8] sm:$0xff]  ;;  %v8529_v34 = vcombine.low %v426_v22, %v430_v23  ;;  %v8531_v35 = vcombine.low %v427_v24, %v431_v25  ;;  %s11555_s8 = sld [smem:[#allocation59_spill]]  ;;  %p10875_p5 = por %p10874_p4, %p10873_p3 }
 0x13a   :  { %1209 = vmatpush1.bf16.msra.mxu0 %v8545_v18  ;;  %1250 = vmatpush1.bf16.msra.mxu1 %v8547_v19  ;;  %v422_v31 = vld [vmem:[#allocation2 + $0xe0] sm:$0xff]  ;;  %v423_v33 = vld [vmem:[#allocation2 + $0xe8] sm:$0xff]  ;;  %s11556_s27 = sld [smem:[#allocation61_spill]] }
 0x13b   :  { %1210 = vmatprep.subr.bf16.mxu0 %v8538_v20  ;;  %1251 = vmatprep.subr.bf16.mxu1 %v8540_v21  ;;  %v8522_v36 = vcombine.high %v418_v30, %v422_v31  ;;  %v8524_v37 = vcombine.high %v419_v32, %v423_v33  ;;  %v410_v38 = vld [vmem:[#allocation2 + $0x80] sm:$0xff]  ;;  %v411_v40 = vld [vmem:[#allocation2 + $0x88] sm:$0xff]  ;;  %v8521_v42 = vcombine.low %v418_v30, %v422_v31  ;;  %s11557_s19 = sld [smem:[#allocation62_spill]]  ;;  %p10876_p6 = pnand %p10875_p5, %p10869_p2 }
 0x13c   :  { %v414_v39 = vld [vmem:[#allocation2 + $0xa0] sm:$0xff]  ;;  %v415_v41 = vld [vmem:[#allocation2 + $0xa8] sm:$0xff]  ;;  %v8523_v43 = vcombine.low %v419_v32, %v423_v33  ;;  %s11558_s3 = sld [smem:[#allocation63_spill]] }
 0x13d   :  { %v8514_v44 = vcombine.high %v410_v38, %v414_v39  ;;  %v8516_v45 = vcombine.high %v411_v40, %v415_v41  ;;  %v402_v46 = vld [vmem:[#allocation2 + $0x40] sm:$0xff]  ;;  %v403_v48 = vld [vmem:[#allocation2 + $0x48] sm:$0xff]  ;;  %v8513_v50 = vcombine.low %v410_v38, %v414_v39  ;;  %v8515_v51 = vcombine.low %v411_v40, %v415_v41 }
 0x13e   :  { %1211 = vmatpush1.bf16.msra.mxu0 %v8537_v26  ;;  %1252 = vmatpush1.bf16.msra.mxu1 %v8539_v27  ;;  %v406_v47 = vld [vmem:[#allocation2 + $0x60] sm:$0xff]  ;;  %v407_v49 = vld [vmem:[#allocation2 + $0x68] sm:$0xff] }
 0x13f   :  { %1212 = vmatprep.subr.bf16.mxu0 %v8530_v28  ;;  %1253 = vmatprep.subr.bf16.mxu1 %v8532_v29  ;;  %v8506_v52 = vcombine.high %v402_v46, %v406_v47  ;;  %v393_v53 = vld [vmem:[%s11547_s6 + $0x8] sm:$0xff]  ;;  %v8508_v54 = vcombine.high %v403_v48, %v407_v49  ;;  %v394_v55 = vld [vmem:[#allocation2] sm:$0xff]  ;;  %v8505_v60 = vcombine.low %v402_v46, %v406_v47 }
 0x140   :  { %v398_v56 = vld [vmem:[#allocation2 + $0x20] sm:$0xff]  ;;  %v11200_v57 = vpack.c.bf16 %v393_v53, %v393_v53  ;;  %v395_v58 = vld [vmem:[#allocation2 + $0x8] sm:$0xff]  ;;  %v8507_v61 = vcombine.low %v403_v48, %v407_v49 }
 0x141   :  { %v399_v59 = vld [vmem:[#allocation2 + $0x28] sm:$0xff]  ;;  %v8498_v62 = vcombine.high %v394_v55, %v398_v56  ;;  %v514_v0 = vld [vmem:[#allocation2 + $0x3c0] sm:$0xff]  ;;  %v8497_v4 = vcombine.low %v394_v55, %v398_v56 }
 0x142   :  { %1213 = vmatpush1.bf16.msra.mxu0 %v8529_v34  ;;  %1254 = vmatpush1.bf16.msra.mxu1 %v8531_v35  ;;  %v8500_v63 = vcombine.high %v395_v58, %v399_v59  ;;  %v518_v1 = vld [vmem:[#allocation2 + $0x3e0] sm:$0xff]  ;;  %v515_v2 = vld [vmem:[#allocation2 + $0x3c8] sm:$0xff]  ;;  %v8499_v5 = vcombine.low %v395_v58, %v399_v59 }
 0x143   :  { %1214 = vmatprep.subr.bf16.mxu0 %v8522_v36  ;;  %1255 = vmatprep.subr.bf16.mxu1 %v8524_v37  ;;  %v519_v3 = vld [vmem:[#allocation2 + $0x3e8] sm:$0xff]  ;;  %v8618_v6 = vcombine.high %v514_v0, %v518_v1  ;;  %v506_v8 = vld [vmem:[#allocation2 + $0x380] sm:$0xff]  ;;  %v8617_v12 = vcombine.low %v514_v0, %v518_v1  ;;  %v452_v0 = vld [vmem:[#allocation2 + $0x1d0] sm:$0xff] }
 0x144   :  { %1238 = vmatprep.mubr.bf16.mxu0 %v11200_v57  ;;  %1279 = vmatprep.mubr.bf16.mxu1 %v11200_v57  ;;  %v8620_v7 = vcombine.high %v515_v2, %v519_v3  ;;  %v510_v9 = vld [vmem:[#allocation2 + $0x3a0] sm:$0xff]  ;;  %v507_v10 = vld [vmem:[#allocation2 + $0x388] sm:$0xff]  ;;  %v8619_v13 = vcombine.low %v515_v2, %v519_v3  ;;  %v456_v1 = vld [vmem:[#allocation2 + $0x1f0] sm:$0xff] }
 0x145   :  { %v511_v11 = vld [vmem:[#allocation2 + $0x3a8] sm:$0xff]  ;;  %v8610_v14 = vcombine.high %v506_v8, %v510_v9  ;;  %v498_v16 = vld [vmem:[#allocation2 + $0x340] sm:$0xff]  ;;  %v8609_v20 = vcombine.low %v506_v8, %v510_v9  ;;  %v453_v3 = vld [vmem:[#allocation2 + $0x1d8] sm:$0xff]  ;;  %v8558_v8 = vcombine.high %v452_v0, %v456_v1 }
 0x146   :  { %1215 = vmatpush1.bf16.msra.mxu0 %v8521_v42  ;;  %1256 = vmatpush1.bf16.msra.mxu1 %v8523_v43  ;;  %v8612_v15 = vcombine.high %v507_v10, %v511_v11  ;;  %v502_v17 = vld [vmem:[#allocation2 + $0x360] sm:$0xff]  ;;  %v499_v18 = vld [vmem:[#allocation2 + $0x348] sm:$0xff]  ;;  %v8611_v21 = vcombine.low %v507_v10, %v511_v11  ;;  %v444_v9 = vld [vmem:[#allocation2 + $0x190] sm:$0xff] }
 0x147   :  { %1216 = vmatprep.subr.bf16.mxu0 %v8514_v44  ;;  %1257 = vmatprep.subr.bf16.mxu1 %v8516_v45  ;;  %v503_v19 = vld [vmem:[#allocation2 + $0x368] sm:$0xff]  ;;  %v8602_v22 = vcombine.high %v498_v16, %v502_v17  ;;  %v490_v24 = vld [vmem:[#allocation2 + $0x300] sm:$0xff]  ;;  %v8601_v28 = vcombine.low %v498_v16, %v502_v17  ;;  %v448_v10 = vld [vmem:[#allocation2 + $0x1b0] sm:$0xff] }
 0x148   :  { %v8604_v23 = vcombine.high %v499_v18, %v503_v19  ;;  %v494_v25 = vld [vmem:[#allocation2 + $0x320] sm:$0xff]  ;;  %v491_v26 = vld [vmem:[#allocation2 + $0x308] sm:$0xff]  ;;  %v8603_v29 = vcombine.low %v499_v18, %v503_v19  ;;  %v8550_v17 = vcombine.high %v444_v9, %v448_v10  ;;  %v436_v18 = vld [vmem:[#allocation2 + $0x150] sm:$0xff] }
 0x149   :  { %v495_v27 = vld [vmem:[#allocation2 + $0x328] sm:$0xff]  ;;  %v8594_v30 = vcombine.high %v490_v24, %v494_v25  ;;  %v482_v32 = vld [vmem:[#allocation2 + $0x2c0] sm:$0xff]  ;;  %v8593_v36 = vcombine.low %v490_v24, %v494_v25  ;;  %v440_v19 = vld [vmem:[#allocation2 + $0x170] sm:$0xff] }
 0x14a   :  { %1217 = vmatpush1.bf16.msra.mxu0 %v8513_v50  ;;  %1258 = vmatpush1.bf16.msra.mxu1 %v8515_v51  ;;  %v8596_v31 = vcombine.high %v491_v26, %v495_v27  ;;  %v486_v33 = vld [vmem:[#allocation2 + $0x2e0] sm:$0xff]  ;;  %v483_v34 = vld [vmem:[#allocation2 + $0x2c8] sm:$0xff]  ;;  %v8595_v37 = vcombine.low %v491_v26, %v495_v27  ;;  %v8542_v25 = vcombine.high %v436_v18, %v440_v19  ;;  %v428_v26 = vld [vmem:[#allocation2 + $0x110] sm:$0xff] }
 0x14b   :  { %1218 = vmatprep.subr.bf16.mxu0 %v8506_v52  ;;  %1259 = vmatprep.subr.bf16.mxu1 %v8508_v54  ;;  %v487_v35 = vld [vmem:[#allocation2 + $0x2e8] sm:$0xff]  ;;  %v8586_v38 = vcombine.high %v482_v32, %v486_v33  ;;  %v474_v39 = vld [vmem:[#allocation2 + $0x280] sm:$0xff]  ;;  %v8585_v44 = vcombine.low %v482_v32, %v486_v33  ;;  %v432_v27 = vld [vmem:[#allocation2 + $0x130] sm:$0xff] }
 0x14c   :  { %v478_v40 = vld [vmem:[#allocation2 + $0x2a0] sm:$0xff]  ;;  %v8588_v41 = vcombine.high %v483_v34, %v487_v35  ;;  %v475_v42 = vld [vmem:[#allocation2 + $0x288] sm:$0xff]  ;;  %v8587_v45 = vcombine.low %v483_v34, %v487_v35  ;;  %v8534_v33 = vcombine.high %v428_v26, %v432_v27  ;;  %v420_v34 = vld [vmem:[#allocation2 + $0xd0] sm:$0xff] }
 0x14d   :  { %v479_v43 = vld [vmem:[#allocation2 + $0x2a8] sm:$0xff]  ;;  %v8578_v46 = vcombine.high %v474_v39, %v478_v40  ;;  %v466_v47 = vld [vmem:[#allocation2 + $0x240] sm:$0xff]  ;;  %v8577_v52 = vcombine.low %v474_v39, %v478_v40  ;;  %v424_v35 = vld [vmem:[#allocation2 + $0xf0] sm:$0xff]  ;;  %v8533_v39 = vcombine.low %v428_v26, %v432_v27 }
 0x14e   :  { %1219 = vmatpush1.bf16.msra.mxu0 %v8505_v60  ;;  %1260 = vmatpush1.bf16.msra.mxu1 %v8507_v61  ;;  %v470_v48 = vld [vmem:[#allocation2 + $0x260] sm:$0xff]  ;;  %v8580_v49 = vcombine.high %v475_v42, %v479_v43  ;;  %v467_v50 = vld [vmem:[#allocation2 + $0x248] sm:$0xff]  ;;  %v8579_v53 = vcombine.low %v475_v42, %v479_v43  ;;  %v412_v42 = vld [vmem:[#allocation2 + $0x90] sm:$0xff] }
 0x14f   :  { %1220 = vmatprep.subr.bf16.mxu0 %v8498_v62  ;;  %1261 = vmatprep.subr.bf16.mxu1 %v8500_v63  ;;  %v471_v51 = vld [vmem:[#allocation2 + $0x268] sm:$0xff]  ;;  %v8570_v54 = vcombine.high %v466_v47, %v470_v48  ;;  %v458_v55 = vld [vmem:[#allocation2 + $0x200] sm:$0xff]  ;;  %v8569_v61 = vcombine.low %v466_v47, %v470_v48  ;;  %v404_v47 = vld [vmem:[#allocation2 + $0x50] sm:$0xff] }
 0x150   :  { %v462_v56 = vld [vmem:[#allocation2 + $0x220] sm:$0xff]  ;;  %v8572_v58 = vcombine.high %v467_v50, %v471_v51  ;;  %v459_v59 = vld [vmem:[#allocation2 + $0x208] sm:$0xff]  ;;  %v8571_v62 = vcombine.low %v467_v50, %v471_v51  ;;  %v408_v48 = vld [vmem:[#allocation2 + $0x70] sm:$0xff] }
 0x151   :  { %v463_v60 = vld [vmem:[#allocation2 + $0x228] sm:$0xff]  ;;  %v8562_v63 = vcombine.high %v458_v55, %v462_v56  ;;  %v405_v51 = vld [vmem:[#allocation2 + $0x58] sm:$0xff]  ;;  %v496_v26 = vld [vmem:[#allocation2 + $0x330] sm:$0xff] }
 0x152   :  { %1221 = vmatpush1.bf16.msra.mxu0 %v8497_v4  ;;  %1262 = vmatpush1.bf16.msra.mxu1 %v8499_v5  ;;  %v8564_v2 = vcombine.high %v459_v59, %v463_v60  ;;  %v457_v4 = vld [vmem:[#allocation2 + $0x1f8] sm:$0xff]  ;;  %v8561_v5 = vcombine.low %v458_v55, %v462_v56  ;;  %v396_v55 = vld [vmem:[#allocation2 + $0x10] sm:$0xff] }
 0x153   :  { %1222 = vmatprep.subr.bf16.mxu0 %v8618_v6  ;;  %1263 = vmatprep.subr.bf16.mxu1 %v8620_v7  ;;  %v392_v6 = vld [vmem:[%s11547_s6] sm:$0xff]  ;;  %v8563_v7 = vcombine.low %v459_v59, %v463_v60  ;;  %v8560_v11 = vcombine.high %v453_v3, %v457_v4  ;;  %v8559_v16 = vcombine.low %v453_v3, %v457_v4  ;;  %v400_v56 = vld [vmem:[#allocation2 + $0x30] sm:$0xff]  ;;  %v397_v60 = vld [vmem:[#allocation2 + $0x18] sm:$0xff] }
 0x154   :  { %v8510_v59 = vcombine.high %v404_v47, %v408_v48  ;;  %v8502_v3 = vcombine.high %v396_v55, %v400_v56  ;;  %v517_v4 = vld [vmem:[#allocation2 + $0x3d8] sm:$0xff] }
 0x156   :  { %1223 = vmatpush2.bf16.msra.mxu0 %v8617_v12  ;;  %1264 = vmatpush2.bf16.msra.mxu1 %v8619_v13  ;;  %v445_v12 = vld [vmem:[#allocation2 + $0x198] sm:$0xff]  ;;  %v11205_v13 = vpack.c.bf16 %v392_v6, %v392_v6 }
 0x157   :  { %1224 = vmatprep.subr.bf16.mxu0 %v8610_v14  ;;  %1265 = vmatprep.subr.bf16.mxu1 %v8612_v15  ;;  %v449_v14 = vld [vmem:[#allocation2 + $0x1b8] sm:$0xff]  ;;  %v8557_v15 = vcombine.low %v452_v0, %v456_v1  ;;  %v516_v0 = vld [vmem:[#allocation2 + $0x3d0] sm:$0xff] }
 0x158   :  { %v8551_v24 = vcombine.low %v445_v12, %v449_v14  ;;  %v520_v1 = vld [vmem:[#allocation2 + $0x3f0] sm:$0xff] }
 0x15a   :  { %1225 = vmatpush2.bf16.msra.mxu0 %v8609_v20  ;;  %1266 = vmatpush2.bf16.msra.mxu1 %v8611_v21  ;;  %v8552_v20 = vcombine.high %v445_v12, %v449_v14  ;;  %v437_v21 = vld [vmem:[#allocation2 + $0x158] sm:$0xff] }
 0x15b   :  { %1226 = vmatprep.subr.bf16.mxu0 %v8602_v22  ;;  %1267 = vmatprep.subr.bf16.mxu1 %v8604_v23  ;;  %v441_v22 = vld [vmem:[#allocation2 + $0x178] sm:$0xff]  ;;  %v8549_v23 = vcombine.low %v444_v9, %v448_v10  ;;  %v512_v9 = vld [vmem:[#allocation2 + $0x3b0] sm:$0xff] }
 0x15c   :  { %v8543_v32 = vcombine.low %v437_v21, %v441_v22  ;;  %v509_v12 = vld [vmem:[#allocation2 + $0x398] sm:$0xff] }
 0x15d   :  { %v513_v14 = vld [vmem:[#allocation2 + $0x3b8] sm:$0xff] }
 0x15e   :  { %1227 = vmatpush2.bf16.msra.mxu0 %v8601_v28  ;;  %1268 = vmatpush2.bf16.msra.mxu1 %v8603_v29  ;;  %v8544_v28 = vcombine.high %v437_v21, %v441_v22  ;;  %v429_v29 = vld [vmem:[#allocation2 + $0x118] sm:$0xff]  ;;  %v8615_v27 = vcombine.low %v509_v12, %v513_v14 }
 0x15f   :  { %1228 = vmatprep.subr.bf16.mxu0 %v8594_v30  ;;  %1269 = vmatprep.subr.bf16.mxu1 %v8596_v31  ;;  %v433_v30 = vld [vmem:[#allocation2 + $0x138] sm:$0xff]  ;;  %v8541_v31 = vcombine.low %v436_v18, %v440_v19  ;;  %v504_v18 = vld [vmem:[#allocation2 + $0x370] sm:$0xff] }
 0x160   :  { %v8535_v40 = vcombine.low %v429_v29, %v433_v30  ;;  %v501_v21 = vld [vmem:[#allocation2 + $0x358] sm:$0xff] }
 0x161   :  { %v505_v22 = vld [vmem:[#allocation2 + $0x378] sm:$0xff] }
 0x162   :  { %1229 = vmatpush2.bf16.msra.mxu0 %v8593_v36  ;;  %1270 = vmatpush2.bf16.msra.mxu1 %v8595_v37  ;;  %v8536_v36 = vcombine.high %v429_v29, %v433_v30  ;;  %v421_v37 = vld [vmem:[#allocation2 + $0xd8] sm:$0xff] }
 0x163   :  { %1230 = vmatprep.subr.bf16.mxu0 %v8586_v38  ;;  %1271 = vmatprep.subr.bf16.mxu1 %v8588_v41  ;;  %v425_v38 = vld [vmem:[#allocation2 + $0xf8] sm:$0xff]  ;;  %v8526_v41 = vcombine.high %v420_v34, %v424_v35 }
 0x164   :  { %v8528_v43 = vcombine.high %v421_v37, %v425_v38  ;;  %v493_v29 = vld [vmem:[#allocation2 + $0x318] sm:$0xff] }
 0x165   :  { %v497_v30 = vld [vmem:[#allocation2 + $0x338] sm:$0xff] }
 0x166   :  { %1231 = vmatpush2.bf16.msra.mxu0 %v8585_v44  ;;  %1272 = vmatpush2.bf16.msra.mxu1 %v8587_v45  ;;  %v413_v44 = vld [vmem:[#allocation2 + $0x98] sm:$0xff] }
 0x167   :  { %1232 = vmatprep.subr.bf16.mxu0 %v8578_v46  ;;  %1273 = vmatprep.subr.bf16.mxu1 %v8580_v49  ;;  %v417_v45 = vld [vmem:[#allocation2 + $0xb8] sm:$0xff]  ;;  %v8525_v46 = vcombine.low %v420_v34, %v424_v35  ;;  %v8527_v49 = vcombine.low %v421_v37, %v425_v38  ;;  %v488_v34 = vld [vmem:[#allocation2 + $0x2f0] sm:$0xff]  ;;  %v8607_v35 = vcombine.low %v501_v21, %v505_v22 }
 0x168   :  { %v485_v37 = vld [vmem:[#allocation2 + $0x2d8] sm:$0xff] }
 0x169   :  { %v489_v38 = vld [vmem:[#allocation2 + $0x2f8] sm:$0xff] }
 0x16a   :  { %1233 = vmatpush2.bf16.msra.mxu0 %v8577_v52  ;;  %1274 = vmatpush2.bf16.msra.mxu1 %v8579_v53  ;;  %v409_v52 = vld [vmem:[#allocation2 + $0x78] sm:$0xff]  ;;  %v8520_v53 = vcombine.high %v413_v44, %v417_v45 }
 0x16b   :  { %1234 = vmatprep.subr.bf16.mxu0 %v8570_v54  ;;  %1275 = vmatprep.subr.bf16.mxu1 %v8572_v58  ;;  %v8519_v58 = vcombine.low %v413_v44, %v417_v45  ;;  %v477_v44 = vld [vmem:[#allocation2 + $0x298] sm:$0xff] }
 0x16c   :  { %v481_v45 = vld [vmem:[#allocation2 + $0x2b8] sm:$0xff] }
 0x16e   :  { %1235 = vmatpush2.bf16.msra.mxu0 %v8569_v61  ;;  %1276 = vmatpush2.bf16.msra.mxu1 %v8571_v62  ;;  %v401_v61 = vld [vmem:[#allocation2 + $0x38] sm:$0xff]  ;;  %v8512_v62 = vcombine.high %v405_v51, %v409_v52 }
 0x16f   :  { %1236 = vmatprep.subr.bf16.mxu0 %v8562_v63  ;;  %1277 = vmatprep.subr.bf16.mxu1 %v8564_v2  ;;  %v8509_v63 = vcombine.low %v404_v47, %v408_v48  ;;  %v8511_v2 = vcombine.low %v405_v51, %v409_v52  ;;  %v8504_v6 = vcombine.high %v397_v60, %v401_v61  ;;  %v468_v48 = vld [vmem:[#allocation2 + $0x250] sm:$0xff]  ;;  %v469_v52 = vld [vmem:[#allocation2 + $0x258] sm:$0xff] }
 0x170   :  { %v8503_v10 = vcombine.low %v397_v60, %v401_v61  ;;  %v461_v61 = vld [vmem:[#allocation2 + $0x218] sm:$0xff] }
 0x172   :  { %1237 = vmatpush2.bf16.msra.mxu0 %v8561_v5  ;;  %1278 = vmatpush2.bf16.msra.mxu1 %v8563_v7  ;;  %v521_v5 = vld [vmem:[#allocation2 + $0x3f8] sm:$0xff]  ;;  %v8501_v7 = vcombine.low %v396_v55, %v400_v56  ;;  %v460_v56 = vld [vmem:[#allocation2 + $0x210] sm:$0xff] }
 0x173   :  { %1288 = vmatprep.subr.bf16.mxu0 %v8558_v8  ;;  %1329 = vmatprep.subr.bf16.mxu1 %v8560_v11  ;;  %v508_v8 = vld [vmem:[#allocation2 + $0x390] sm:$0xff]  ;;  %v8622_v11 = vcombine.high %v516_v0, %v520_v1  ;;  %v8623_v19 = vcombine.low %v517_v4, %v521_v5 }
 0x175   :  { %1239 = vmatmul.mubr.bf16.vlgmr.msra.gmra.mxu0 %v11205_v13  ;;  %1280 = vmatmul.mubr.bf16.vlgmr.msra.gmra.mxu1 %v11205_v13 }
 0x176   :  { %1289 = vmatpush1.bf16.msra.mxu0 %v8557_v15  ;;  %1330 = vmatpush1.bf16.msra.mxu1 %v8559_v16  ;;  %v8624_v15 = vcombine.high %v517_v4, %v521_v5  ;;  %v8621_v16 = vcombine.low %v516_v0, %v520_v1  ;;  %v9596_v4 = vld [vmem:[#allocation5 + $0xe4] ss:$16 sps:$4 sm:$0xff]  }
 0x177   :  { %1290 = vmatprep.subr.bf16.mxu0 %v8550_v17  ;;  %1331 = vmatprep.subr.bf16.mxu1 %v8552_v20  ;;  %v500_v17 = vld [vmem:[#allocation2 + $0x350] sm:$0xff]  ;;  %v8614_v20 = vcombine.high %v508_v8, %v512_v9 }
 0x178   :  { %1320 = vmatprep.mubr.bf16.mxu0 %v11200_v57  ;;  %1361 = vmatprep.mubr.bf16.mxu1 %v11200_v57  ;;  %v416_v57 = vld [vmem:[#allocation2 + $0xb0] sm:$0xff] }
 0x179   :  { %v8518_v50 = vcombine.high %v412_v42, %v416_v57  ;;  %v8517_v54 = vcombine.low %v412_v42, %v416_v57  ;;  %v480_v42 = vld [vmem:[#allocation2 + $0x2b0] sm:$0xff]  ;;  %v8599_v57 = vcombine.low %v493_v29, %v497_v30 }
 0x17a   :  { %1291 = vmatpush1.bf16.msra.mxu0 %v8549_v23  ;;  %1332 = vmatpush1.bf16.msra.mxu1 %v8551_v24  ;;  %v8616_v23 = vcombine.high %v509_v12, %v513_v14  ;;  %v8613_v24 = vcombine.low %v508_v8, %v512_v9  ;;  %v9594_v8 = vld [vmem:[#allocation5 + $0xe0] ss:$16 sps:$4 sm:$0xff]  }
 0x17b   :  { %1292 = vmatprep.subr.bf16.mxu0 %v8542_v25  ;;  %1333 = vmatprep.subr.bf16.mxu1 %v8544_v28  ;;  %v492_v25 = vld [vmem:[#allocation2 + $0x310] sm:$0xff]  ;;  %v8606_v28 = vcombine.high %v500_v17, %v504_v18 }
 0x17c   :  { %v9597_v9 = vld [vmem:[#allocation5 + $0x2e0] ss:$16 sps:$4 sm:$0xff]  }
 0x17d   :  { %v9600_v12 = vld [vmem:[#allocation5 + $0xc0] ss:$16 sps:$4 sm:$0xff]  }
 0x17e   :  { %1293 = vmatpush1.bf16.msra.mxu0 %v8541_v31  ;;  %1334 = vmatpush1.bf16.msra.mxu1 %v8543_v32  ;;  %v8608_v31 = vcombine.high %v501_v21, %v505_v22  ;;  %v8605_v32 = vcombine.low %v500_v17, %v504_v18  ;;  %v9603_v14 = vld [vmem:[#allocation5 + $0x2c0] ss:$16 sps:$4 sm:$0xff]  }
 0x17f   :  { %1294 = vmatprep.subr.bf16.mxu0 %v8534_v33  ;;  %1335 = vmatprep.subr.bf16.mxu1 %v8536_v36  ;;  %v484_v33 = vld [vmem:[#allocation2 + $0x2d0] sm:$0xff]  ;;  %v8598_v36 = vcombine.high %v492_v25, %v496_v26 }
 0x180   :  { %v8589_v47 = vcombine.low %v484_v33, %v488_v34  ;;  %v9606_v17 = vld [vmem:[#allocation5 + $0xa0] ss:$16 sps:$4 sm:$0xff]  }
 0x181   :  { %v9609_v18 = vld [vmem:[#allocation5 + $0x2a0] ss:$16 sps:$4 sm:$0xff]  }
 0x182   :  { %1295 = vmatpush1.bf16.msra.mxu0 %v8533_v39  ;;  %1336 = vmatpush1.bf16.msra.mxu1 %v8535_v40  ;;  %v8600_v39 = vcombine.high %v493_v29, %v497_v30  ;;  %v8597_v40 = vcombine.low %v492_v25, %v496_v26  ;;  %v9612_v21 = vld [vmem:[#allocation5 + $0x80] ss:$16 sps:$4 sm:$0xff]   ;;  %v9626_v26 = vld [vmem:[#allocation5 + $0x44] ss:$16 sps:$4 sm:$0xff]  }
 0x183   :  { %1296 = vmatprep.subr.bf16.mxu0 %v8526_v41  ;;  %1337 = vmatprep.subr.bf16.mxu1 %v8528_v43  ;;  %v476_v41 = vld [vmem:[#allocation2 + $0x290] sm:$0xff]  ;;  %v8590_v43 = vcombine.high %v484_v33, %v488_v34 }
 0x184   :  { %v8582_v51 = vcombine.high %v476_v41, %v480_v42  ;;  %v8581_v55 = vcombine.low %v476_v41, %v480_v42  ;;  %v9615_v22 = vld [vmem:[#allocation5 + $0x280] ss:$16 sps:$4 sm:$0xff]   ;;  %v9632_v30 = vld [vmem:[#allocation5 + $0x24] ss:$16 sps:$4 sm:$0xff]  }
 0x185   :  { %v9621_v25 = vld [vmem:[#allocation5 + $0x260] ss:$16 sps:$4 sm:$0xff]   ;;  %v9638_v34 = vld [vmem:[#allocation5 + $0x4] ss:$16 sps:$4 sm:$0xff]  }
 0x186   :  { %1297 = vmatpush1.bf16.msra.mxu0 %v8525_v46  ;;  %1338 = vmatpush1.bf16.msra.mxu1 %v8527_v49  ;;  %v8592_v46 = vcombine.high %v485_v37, %v489_v38  ;;  %v472_v49 = vld [vmem:[#allocation2 + $0x270] sm:$0xff] }
 0x187   :  { %1298 = vmatprep.subr.bf16.mxu0 %v8518_v50  ;;  %1339 = vmatprep.subr.bf16.mxu1 %v8520_v53  ;;  %v8591_v50 = vcombine.low %v485_v37, %v489_v38  ;;  %v473_v53 = vld [vmem:[#allocation2 + $0x278] sm:$0xff]  ;;  %v8574_v60 = vcombine.high %v468_v48, %v472_v49  ;;  %v8573_v0 = vcombine.low %v468_v48, %v472_v49  ;;  %v9627_v29 = vld [vmem:[#allocation5 + $0x240] ss:$16 sps:$4 sm:$0xff]   ;;  %v9644_v38 = vld [vmem:[#allocation5 + $0x1e4] ss:$16 sps:$4 sm:$0xff]  }
 0x188   :  { %v8575_v1 = vcombine.low %v469_v52, %v473_v53  ;;  %v9633_v33 = vld [vmem:[#allocation5 + $0x220] ss:$16 sps:$4 sm:$0xff]   ;;  %v9650_v42 = vld [vmem:[#allocation5 + $0x1c4] ss:$16 sps:$4 sm:$0xff]  }
 0x189   :  { %v9639_v37 = vld [vmem:[#allocation5 + $0x200] ss:$16 sps:$4 sm:$0xff]   ;;  %v9662_v49 = vld [vmem:[#allocation5 + $0x184] ss:$16 sps:$4 sm:$0xff]  }
 0x18a   :  { %1299 = vmatpush1.bf16.msra.mxu0 %v8517_v54  ;;  %1340 = vmatpush1.bf16.msra.mxu1 %v8519_v58  ;;  %v8584_v54 = vcombine.high %v477_v44, %v481_v45  ;;  %v464_v58 = vld [vmem:[#allocation2 + $0x230] sm:$0xff] }
 0x18b   :  { %1300 = vmatprep.subr.bf16.mxu0 %v8510_v59  ;;  %1341 = vmatprep.subr.bf16.mxu1 %v8512_v62  ;;  %v8583_v59 = vcombine.low %v477_v44, %v481_v45  ;;  %v465_v62 = vld [vmem:[#allocation2 + $0x238] sm:$0xff]  ;;  %v8565_v5 = vcombine.low %v460_v56, %v464_v58  ;;  %v9645_v41 = vld [vmem:[#allocation5 + $0x3e0] ss:$16 sps:$4 sm:$0xff]   ;;  %v9656_v45 = vld [vmem:[#allocation5 + $0x1a4] ss:$16 sps:$4 sm:$0xff]  }
 0x18c   :  { %v9651_v44 = vld [vmem:[#allocation5 + $0x3c0] ss:$16 sps:$4 sm:$0xff]  }
 0x18d   :  { %v9657_v48 = vld [vmem:[#allocation5 + $0x3a0] ss:$16 sps:$4 sm:$0xff]  }
 0x18e   :  { %1301 = vmatpush1.bf16.msra.mxu0 %v8509_v63  ;;  %1342 = vmatpush1.bf16.msra.mxu1 %v8511_v2  ;;  %v8576_v63 = vcombine.high %v469_v52, %v473_v53  ;;  %v8566_v2 = vcombine.high %v460_v56, %v464_v58  ;;  %v9663_v52 = vld [vmem:[#allocation5 + $0x380] ss:$16 sps:$4 sm:$0xff]   ;;  %v9668_v53 = vld [vmem:[#allocation5 + $0x164] ss:$16 sps:$4 sm:$0xff]  }
 0x18f   :  { %1302 = vmatprep.subr.bf16.mxu0 %v8502_v3  ;;  %1343 = vmatprep.subr.bf16.mxu1 %v8504_v6  ;;  %v8568_v3 = vcombine.high %v461_v61, %v465_v62  ;;  %v9599_v6 = vld [vmem:[#allocation5 + $0x2e4] ss:$16 sps:$4 sm:$0xff]   ;;  %v9669_v56 = vld [vmem:[#allocation5 + $0x360] ss:$16 sps:$4 sm:$0xff]  }
 0x190   :  { %v9674_v58 = vld [vmem:[#allocation5 + $0x144] ss:$16 sps:$4 sm:$0xff]  }
 0x192   :  { %1303 = vmatpush1.bf16.msra.mxu0 %v8501_v7  ;;  %1344 = vmatpush1.bf16.msra.mxu1 %v8503_v10  ;;  %v8567_v7 = vcombine.low %v461_v61, %v465_v62  ;;  %v9602_v10 = vld [vmem:[#allocation5 + $0xc4] ss:$16 sps:$4 sm:$0xff]   ;;  %v9675_v61 = vld [vmem:[#allocation5 + $0x340] ss:$16 sps:$4 sm:$0xff]  }
 0x193   :  { %1304 = vmatprep.subr.bf16.mxu0 %v8622_v11  ;;  %1345 = vmatprep.subr.bf16.mxu1 %v8624_v15  ;;  %v9605_v11 = vld [vmem:[#allocation5 + $0x2c4] ss:$16 sps:$4 sm:$0xff]  }
 0x194   :  { %v9608_v15 = vld [vmem:[#allocation5 + $0xa4] ss:$16 sps:$4 sm:$0xff]  }
 0x195   :  { %v9680_v62 = vld [vmem:[#allocation5 + $0x124] ss:$16 sps:$4 sm:$0xff]  }
 0x196   :  { %1305 = vmatpush2.bf16.msra.mxu0 %v8621_v16  ;;  %1346 = vmatpush2.bf16.msra.mxu1 %v8623_v19  ;;  %v9611_v16 = vld [vmem:[#allocation5 + $0x2a4] ss:$16 sps:$4 sm:$0xff]  }
 0x197   :  { %1306 = vmatprep.subr.bf16.mxu0 %v8614_v20  ;;  %1347 = vmatprep.subr.bf16.mxu1 %v8616_v23  ;;  %v9614_v19 = vld [vmem:[#allocation5 + $0x84] ss:$16 sps:$4 sm:$0xff]  }
 0x198   :  { %v9617_v20 = vld [vmem:[#allocation5 + $0x284] ss:$16 sps:$4 sm:$0xff]  }
 0x199   :  { %v9623_v23 = vld [vmem:[#allocation5 + $0x264] ss:$16 sps:$4 sm:$0xff]  }
 0x19a   :  { %1307 = vmatpush2.bf16.msra.mxu0 %v8613_v24  ;;  %1348 = vmatpush2.bf16.msra.mxu1 %v8615_v27  ;;  %v9618_v24 = vld [vmem:[#allocation5 + $0x60] ss:$16 sps:$4 sm:$0xff]   ;;  %v9629_v27 = vld [vmem:[#allocation5 + $0x244] ss:$16 sps:$4 sm:$0xff]  }
 0x19b   :  { %1308 = vmatprep.subr.bf16.mxu0 %v8606_v28  ;;  %1349 = vmatprep.subr.bf16.mxu1 %v8608_v31  ;;  %v9624_v28 = vld [vmem:[#allocation5 + $0x40] ss:$16 sps:$4 sm:$0xff]   ;;  %v9635_v31 = vld [vmem:[#allocation5 + $0x224] ss:$16 sps:$4 sm:$0xff]  }
 0x19e   :  { %1309 = vmatpush2.bf16.msra.mxu0 %v8605_v32  ;;  %1350 = vmatpush2.bf16.msra.mxu1 %v8607_v35  ;;  %v9630_v32 = vld [vmem:[#allocation5 + $0x20] ss:$16 sps:$4 sm:$0xff]   ;;  %v9641_v35 = vld [vmem:[#allocation5 + $0x204] ss:$16 sps:$4 sm:$0xff]  }
 0x19f   :  { %1310 = vmatprep.subr.bf16.mxu0 %v8598_v36  ;;  %1351 = vmatprep.subr.bf16.mxu1 %v8600_v39  ;;  %v9636_v36 = vld [vmem:[#allocation5] ss:$16 sps:$4 sm:$0xff]   ;;  %v9647_v39 = vld [vmem:[#allocation5 + $0x3e4] ss:$16 sps:$4 sm:$0xff]  }
 0x1a2   :  { %1311 = vmatpush2.bf16.msra.mxu0 %v8597_v40  ;;  %1352 = vmatpush2.bf16.msra.mxu1 %v8599_v57  ;;  %v9642_v40 = vld [vmem:[#allocation5 + $0x1e0] ss:$16 sps:$4 sm:$0xff]   ;;  %v9653_v57 = vld [vmem:[#allocation5 + $0x3c4] ss:$16 sps:$4 sm:$0xff]  }
 0x1a3   :  { %1312 = vmatprep.subr.bf16.mxu0 %v8590_v43  ;;  %1353 = vmatprep.subr.bf16.mxu1 %v8592_v46  ;;  %v9648_v43 = vld [vmem:[#allocation5 + $0x1c0] ss:$16 sps:$4 sm:$0xff]   ;;  %v9659_v46 = vld [vmem:[#allocation5 + $0x3a4] ss:$16 sps:$4 sm:$0xff]  }
 0x1a6   :  { %1313 = vmatpush2.bf16.msra.mxu0 %v8589_v47  ;;  %1354 = vmatpush2.bf16.msra.mxu1 %v8591_v50  ;;  %v9654_v47 = vld [vmem:[#allocation5 + $0x1a0] ss:$16 sps:$4 sm:$0xff]   ;;  %v9665_v50 = vld [vmem:[#allocation5 + $0x384] ss:$16 sps:$4 sm:$0xff]  }
 0x1a7   :  { %1314 = vmatprep.subr.bf16.mxu0 %v8582_v51  ;;  %1355 = vmatprep.subr.bf16.mxu1 %v8584_v54  ;;  %v9660_v51 = vld [vmem:[#allocation5 + $0x180] ss:$16 sps:$4 sm:$0xff]   ;;  %v9671_v54 = vld [vmem:[#allocation5 + $0x364] ss:$16 sps:$4 sm:$0xff]  }
 0x1aa   :  { %1315 = vmatpush2.bf16.msra.mxu0 %v8581_v55  ;;  %1356 = vmatpush2.bf16.msra.mxu1 %v8583_v59  ;;  %v9666_v55 = vld [vmem:[#allocation5 + $0x160] ss:$16 sps:$4 sm:$0xff]   ;;  %v9677_v59 = vld [vmem:[#allocation5 + $0x344] ss:$16 sps:$4 sm:$0xff]  }
 0x1ab   :  { %1316 = vmatprep.subr.bf16.mxu0 %v8574_v60  ;;  %1357 = vmatprep.subr.bf16.mxu1 %v8576_v63  ;;  %v9672_v60 = vld [vmem:[#allocation5 + $0x140] ss:$16 sps:$4 sm:$0xff]   ;;  %v9683_v63 = vld [vmem:[#allocation5 + $0x324] ss:$16 sps:$4 sm:$0xff]  }
 0x1ae   :  { %1317 = vmatpush2.bf16.msra.mxu0 %v8573_v0  ;;  %1358 = vmatpush2.bf16.msra.mxu1 %v8575_v1  ;;  %v9678_v0 = vld [vmem:[#allocation5 + $0x120] ss:$16 sps:$4 sm:$0xff]  }
 0x1af   :  { %1318 = vmatprep.subr.bf16.mxu0 %v8566_v2  ;;  %1359 = vmatprep.subr.bf16.mxu1 %v8568_v3  ;;  %v9681_v1 = vld [vmem:[#allocation5 + $0x320] ss:$16 sps:$4 sm:$0xff]   ;;  %v9686_v2 = vld [vmem:[#allocation5 + $0x104] ss:$16 sps:$4 sm:$0xff]  }
 0x1b0   :  { %v9689_v3 = vld [vmem:[#allocation5 + $0x304] ss:$16 sps:$4 sm:$0xff]  }
 0x1b2   :  { %1319 = vmatpush2.bf16.msra.mxu0 %v8565_v5  ;;  %1360 = vmatpush2.bf16.msra.mxu1 %v8567_v7  ;;  %v9687_v5 = vld [vmem:[#allocation5 + $0x300] ss:$16 sps:$4 sm:$0xff]   ;;  %v9695_v7 = vld [vmem:[#allocation5 + $0x6e4] ss:$16 sps:$4 sm:$0xff]  }
 0x1b3   :  { %2960 = vmatprep.subr.bf16.mxu0 %v9596_v4  ;;  %3001 = vmatprep.subr.bf16.mxu1 %v9599_v6  ;;  %v9684_v4 = vld [vmem:[#allocation5 + $0x100] ss:$16 sps:$4 sm:$0xff]   ;;  %v9692_v6 = vld [vmem:[#allocation5 + $0x4e4] ss:$16 sps:$4 sm:$0xff]  }
 0x1b5   :  { %1321 = vmatmul.mubr.bf16.vlgmr.msra.gmra.mxu0 %v11205_v13  ;;  %1362 = vmatmul.mubr.bf16.vlgmr.msra.gmra.mxu1 %v11205_v13  ;;  %v9620_v13 = vld [vmem:[#allocation5 + $0x64] ss:$16 sps:$4 sm:$0xff]  }
 0x1b6   :  { %2961 = vmatpush1.bf16.msra.mxu0 %v9594_v8  ;;  %3002 = vmatpush1.bf16.msra.mxu1 %v9597_v9  ;;  %v526_v8 = vlaneseq }
 0x1b7   :  { %2962 = vmatprep.subr.bf16.mxu0 %v9602_v10  ;;  %3003 = vmatprep.subr.bf16.mxu1 %v9605_v11  ;;  %v11219_v11 = vld [vmem:[%s11548_s17] sm:$0xff] }
 0x1b8   :  { %v11213_v9 = vshrl.u32 %v526_v8, 7  ;;  %v9735_v8 = vld [vmem:[#allocation5 + $0x600] ss:$16 sps:$4 sm:$0xff]  }
 0x1ba   :  { %2963 = vmatpush1.bf16.msra.mxu0 %v9600_v12  ;;  %3004 = vmatpush1.bf16.msra.mxu1 %v9603_v14  ;;  %v11216_v10 = vsub.s32 0, %v11213_v9  ;;  %v11222_v12 = vsub.s32 2, %v11213_v9  ;;  %v11225_v14 = vsub.s32 1, %v11213_v9 }
 0x1bb   :  { %2964 = vmatprep.subr.bf16.mxu0 %v9608_v15  ;;  %3005 = vmatprep.subr.bf16.mxu1 %v9611_v16  ;;  %v11228_v15 = vsub.s32 3, %v11213_v9 }
 0x1bc   :  { %v529_v16 = vrot.slane %v11219_v11, %v11216_v10 }
 0x1be   :  { %2965 = vmatpush1.bf16.msra.mxu0 %v9606_v17  ;;  %3006 = vmatpush1.bf16.msra.mxu1 %v9609_v18  ;;  %v537_v17 = vrot.slane %v11219_v11, %v11222_v12  ;;  %v533_v18 = vrot.slane %v11219_v11, %v11225_v14 }
 0x1bf   :  { %2966 = vmatprep.subr.bf16.mxu0 %v9614_v19  ;;  %3007 = vmatprep.subr.bf16.mxu1 %v9617_v20  ;;  %v541_v20 = vrot.slane %v11219_v11, %v11228_v15 }
 0x1c2   :  { %2967 = vmatpush1.bf16.msra.mxu0 %v9612_v21  ;;  %3008 = vmatpush1.bf16.msra.mxu1 %v9615_v22 }
 0x1c3   :  { %2968 = vmatprep.subr.bf16.mxu0 %v9620_v13  ;;  %3009 = vmatprep.subr.bf16.mxu1 %v9623_v23 }
 0x1c6   :  { %2969 = vmatpush1.bf16.msra.mxu0 %v9618_v24  ;;  %3010 = vmatpush1.bf16.msra.mxu1 %v9621_v25 }
 0x1c7   :  { %2970 = vmatprep.subr.bf16.mxu0 %v9626_v26  ;;  %3011 = vmatprep.subr.bf16.mxu1 %v9629_v27 }
 0x1ca   :  { %2971 = vmatpush1.bf16.msra.mxu0 %v9624_v28  ;;  %3012 = vmatpush1.bf16.msra.mxu1 %v9627_v29 }
 0x1cb   :  { %2972 = vmatprep.subr.bf16.mxu0 %v9632_v30  ;;  %3013 = vmatprep.subr.bf16.mxu1 %v9635_v31 }
 0x1ce   :  { %2973 = vmatpush1.bf16.msra.mxu0 %v9630_v32  ;;  %3014 = vmatpush1.bf16.msra.mxu1 %v9633_v33 }
 0x1cf   :  { %2974 = vmatprep.subr.bf16.mxu0 %v9638_v34  ;;  %3015 = vmatprep.subr.bf16.mxu1 %v9641_v35  ;;  %v9690_v35 = vld [vmem:[#allocation5 + $0x4e0] ss:$16 sps:$4 sm:$0xff]  }
 0x1d2   :  { %2975 = vmatpush1.bf16.msra.mxu0 %v9636_v36  ;;  %3016 = vmatpush1.bf16.msra.mxu1 %v9639_v37 }
 0x1d3   :  { %2976 = vmatprep.subr.bf16.mxu0 %v9644_v38  ;;  %3017 = vmatprep.subr.bf16.mxu1 %v9647_v39  ;;  %v9693_v39 = vld [vmem:[#allocation5 + $0x6e0] ss:$16 sps:$4 sm:$0xff]  }
 0x1d6   :  { %2977 = vmatpush2.bf16.msra.mxu0 %v9642_v40  ;;  %3018 = vmatpush2.bf16.msra.mxu1 %v9645_v41  ;;  %v9698_v40 = vld [vmem:[#allocation5 + $0x4c4] ss:$16 sps:$4 sm:$0xff]  }
 0x1d7   :  { %2978 = vmatprep.subr.bf16.mxu0 %v9650_v42  ;;  %3019 = vmatprep.subr.bf16.mxu1 %v9653_v57 }
 0x1da   :  { %2979 = vmatpush2.bf16.msra.mxu0 %v9648_v43  ;;  %3020 = vmatpush2.bf16.msra.mxu1 %v9651_v44 }
 0x1db   :  { %2980 = vmatprep.subr.bf16.mxu0 %v9656_v45  ;;  %3021 = vmatprep.subr.bf16.mxu1 %v9659_v46  ;;  %v9696_v45 = vld [vmem:[#allocation5 + $0x4c0] ss:$16 sps:$4 sm:$0xff]   ;;  %v9701_v46 = vld [vmem:[#allocation5 + $0x6c4] ss:$16 sps:$4 sm:$0xff]  }
 0x1de   :  { %2981 = vmatpush2.bf16.msra.mxu0 %v9654_v47  ;;  %3022 = vmatpush2.bf16.msra.mxu1 %v9657_v48  ;;  %v9699_v47 = vld [vmem:[#allocation5 + $0x6c0] ss:$16 sps:$4 sm:$0xff]   ;;  %v9704_v48 = vld [vmem:[#allocation5 + $0x4a4] ss:$16 sps:$4 sm:$0xff]  }
 0x1df   :  { %2982 = vmatprep.subr.bf16.mxu0 %v9662_v49  ;;  %3023 = vmatprep.subr.bf16.mxu1 %v9665_v50  ;;  %v9707_v49 = vld [vmem:[#allocation5 + $0x6a4] ss:$16 sps:$4 sm:$0xff]   ;;  %v9702_v50 = vld [vmem:[#allocation5 + $0x4a0] ss:$16 sps:$4 sm:$0xff]  }
 0x1e2   :  { %2983 = vmatpush2.bf16.msra.mxu0 %v9660_v51  ;;  %3024 = vmatpush2.bf16.msra.mxu1 %v9663_v52  ;;  %v9705_v51 = vld [vmem:[#allocation5 + $0x6a0] ss:$16 sps:$4 sm:$0xff]   ;;  %v9710_v52 = vld [vmem:[#allocation5 + $0x484] ss:$16 sps:$4 sm:$0xff]  }
 0x1e3   :  { %2984 = vmatprep.subr.bf16.mxu0 %v9668_v53  ;;  %3025 = vmatprep.subr.bf16.mxu1 %v9671_v54  ;;  %v9708_v53 = vld [vmem:[#allocation5 + $0x480] ss:$16 sps:$4 sm:$0xff]   ;;  %v9713_v54 = vld [vmem:[#allocation5 + $0x684] ss:$16 sps:$4 sm:$0xff]  }
 0x1e6   :  { %2985 = vmatpush2.bf16.msra.mxu0 %v9666_v55  ;;  %3026 = vmatpush2.bf16.msra.mxu1 %v9669_v56  ;;  %v9711_v55 = vld [vmem:[#allocation5 + $0x680] ss:$16 sps:$4 sm:$0xff]   ;;  %v9716_v56 = vld [vmem:[#allocation5 + $0x464] ss:$16 sps:$4 sm:$0xff]  }
 0x1e7   :  { %2986 = vmatprep.subr.bf16.mxu0 %v9674_v58  ;;  %3027 = vmatprep.subr.bf16.mxu1 %v9677_v59  ;;  %v9714_v58 = vld [vmem:[#allocation5 + $0x460] ss:$16 sps:$4 sm:$0xff]   ;;  %v9719_v59 = vld [vmem:[#allocation5 + $0x664] ss:$16 sps:$4 sm:$0xff]  }
 0x1ea   :  { %2987 = vmatpush2.bf16.msra.mxu0 %v9672_v60  ;;  %3028 = vmatpush2.bf16.msra.mxu1 %v9675_v61  ;;  %v9717_v60 = vld [vmem:[#allocation5 + $0x660] ss:$16 sps:$4 sm:$0xff]   ;;  %v9722_v61 = vld [vmem:[#allocation5 + $0x444] ss:$16 sps:$4 sm:$0xff]  }
 0x1eb   :  { %2988 = vmatprep.subr.bf16.mxu0 %v9680_v62  ;;  %3029 = vmatprep.subr.bf16.mxu1 %v9683_v63  ;;  %v9720_v62 = vld [vmem:[#allocation5 + $0x440] ss:$16 sps:$4 sm:$0xff]   ;;  %v9725_v63 = vld [vmem:[#allocation5 + $0x644] ss:$16 sps:$4 sm:$0xff]  }
 0x1ee   :  { %2989 = vmatpush2.bf16.msra.mxu0 %v9678_v0  ;;  %3030 = vmatpush2.bf16.msra.mxu1 %v9681_v1  ;;  %v9723_v0 = vld [vmem:[#allocation5 + $0x640] ss:$16 sps:$4 sm:$0xff]   ;;  %v9728_v1 = vld [vmem:[#allocation5 + $0x424] ss:$16 sps:$4 sm:$0xff]  }
 0x1ef   :  { %2990 = vmatprep.subr.bf16.mxu0 %v9686_v2  ;;  %3031 = vmatprep.subr.bf16.mxu1 %v9689_v3  ;;  %v9726_v2 = vld [vmem:[#allocation5 + $0x420] ss:$16 sps:$4 sm:$0xff]   ;;  %v9731_v3 = vld [vmem:[#allocation5 + $0x624] ss:$16 sps:$4 sm:$0xff]  }
 0x1f2   :  { %2991 = vmatpush2.bf16.msra.mxu0 %v9684_v4  ;;  %3032 = vmatpush2.bf16.msra.mxu1 %v9687_v5  ;;  %v9729_v4 = vld [vmem:[#allocation5 + $0x620] ss:$16 sps:$4 sm:$0xff]   ;;  %v9734_v5 = vld [vmem:[#allocation5 + $0x404] ss:$16 sps:$4 sm:$0xff]  }
 0x1f3   :  { %3042 = vmatprep.subr.bf16.mxu0 %v9692_v6  ;;  %3083 = vmatprep.subr.bf16.mxu1 %v9695_v7  ;;  %v9732_v6 = vld [vmem:[#allocation5 + $0x400] ss:$16 sps:$4 sm:$0xff]   ;;  %v9737_v7 = vld [vmem:[#allocation5 + $0x604] ss:$16 sps:$4 sm:$0xff]  }
 0x235   :  { %v1240_v19 = vpop.f32.mrf.mxu0  ;;  %v1281_v22 = vpop.f32.mrf.mxu1 }
 0x236   :  { %v1241_v21 = vadd.f32 %v1240_v19, %v529_v16  ;;  %v1282_v13 = vadd.f32 %v1281_v22, %v537_v17  ;;  %v9740_v16 = vld [vmem:[#allocation5 + $0x5e4] ss:$16 sps:$4 sm:$0xff]   ;;  %v9738_v17 = vld [vmem:[#allocation5 + $0x5e0] ss:$16 sps:$4 sm:$0xff]  }
 0x237   :  { %v1242_v23 = vpop.f32.mrf.mxu0  ;;  %v1283_v26 = vpop.f32.mrf.mxu1  ;;  %v9741_v19 = vld [vmem:[#allocation5 + $0x7e0] ss:$16 sps:$4 sm:$0xff]   ;;  %v9749_v22 = vld [vmem:[#allocation5 + $0x7c4] ss:$16 sps:$4 sm:$0xff]  }
 0x238   :  { %vm1370_vm0 = vcmp.ge.f32.partialorder %v1241_v21, 0.0  ;;  %v1378_v24 = vmul.f32 0.2, %v1241_v21  ;;  %v1243_v25 = vadd.f32 %v1242_v23, %v533_v18  ;;  %vm1372_vm1 = vcmp.ge.f32.partialorder %v1282_v13, 0.0  ;;  %v9743_v18 = vld [vmem:[#allocation5 + $0x7e4] ss:$16 sps:$4 sm:$0xff]  }
 0x239   :  { %v1380_v27 = vmul.f32 0.2, %v1282_v13  ;;  %v1284_v28 = vadd.f32 %v1283_v26, %v541_v20  ;;  %v1244_v29 = vpop.f32.mrf.mxu0  ;;  %v1285_v31 = vpop.f32.mrf.mxu1  ;;  %v9746_v20 = vld [vmem:[#allocation5 + $0x5c4] ss:$16 sps:$4 sm:$0xff]   ;;  %v9753_v26 = vld [vmem:[#allocation5 + $0x7a0] ss:$16 sps:$4 sm:$0xff]  }
 0x23a   :  { %vm1371_vm2 = vcmp.ge.f32.partialorder %v1243_v25, 0.0  ;;  %v1379_v30 = vmul.f32 0.2, %v1243_v25  ;;  %v1386_v32 = vsel %vm1370_vm0, %v1241_v21, %v1378_v24  ;;  %v9744_v21 = vld [vmem:[#allocation5 + $0x5c0] ss:$16 sps:$4 sm:$0xff]  }
 0x23b   :  { %vm1373_vm3 = vcmp.ge.f32.partialorder %v1284_v28, 0.0  ;;  %v1381_v33 = vmul.f32 0.2, %v1284_v28  ;;  %v1245_v34 = vpop.f32.mrf.mxu0  ;;  %v1388_v36 = vsel %vm1372_vm1, %v1282_v13, %v1380_v27  ;;  %v1286_v37 = vpop.f32.mrf.mxu1  ;;  %v11240_v57 = vpack.c.bf16 %v1386_v32, %v1386_v32  ;;  %v9747_v13 = vld [vmem:[#allocation5 + $0x7c0] ss:$16 sps:$4 sm:$0xff]  }
 0x23c   :  { %v1387_v38 = vsel %vm1371_vm2, %v1243_v25, %v1379_v30  ;;  %v11244_v44 = vpack.c.bf16 %v1388_v36, %v1388_v36  ;;  %v9752_v23 = vld [vmem:[#allocation5 + $0x5a4] ss:$16 sps:$4 sm:$0xff]   ;;  %v9750_v24 = vld [vmem:[#allocation5 + $0x5a0] ss:$16 sps:$4 sm:$0xff]   ;;  %v11251_v36 = vsub.s32 4, %v11213_v9  ;;  %vm4313_vm1 = vcmask 261120  }
 0x23d   :  { %v11238_v41 = vpack.c.bf16 %v1387_v38, %v1387_v38  ;;  %v1389_v42 = vsel %vm1373_vm3, %v1284_v28, %v1381_v33  ;;  %v9755_v25 = vld [vmem:[#allocation5 + $0x7a4] ss:$16 sps:$4 sm:$0xff]   ;;  %v9756_v28 = vld [vmem:[#allocation5 + $0x580] ss:$16 sps:$4 sm:$0xff]  }
 0x23e   :  { %v11242_v43 = vpack.c.bf16 %v1389_v42, %v1389_v42  ;;  %v9758_v27 = vld [vmem:[#allocation5 + $0x584] ss:$16 sps:$4 sm:$0xff]   ;;  %v9759_v30 = vld [vmem:[#allocation5 + $0x780] ss:$16 sps:$4 sm:$0xff]   ;;  %v11260_v42 = vsub.s32 7, %v11213_v9 }
 0x23f   :  { %2992 = vmatprep.mubr.bf16.mxu0 %v11238_v41  ;;  %v9761_v29 = vld [vmem:[#allocation5 + $0x784] ss:$16 sps:$4 sm:$0xff]   ;;  %v9762_v32 = vld [vmem:[#allocation5 + $0x560] ss:$16 sps:$4 sm:$0xff]  }
 0x240   :  { %3033 = vmatprep.mubr.bf16.mxu1 %v11242_v43  ;;  %2993 = vmatmul.mubr.bf16.vlgmr.msra.gmra.mxu0 %v11240_v57  ;;  %v9764_v31 = vld [vmem:[#allocation5 + $0x564] ss:$16 sps:$4 sm:$0xff]   ;;  %v9765_v34 = vld [vmem:[#allocation5 + $0x760] ss:$16 sps:$4 sm:$0xff]  }
 0x241   :  { %3034 = vmatmul.mubr.bf16.vlgmr.msra.gmra.mxu1 %v11244_v44  ;;  %3043 = vmatpush1.bf16.msra.mxu0 %v9690_v35  ;;  %v9767_v33 = vld [vmem:[#allocation5 + $0x764] ss:$16 sps:$4 sm:$0xff]   ;;  %v9768_v37 = vld [vmem:[#allocation5 + $0x540] ss:$16 sps:$4 sm:$0xff]  }
 0x242   :  { %3084 = vmatpush1.bf16.msra.mxu1 %v9693_v39  ;;  %3044 = vmatprep.subr.bf16.mxu0 %v9698_v40  ;;  %v9770_v35 = vld [vmem:[#allocation5 + $0x544] ss:$16 sps:$4 sm:$0xff]   ;;  %v11254_v39 = vsub.s32 6, %v11213_v9  ;;  %v11257_v40 = vsub.s32 5, %v11213_v9  ;;  %v557_v9 = vrot.slane %v11219_v11, %v11260_v42 }
 0x243   :  { %3085 = vmatprep.subr.bf16.mxu1 %v9701_v46  ;;  %v9773_v38 = vld [vmem:[#allocation5 + $0x744] ss:$16 sps:$4 sm:$0xff]   ;;  %v545_v46 = vrot.slane %v11219_v11, %v11251_v36 }
 0x245   :  { %3045 = vmatpush1.bf16.msra.mxu0 %v9696_v45  ;;  %v9771_v45 = vld [vmem:[#allocation5 + $0x740] ss:$16 sps:$4 sm:$0xff]  }
 0x246   :  { %3086 = vmatpush1.bf16.msra.mxu1 %v9699_v47  ;;  %3046 = vmatprep.subr.bf16.mxu0 %v9704_v48  ;;  %v9776_v47 = vld [vmem:[#allocation5 + $0x524] ss:$16 sps:$4 sm:$0xff]  }
 0x247   :  { %3087 = vmatprep.subr.bf16.mxu1 %v9707_v49  ;;  %v9779_v48 = vld [vmem:[#allocation5 + $0x724] ss:$16 sps:$4 sm:$0xff]   ;;  %v553_v49 = vrot.slane %v11219_v11, %v11254_v39 }
 0x249   :  { %3047 = vmatpush1.bf16.msra.mxu0 %v9702_v50  ;;  %v9774_v50 = vld [vmem:[#allocation5 + $0x520] ss:$16 sps:$4 sm:$0xff]  }
 0x24a   :  { %3088 = vmatpush1.bf16.msra.mxu1 %v9705_v51  ;;  %3048 = vmatprep.subr.bf16.mxu0 %v9710_v52  ;;  %v549_v51 = vrot.slane %v11219_v11, %v11257_v40 }
 0x24b   :  { %3089 = vmatprep.subr.bf16.mxu1 %v9713_v54 }
 0x24d   :  { %3049 = vmatpush1.bf16.msra.mxu0 %v9708_v53 }
 0x24e   :  { %3090 = vmatpush1.bf16.msra.mxu1 %v9711_v55  ;;  %3050 = vmatprep.subr.bf16.mxu0 %v9716_v56  ;;  %v9777_v55 = vld [vmem:[#allocation5 + $0x720] ss:$16 sps:$4 sm:$0xff]   ;;  %v9782_v56 = vld [vmem:[#allocation5 + $0x504] ss:$16 sps:$4 sm:$0xff]  }
 0x24f   :  { %3091 = vmatprep.subr.bf16.mxu1 %v9719_v59 }
 0x251   :  { %3051 = vmatpush1.bf16.msra.mxu0 %v9714_v58 }
 0x252   :  { %3092 = vmatpush1.bf16.msra.mxu1 %v9717_v60  ;;  %3052 = vmatprep.subr.bf16.mxu0 %v9722_v61  ;;  %v9785_v60 = vld [vmem:[#allocation5 + $0x704] ss:$16 sps:$4 sm:$0xff]  }
 0x253   :  { %3093 = vmatprep.subr.bf16.mxu1 %v9725_v63 }
 0x255   :  { %3053 = vmatpush1.bf16.msra.mxu0 %v9720_v62 }
 0x256   :  { %3094 = vmatpush1.bf16.msra.mxu1 %v9723_v0  ;;  %3054 = vmatprep.subr.bf16.mxu0 %v9728_v1  ;;  %v9780_v0 = vld [vmem:[#allocation5 + $0x500] ss:$16 sps:$4 sm:$0xff]  }
 0x257   :  { %3095 = vmatprep.subr.bf16.mxu1 %v9731_v3  ;;  %v9783_v3 = vld [vmem:[#allocation5 + $0x700] ss:$16 sps:$4 sm:$0xff]  }
 0x259   :  { %3055 = vmatpush1.bf16.msra.mxu0 %v9726_v2 }
 0x25a   :  { %3096 = vmatpush1.bf16.msra.mxu1 %v9729_v4  ;;  %3056 = vmatprep.subr.bf16.mxu0 %v9734_v5 }
 0x25b   :  { %3097 = vmatprep.subr.bf16.mxu1 %v9737_v7 }
 0x25d   :  { %3057 = vmatpush1.bf16.msra.mxu0 %v9732_v6  ;;  %v9788_v6 = vld [vmem:[#allocation5 + $0xec] ss:$16 sps:$4 sm:$0xff]  }
 0x25e   :  { %3098 = vmatpush1.bf16.msra.mxu1 %v9735_v8  ;;  %3058 = vmatprep.subr.bf16.mxu0 %v9740_v16 }
 0x25f   :  { %3099 = vmatprep.subr.bf16.mxu1 %v9743_v18 }
 0x261   :  { %3059 = vmatpush2.bf16.msra.mxu0 %v9738_v17  ;;  %v9791_v17 = vld [vmem:[#allocation5 + $0x2ec] ss:$16 sps:$4 sm:$0xff]  }
 0x262   :  { %3100 = vmatpush2.bf16.msra.mxu1 %v9741_v19  ;;  %3060 = vmatprep.subr.bf16.mxu0 %v9746_v20 }
 0x263   :  { %3101 = vmatprep.subr.bf16.mxu1 %v9749_v22 }
 0x265   :  { %3061 = vmatpush2.bf16.msra.mxu0 %v9744_v21 }
 0x266   :  { %3102 = vmatpush2.bf16.msra.mxu1 %v9747_v13  ;;  %3062 = vmatprep.subr.bf16.mxu0 %v9752_v23  ;;  %v9786_v13 = vld [vmem:[#allocation5 + $0xe8] ss:$16 sps:$4 sm:$0xff]  }
 0x267   :  { %3103 = vmatprep.subr.bf16.mxu1 %v9755_v25  ;;  %v9789_v25 = vld [vmem:[#allocation5 + $0x2e8] ss:$16 sps:$4 sm:$0xff]  }
 0x269   :  { %3063 = vmatpush2.bf16.msra.mxu0 %v9750_v24 }
 0x26a   :  { %3104 = vmatpush2.bf16.msra.mxu1 %v9753_v26  ;;  %3064 = vmatprep.subr.bf16.mxu0 %v9758_v27  ;;  %v9794_v27 = vld [vmem:[#allocation5 + $0xcc] ss:$16 sps:$4 sm:$0xff]  }
 0x26b   :  { %3105 = vmatprep.subr.bf16.mxu1 %v9761_v29  ;;  %v9792_v29 = vld [vmem:[#allocation5 + $0xc8] ss:$16 sps:$4 sm:$0xff]  }
 0x26d   :  { %3065 = vmatpush2.bf16.msra.mxu0 %v9756_v28  ;;  %v9797_v28 = vld [vmem:[#allocation5 + $0x2cc] ss:$16 sps:$4 sm:$0xff]  }
 0x26e   :  { %3106 = vmatpush2.bf16.msra.mxu1 %v9759_v30  ;;  %3066 = vmatprep.subr.bf16.mxu0 %v9764_v31  ;;  %v9795_v30 = vld [vmem:[#allocation5 + $0x2c8] ss:$16 sps:$4 sm:$0xff]   ;;  %v9800_v31 = vld [vmem:[#allocation5 + $0xac] ss:$16 sps:$4 sm:$0xff]  }
 0x26f   :  { %3107 = vmatprep.subr.bf16.mxu1 %v9767_v33  ;;  %v9798_v33 = vld [vmem:[#allocation5 + $0xa8] ss:$16 sps:$4 sm:$0xff]  }
 0x271   :  { %3067 = vmatpush2.bf16.msra.mxu0 %v9762_v32  ;;  %v9803_v32 = vld [vmem:[#allocation5 + $0x2ac] ss:$16 sps:$4 sm:$0xff]  }
 0x272   :  { %3108 = vmatpush2.bf16.msra.mxu1 %v9765_v34  ;;  %3068 = vmatprep.subr.bf16.mxu0 %v9770_v35  ;;  %v9801_v34 = vld [vmem:[#allocation5 + $0x2a8] ss:$16 sps:$4 sm:$0xff]   ;;  %v9806_v35 = vld [vmem:[#allocation5 + $0x8c] ss:$16 sps:$4 sm:$0xff]  }
 0x273   :  { %3109 = vmatprep.subr.bf16.mxu1 %v9773_v38  ;;  %v9804_v38 = vld [vmem:[#allocation5 + $0x88] ss:$16 sps:$4 sm:$0xff]  }
 0x275   :  { %3069 = vmatpush2.bf16.msra.mxu0 %v9768_v37  ;;  %v1322_v52 = vpop.f32.mrf.mxu0  ;;  %v1363_v54 = vpop.f32.mrf.mxu1  ;;  %v9809_v37 = vld [vmem:[#allocation5 + $0x28c] ss:$16 sps:$4 sm:$0xff]  }
 0x276   :  { %3110 = vmatpush2.bf16.msra.mxu1 %v9771_v45  ;;  %v1323_v53 = vadd.f32 %v1322_v52, %v545_v46  ;;  %3070 = vmatprep.subr.bf16.mxu0 %v9776_v47  ;;  %v1364_v58 = vadd.f32 %v1363_v54, %v553_v49  ;;  %v9812_v45 = vld [vmem:[#allocation5 + $0x6c] ss:$16 sps:$4 sm:$0xff]   ;;  %v9813_v47 = vld [vmem:[#allocation5 + $0x268] ss:$16 sps:$4 sm:$0xff]  }
 0x277   :  { %v1324_v59 = vpop.f32.mrf.mxu0  ;;  %3111 = vmatprep.subr.bf16.mxu1 %v9779_v48  ;;  %v1365_v63 = vpop.f32.mrf.mxu1  ;;  %v9815_v46 = vld [vmem:[#allocation5 + $0x26c] ss:$16 sps:$4 sm:$0xff]   ;;  %v9825_v54 = vld [vmem:[#allocation5 + $0x228] ss:$16 sps:$4 sm:$0xff]  }
 0x278   :  { %vm1374_vm4 = vcmp.ge.f32.partialorder %v1323_v53, 0.0  ;;  %v1382_v61 = vmul.f32 0.2, %v1323_v53  ;;  %v1325_v62 = vadd.f32 %v1324_v59, %v549_v51  ;;  %vm1376_vm5 = vcmp.ge.f32.partialorder %v1364_v58, 0.0  ;;  %v9818_v48 = vld [vmem:[#allocation5 + $0x4c] ss:$16 sps:$4 sm:$0xff]  }
 0x279   :  { %v1384_v1 = vmul.f32 0.2, %v1364_v58  ;;  %v1366_v2 = vadd.f32 %v1365_v63, %v557_v9  ;;  %3071 = vmatpush2.bf16.msra.mxu0 %v9774_v50  ;;  %v1326_v11 = vpop.f32.mrf.mxu0  ;;  %v1367_v5 = vpop.f32.mrf.mxu1  ;;  %v9821_v49 = vld [vmem:[#allocation5 + $0x24c] ss:$16 sps:$4 sm:$0xff]   ;;  %v9816_v50 = vld [vmem:[#allocation5 + $0x48] ss:$16 sps:$4 sm:$0xff]  }
 0x27a   :  { %vm1375_vm6 = vcmp.ge.f32.partialorder %v1325_v62, 0.0  ;;  %v1383_v4 = vmul.f32 0.2, %v1325_v62  ;;  %3112 = vmatpush2.bf16.msra.mxu1 %v9777_v55  ;;  %3072 = vmatprep.subr.bf16.mxu0 %v9782_v56  ;;  %v1390_v7 = vsel %vm1374_vm4, %v1323_v53, %v1382_v61  ;;  %v9819_v51 = vld [vmem:[#allocation5 + $0x248] ss:$16 sps:$4 sm:$0xff]  }
 0x27b   :  { %vm1377_vm7 = vcmp.ge.f32.partialorder %v1366_v2, 0.0  ;;  %v1385_v8 = vmul.f32 0.2, %v1366_v2  ;;  %v1327_v16 = vpop.f32.mrf.mxu0  ;;  %3113 = vmatprep.subr.bf16.mxu1 %v9785_v60  ;;  %v1392_v18 = vsel %vm1376_vm5, %v1364_v58, %v1384_v1  ;;  %v1368_v19 = vpop.f32.mrf.mxu1  ;;  %v11274_v23 = vpack.c.bf16 %v1390_v7, %v1390_v7  ;;  %v9824_v52 = vld [vmem:[#allocation5 + $0x2c] ss:$16 sps:$4 sm:$0xff]  }
 0x27c   :  { %v1391_v20 = vsel %vm1375_vm6, %v1325_v62, %v1383_v4  ;;  %v11278_v26 = vpack.c.bf16 %v1392_v18, %v1392_v18  ;;  %v9827_v9 = vld [vmem:[#allocation5 + $0x22c] ss:$16 sps:$4 sm:$0xff]   ;;  %v9822_v53 = vld [vmem:[#allocation5 + $0x28] ss:$16 sps:$4 sm:$0xff]  }
 0x27d   :  { %3073 = vmatpush2.bf16.msra.mxu0 %v9780_v0  ;;  %v11272_v21 = vpack.c.bf16 %v1391_v20, %v1391_v20  ;;  %v1393_v22 = vsel %vm1377_vm7, %v1366_v2, %v1385_v8  ;;  %v9830_v55 = vld [vmem:[#allocation5 + $0xc] ss:$16 sps:$4 sm:$0xff]   ;;  %v9828_v58 = vld [vmem:[#allocation5 + $0x8] ss:$16 sps:$4 sm:$0xff]  }
 0x27e   :  { %3114 = vmatpush2.bf16.msra.mxu1 %v9783_v3  ;;  %v11276_v24 = vpack.c.bf16 %v1393_v22, %v1393_v22  ;;  %3124 = vmatprep.subr.bf16.mxu0 %v9788_v6  ;;  %v9833_v56 = vld [vmem:[#allocation5 + $0x20c] ss:$16 sps:$4 sm:$0xff]   ;;  %v9831_v59 = vld [vmem:[#allocation5 + $0x208] ss:$16 sps:$4 sm:$0xff]  }
 0x27f   :  { %3074 = vmatprep.mubr.bf16.mxu0 %v11272_v21  ;;  %3165 = vmatprep.subr.bf16.mxu1 %v9791_v17  ;;  %v9836_v60 = vld [vmem:[#allocation5 + $0x1ec] ss:$16 sps:$4 sm:$0xff]   ;;  %v9834_v62 = vld [vmem:[#allocation5 + $0x1e8] ss:$16 sps:$4 sm:$0xff]  }
 0x280   :  { %3115 = vmatprep.mubr.bf16.mxu1 %v11276_v24  ;;  %3075 = vmatmul.mubr.bf16.vlgmr.msra.gmra.mxu0 %v11274_v23  ;;  %v9839_v61 = vld [vmem:[#allocation5 + $0x3ec] ss:$16 sps:$4 sm:$0xff]   ;;  %v9837_v63 = vld [vmem:[#allocation5 + $0x3e8] ss:$16 sps:$4 sm:$0xff]  }
 0x281   :  { %3116 = vmatmul.mubr.bf16.vlgmr.msra.gmra.mxu1 %v11278_v26  ;;  %3125 = vmatpush1.bf16.msra.mxu0 %v9786_v13  ;;  %v9842_v0 = vld [vmem:[#allocation5 + $0x1cc] ss:$16 sps:$4 sm:$0xff]   ;;  %v9840_v2 = vld [vmem:[#allocation5 + $0x1c8] ss:$16 sps:$4 sm:$0xff]  }
 0x282   :  { %3166 = vmatpush1.bf16.msra.mxu1 %v9789_v25  ;;  %3156 = vmatprep.mubr.bf16.mxu0 %v11238_v41  ;;  %v9807_v41 = vld [vmem:[#allocation5 + $0x288] ss:$16 sps:$4 sm:$0xff]   ;;  %v9845_v1 = vld [vmem:[#allocation5 + $0x3cc] ss:$16 sps:$4 sm:$0xff]  }
 0x283   :  { %3197 = vmatprep.mubr.bf16.mxu1 %v11242_v43  ;;  %3126 = vmatprep.subr.bf16.mxu0 %v9794_v27  ;;  %v9810_v43 = vld [vmem:[#allocation5 + $0x68] ss:$16 sps:$4 sm:$0xff]   ;;  %v9848_v3 = vld [vmem:[#allocation5 + $0x1ac] ss:$16 sps:$4 sm:$0xff]  }
 0x284   :  { %3167 = vmatprep.subr.bf16.mxu1 %v9797_v28  ;;  %v9843_v11 = vld [vmem:[#allocation5 + $0x3c8] ss:$16 sps:$4 sm:$0xff]   ;;  %v9851_v4 = vld [vmem:[#allocation5 + $0x3ac] ss:$16 sps:$4 sm:$0xff]  }
 0x285   :  { %3127 = vmatpush1.bf16.msra.mxu0 %v9792_v29  ;;  %v9846_v5 = vld [vmem:[#allocation5 + $0x1a8] ss:$16 sps:$4 sm:$0xff]   ;;  %v9854_v7 = vld [vmem:[#allocation5 + $0x18c] ss:$16 sps:$4 sm:$0xff]  }
 0x286   :  { %3168 = vmatpush1.bf16.msra.mxu1 %v9795_v30  ;;  %3128 = vmatprep.subr.bf16.mxu0 %v9800_v31  ;;  %v9849_v6 = vld [vmem:[#allocation5 + $0x3a8] ss:$16 sps:$4 sm:$0xff]   ;;  %v9857_v8 = vld [vmem:[#allocation5 + $0x38c] ss:$16 sps:$4 sm:$0xff]  }
 0x287   :  { %3169 = vmatprep.subr.bf16.mxu1 %v9803_v32  ;;  %v9852_v16 = vld [vmem:[#allocation5 + $0x188] ss:$16 sps:$4 sm:$0xff]   ;;  %v9860_v18 = vld [vmem:[#allocation5 + $0x16c] ss:$16 sps:$4 sm:$0xff]  }
 0x288   :  { %v9855_v17 = vld [vmem:[#allocation5 + $0x388] ss:$16 sps:$4 sm:$0xff]   ;;  %v9863_v19 = vld [vmem:[#allocation5 + $0x36c] ss:$16 sps:$4 sm:$0xff]  }
 0x289   :  { %3129 = vmatpush1.bf16.msra.mxu0 %v9798_v33  ;;  %v9858_v20 = vld [vmem:[#allocation5 + $0x168] ss:$16 sps:$4 sm:$0xff]   ;;  %v9866_v13 = vld [vmem:[#allocation5 + $0x14c] ss:$16 sps:$4 sm:$0xff]  }
 0x28a   :  { %3170 = vmatpush1.bf16.msra.mxu1 %v9801_v34  ;;  %3130 = vmatprep.subr.bf16.mxu0 %v9806_v35  ;;  %v9861_v22 = vld [vmem:[#allocation5 + $0x368] ss:$16 sps:$4 sm:$0xff]   ;;  %v9869_v25 = vld [vmem:[#allocation5 + $0x34c] ss:$16 sps:$4 sm:$0xff]  }
 0x28b   :  { %3171 = vmatprep.subr.bf16.mxu1 %v9809_v37  ;;  %v9864_v27 = vld [vmem:[#allocation5 + $0x148] ss:$16 sps:$4 sm:$0xff]   ;;  %v9872_v29 = vld [vmem:[#allocation5 + $0x12c] ss:$16 sps:$4 sm:$0xff]  }
 0x28c   :  { %v9867_v28 = vld [vmem:[#allocation5 + $0x348] ss:$16 sps:$4 sm:$0xff]   ;;  %v9875_v30 = vld [vmem:[#allocation5 + $0x32c] ss:$16 sps:$4 sm:$0xff]  }
 0x28d   :  { %3131 = vmatpush1.bf16.msra.mxu0 %v9804_v38  ;;  %v9870_v31 = vld [vmem:[#allocation5 + $0x128] ss:$16 sps:$4 sm:$0xff]   ;;  %v9878_v33 = vld [vmem:[#allocation5 + $0x10c] ss:$16 sps:$4 sm:$0xff]  }
 0x28e   :  { %3172 = vmatpush1.bf16.msra.mxu1 %v9807_v41  ;;  %3132 = vmatprep.subr.bf16.mxu0 %v9812_v45  ;;  %v9873_v32 = vld [vmem:[#allocation5 + $0x328] ss:$16 sps:$4 sm:$0xff]   ;;  %v9881_v34 = vld [vmem:[#allocation5 + $0x30c] ss:$16 sps:$4 sm:$0xff]  }
 0x28f   :  { %3173 = vmatprep.subr.bf16.mxu1 %v9815_v46  ;;  %v9876_v35 = vld [vmem:[#allocation5 + $0x108] ss:$16 sps:$4 sm:$0xff]   ;;  %v9884_v38 = vld [vmem:[#allocation5 + $0x4ec] ss:$16 sps:$4 sm:$0xff]  }
 0x290   :  { %v9879_v37 = vld [vmem:[#allocation5 + $0x308] ss:$16 sps:$4 sm:$0xff]   ;;  %v9887_v41 = vld [vmem:[#allocation5 + $0x6ec] ss:$16 sps:$4 sm:$0xff]  }
 0x291   :  { %3133 = vmatpush1.bf16.msra.mxu0 %v9810_v43  ;;  %v9882_v45 = vld [vmem:[#allocation5 + $0x4e8] ss:$16 sps:$4 sm:$0xff]   ;;  %v9890_v43 = vld [vmem:[#allocation5 + $0x4cc] ss:$16 sps:$4 sm:$0xff]  }
 0x292   :  { %3174 = vmatpush1.bf16.msra.mxu1 %v9813_v47  ;;  %3134 = vmatprep.subr.bf16.mxu0 %v9818_v48  ;;  %v9885_v46 = vld [vmem:[#allocation5 + $0x6e8] ss:$16 sps:$4 sm:$0xff]   ;;  %v9893_v47 = vld [vmem:[#allocation5 + $0x6cc] ss:$16 sps:$4 sm:$0xff]  }
 0x293   :  { %3175 = vmatprep.subr.bf16.mxu1 %v9821_v49  ;;  %v9888_v48 = vld [vmem:[#allocation5 + $0x4c8] ss:$16 sps:$4 sm:$0xff]  }
 0x294   :  { %v9891_v49 = vld [vmem:[#allocation5 + $0x6c8] ss:$16 sps:$4 sm:$0xff]  }
 0x295   :  { %3135 = vmatpush1.bf16.msra.mxu0 %v9816_v50  ;;  %v9896_v50 = vld [vmem:[#allocation5 + $0x4ac] ss:$16 sps:$4 sm:$0xff]  }
 0x296   :  { %3176 = vmatpush1.bf16.msra.mxu1 %v9819_v51  ;;  %3136 = vmatprep.subr.bf16.mxu0 %v9824_v52  ;;  %v9899_v51 = vld [vmem:[#allocation5 + $0x6ac] ss:$16 sps:$4 sm:$0xff]   ;;  %v9894_v52 = vld [vmem:[#allocation5 + $0x4a8] ss:$16 sps:$4 sm:$0xff]  }
 0x297   :  { %3177 = vmatprep.subr.bf16.mxu1 %v9827_v9  ;;  %v9902_v9 = vld [vmem:[#allocation5 + $0x48c] ss:$16 sps:$4 sm:$0xff]  }
 0x299   :  { %3137 = vmatpush1.bf16.msra.mxu0 %v9822_v53  ;;  %v9900_v53 = vld [vmem:[#allocation5 + $0x488] ss:$16 sps:$4 sm:$0xff]  }
 0x29a   :  { %3178 = vmatpush1.bf16.msra.mxu1 %v9825_v54  ;;  %3138 = vmatprep.subr.bf16.mxu0 %v9830_v55  ;;  %v9908_v54 = vld [vmem:[#allocation5 + $0x46c] ss:$16 sps:$4 sm:$0xff]  }
 0x29b   :  { %3179 = vmatprep.subr.bf16.mxu1 %v9833_v56  ;;  %v9911_v55 = vld [vmem:[#allocation5 + $0x66c] ss:$16 sps:$4 sm:$0xff]   ;;  %v9909_v56 = vld [vmem:[#allocation5 + $0x668] ss:$16 sps:$4 sm:$0xff]  }
 0x29d   :  { %3139 = vmatpush1.bf16.msra.mxu0 %v9828_v58  ;;  %v9914_v58 = vld [vmem:[#allocation5 + $0x44c] ss:$16 sps:$4 sm:$0xff]  }
 0x29e   :  { %3180 = vmatpush1.bf16.msra.mxu1 %v9831_v59  ;;  %3140 = vmatprep.subr.bf16.mxu0 %v9836_v60  ;;  %v9917_v59 = vld [vmem:[#allocation5 + $0x64c] ss:$16 sps:$4 sm:$0xff]   ;;  %v9912_v60 = vld [vmem:[#allocation5 + $0x448] ss:$16 sps:$4 sm:$0xff]  }
 0x29f   :  { %3181 = vmatprep.subr.bf16.mxu1 %v9839_v61  ;;  %v9915_v61 = vld [vmem:[#allocation5 + $0x648] ss:$16 sps:$4 sm:$0xff]  }
 0x2a1   :  { %3141 = vmatpush2.bf16.msra.mxu0 %v9834_v62  ;;  %v9920_v62 = vld [vmem:[#allocation5 + $0x42c] ss:$16 sps:$4 sm:$0xff]  }
 0x2a2   :  { %3182 = vmatpush2.bf16.msra.mxu1 %v9837_v63  ;;  %3142 = vmatprep.subr.bf16.mxu0 %v9842_v0  ;;  %v9923_v63 = vld [vmem:[#allocation5 + $0x62c] ss:$16 sps:$4 sm:$0xff]   ;;  %v9918_v0 = vld [vmem:[#allocation5 + $0x428] ss:$16 sps:$4 sm:$0xff]  }
 0x2a3   :  { %3183 = vmatprep.subr.bf16.mxu1 %v9845_v1  ;;  %v9921_v1 = vld [vmem:[#allocation5 + $0x628] ss:$16 sps:$4 sm:$0xff]  }
 0x2a5   :  { %3143 = vmatpush2.bf16.msra.mxu0 %v9840_v2  ;;  %v9926_v2 = vld [vmem:[#allocation5 + $0x40c] ss:$16 sps:$4 sm:$0xff]  }
 0x2a6   :  { %3184 = vmatpush2.bf16.msra.mxu1 %v9843_v11  ;;  %3144 = vmatprep.subr.bf16.mxu0 %v9848_v3  ;;  %v9929_v11 = vld [vmem:[#allocation5 + $0x60c] ss:$16 sps:$4 sm:$0xff]   ;;  %v9924_v3 = vld [vmem:[#allocation5 + $0x408] ss:$16 sps:$4 sm:$0xff]  }
 0x2a7   :  { %3185 = vmatprep.subr.bf16.mxu1 %v9851_v4  ;;  %v9927_v4 = vld [vmem:[#allocation5 + $0x608] ss:$16 sps:$4 sm:$0xff]  }
 0x2a9   :  { %3145 = vmatpush2.bf16.msra.mxu0 %v9846_v5  ;;  %v9932_v5 = vld [vmem:[#allocation5 + $0x5ec] ss:$16 sps:$4 sm:$0xff]  }
 0x2aa   :  { %3186 = vmatpush2.bf16.msra.mxu1 %v9849_v6  ;;  %3146 = vmatprep.subr.bf16.mxu0 %v9854_v7  ;;  %v9935_v6 = vld [vmem:[#allocation5 + $0x7ec] ss:$16 sps:$4 sm:$0xff]   ;;  %v9930_v7 = vld [vmem:[#allocation5 + $0x5e8] ss:$16 sps:$4 sm:$0xff]  }
 0x2ab   :  { %3187 = vmatprep.subr.bf16.mxu1 %v9857_v8  ;;  %v9933_v8 = vld [vmem:[#allocation5 + $0x7e8] ss:$16 sps:$4 sm:$0xff]  }
 0x2ad   :  { %3147 = vmatpush2.bf16.msra.mxu0 %v9852_v16  ;;  %v9938_v16 = vld [vmem:[#allocation5 + $0x5cc] ss:$16 sps:$4 sm:$0xff]  }
 0x2ae   :  { %3188 = vmatpush2.bf16.msra.mxu1 %v9855_v17  ;;  %3148 = vmatprep.subr.bf16.mxu0 %v9860_v18  ;;  %v9941_v17 = vld [vmem:[#allocation5 + $0x7cc] ss:$16 sps:$4 sm:$0xff]   ;;  %v9936_v18 = vld [vmem:[#allocation5 + $0x5c8] ss:$16 sps:$4 sm:$0xff]  }
 0x2af   :  { %3189 = vmatprep.subr.bf16.mxu1 %v9863_v19  ;;  %v9939_v19 = vld [vmem:[#allocation5 + $0x7c8] ss:$16 sps:$4 sm:$0xff]  }
 0x2b1   :  { %3149 = vmatpush2.bf16.msra.mxu0 %v9858_v20  ;;  %v9944_v20 = vld [vmem:[#allocation5 + $0x5ac] ss:$16 sps:$4 sm:$0xff]  }
 0x2b2   :  { %3190 = vmatpush2.bf16.msra.mxu1 %v9861_v22  ;;  %3150 = vmatprep.subr.bf16.mxu0 %v9866_v13  ;;  %v9947_v22 = vld [vmem:[#allocation5 + $0x7ac] ss:$16 sps:$4 sm:$0xff]   ;;  %v9942_v13 = vld [vmem:[#allocation5 + $0x5a8] ss:$16 sps:$4 sm:$0xff]  }
 0x2b3   :  { %3191 = vmatprep.subr.bf16.mxu1 %v9869_v25  ;;  %v9945_v25 = vld [vmem:[#allocation5 + $0x7a8] ss:$16 sps:$4 sm:$0xff]  }
 0x2b5   :  { %3151 = vmatpush2.bf16.msra.mxu0 %v9864_v27  ;;  %v9950_v27 = vld [vmem:[#allocation5 + $0x58c] ss:$16 sps:$4 sm:$0xff]  }
 0x2b6   :  { %3192 = vmatpush2.bf16.msra.mxu1 %v9867_v28  ;;  %3152 = vmatprep.subr.bf16.mxu0 %v9872_v29  ;;  %v9953_v28 = vld [vmem:[#allocation5 + $0x78c] ss:$16 sps:$4 sm:$0xff]   ;;  %v9948_v29 = vld [vmem:[#allocation5 + $0x588] ss:$16 sps:$4 sm:$0xff]  }
 0x2b7   :  { %3193 = vmatprep.subr.bf16.mxu1 %v9875_v30  ;;  %v9951_v30 = vld [vmem:[#allocation5 + $0x788] ss:$16 sps:$4 sm:$0xff]  }
 0x2b9   :  { %3153 = vmatpush2.bf16.msra.mxu0 %v9870_v31  ;;  %v9956_v31 = vld [vmem:[#allocation5 + $0x56c] ss:$16 sps:$4 sm:$0xff]  }
 0x2ba   :  { %3194 = vmatpush2.bf16.msra.mxu1 %v9873_v32  ;;  %3154 = vmatprep.subr.bf16.mxu0 %v9878_v33  ;;  %v9959_v32 = vld [vmem:[#allocation5 + $0x76c] ss:$16 sps:$4 sm:$0xff]   ;;  %v9954_v33 = vld [vmem:[#allocation5 + $0x568] ss:$16 sps:$4 sm:$0xff]  }
 0x2bb   :  { %3195 = vmatprep.subr.bf16.mxu1 %v9881_v34  ;;  %v9957_v34 = vld [vmem:[#allocation5 + $0x768] ss:$16 sps:$4 sm:$0xff]  }
 0x2bd   :  { %3155 = vmatpush2.bf16.msra.mxu0 %v9876_v35  ;;  %v9962_v35 = vld [vmem:[#allocation5 + $0x54c] ss:$16 sps:$4 sm:$0xff]  }
 0x2be   :  { %3196 = vmatpush2.bf16.msra.mxu1 %v9879_v37  ;;  %3206 = vmatprep.subr.bf16.mxu0 %v9884_v38  ;;  %v9965_v37 = vld [vmem:[#allocation5 + $0x74c] ss:$16 sps:$4 sm:$0xff]   ;;  %v9960_v38 = vld [vmem:[#allocation5 + $0x548] ss:$16 sps:$4 sm:$0xff]  }
 0x2bf   :  { %3247 = vmatprep.subr.bf16.mxu1 %v9887_v41  ;;  %v9963_v41 = vld [vmem:[#allocation5 + $0x748] ss:$16 sps:$4 sm:$0xff]  }
 0x2c0   :  { %3157 = vmatmul.mubr.bf16.vlgmr.msra.gmra.mxu0 %v11240_v57  ;;  %v9897_v57 = vld [vmem:[#allocation5 + $0x6a8] ss:$16 sps:$4 sm:$0xff]  }
 0x2c1   :  { %3198 = vmatmul.mubr.bf16.vlgmr.msra.gmra.mxu1 %v11244_v44  ;;  %3207 = vmatpush1.bf16.msra.mxu0 %v9882_v45  ;;  %v9905_v44 = vld [vmem:[#allocation5 + $0x68c] ss:$16 sps:$4 sm:$0xff]  }
 0x2c2   :  { %3238 = vmatprep.mubr.bf16.mxu0 %v11272_v21  ;;  %3248 = vmatpush1.bf16.msra.mxu1 %v9885_v46  ;;  %v9903_v21 = vld [vmem:[#allocation5 + $0x688] ss:$16 sps:$4 sm:$0xff]   ;;  %v9968_v45 = vld [vmem:[#allocation5 + $0x52c] ss:$16 sps:$4 sm:$0xff]  }
 0x2c3   :  { %3279 = vmatprep.mubr.bf16.mxu1 %v11276_v24  ;;  %3208 = vmatprep.subr.bf16.mxu0 %v9890_v43  ;;  %v9906_v24 = vld [vmem:[#allocation5 + $0x468] ss:$16 sps:$4 sm:$0xff]   ;;  %v9971_v46 = vld [vmem:[#allocation5 + $0x72c] ss:$16 sps:$4 sm:$0xff]  }
 0x2c4   :  { %3249 = vmatprep.subr.bf16.mxu1 %v9893_v47  ;;  %v9966_v43 = vld [vmem:[#allocation5 + $0x528] ss:$16 sps:$4 sm:$0xff]  }
 0x2c5   :  { %3209 = vmatpush1.bf16.msra.mxu0 %v9888_v48  ;;  %v9969_v47 = vld [vmem:[#allocation5 + $0x728] ss:$16 sps:$4 sm:$0xff]   ;;  %v9974_v48 = vld [vmem:[#allocation5 + $0x50c] ss:$16 sps:$4 sm:$0xff]  }
 0x2c6   :  { %3250 = vmatpush1.bf16.msra.mxu1 %v9891_v49  ;;  %3210 = vmatprep.subr.bf16.mxu0 %v9896_v50  ;;  %v9977_v49 = vld [vmem:[#allocation5 + $0x70c] ss:$16 sps:$4 sm:$0xff]   ;;  %v9972_v50 = vld [vmem:[#allocation5 + $0x508] ss:$16 sps:$4 sm:$0xff]  }
 0x2c7   :  { %3251 = vmatprep.subr.bf16.mxu1 %v9899_v51  ;;  %v9975_v51 = vld [vmem:[#allocation5 + $0x708] ss:$16 sps:$4 sm:$0xff]  }
 0x2c9   :  { %3211 = vmatpush1.bf16.msra.mxu0 %v9894_v52  ;;  %v9980_v52 = vld [vmem:[#allocation11 + $0x74] ss:$8 sps:$4 sm:$0xff]  }
 0x2ca   :  { %3252 = vmatpush1.bf16.msra.mxu1 %v9897_v57  ;;  %3212 = vmatprep.subr.bf16.mxu0 %v9902_v9  ;;  %v9978_v57 = vld [vmem:[#allocation11 + $0x70] ss:$8 sps:$4 sm:$0xff]   ;;  %v9983_v9 = vld [vmem:[#allocation11 + $0x64] ss:$8 sps:$4 sm:$0xff]  }
 0x2cb   :  { %3253 = vmatprep.subr.bf16.mxu1 %v9905_v44 }
 0x2cd   :  { %3213 = vmatpush1.bf16.msra.mxu0 %v9900_v53 }
 0x2ce   :  { %3254 = vmatpush1.bf16.msra.mxu1 %v9903_v21  ;;  %3214 = vmatprep.subr.bf16.mxu0 %v9908_v54  ;;  %v9981_v21 = vld [vmem:[#allocation11 + $0x60] ss:$8 sps:$4 sm:$0xff]  }
 0x2cf   :  { %3255 = vmatprep.subr.bf16.mxu1 %v9911_v55  ;;  %v9986_v55 = vld [vmem:[#allocation11 + $0x54] ss:$8 sps:$4 sm:$0xff]  }
 0x2d1   :  { %3215 = vmatpush1.bf16.msra.mxu0 %v9906_v24 }
 0x2d2   :  { %3256 = vmatpush1.bf16.msra.mxu1 %v9909_v56  ;;  %3216 = vmatprep.subr.bf16.mxu0 %v9914_v58 }
 0x2d3   :  { %3257 = vmatprep.subr.bf16.mxu1 %v9917_v59  ;;  %v9984_v59 = vld [vmem:[#allocation11 + $0x50] ss:$8 sps:$4 sm:$0xff]  }
 0x2d5   :  { %3217 = vmatpush1.bf16.msra.mxu0 %v9912_v60 }
 0x2d6   :  { %3258 = vmatpush1.bf16.msra.mxu1 %v9915_v61  ;;  %3218 = vmatprep.subr.bf16.mxu0 %v9920_v62  ;;  %v9992_v62 = vld [vmem:[#allocation11 + $0x34] ss:$8 sps:$4 sm:$0xff]  }
 0x2d7   :  { %3259 = vmatprep.subr.bf16.mxu1 %v9923_v63  ;;  %v9990_v63 = vld [vmem:[#allocation11 + $0x30] ss:$8 sps:$4 sm:$0xff]  }
 0x2d9   :  { %3219 = vmatpush1.bf16.msra.mxu0 %v9918_v0  ;;  %v9995_v0 = vld [vmem:[#allocation11 + $0x24] ss:$8 sps:$4 sm:$0xff]  }
 0x2da   :  { %3260 = vmatpush1.bf16.msra.mxu1 %v9921_v1  ;;  %3220 = vmatprep.subr.bf16.mxu0 %v9926_v2  ;;  %v9993_v1 = vld [vmem:[#allocation11 + $0x20] ss:$8 sps:$4 sm:$0xff]   ;;  %v9998_v2 = vld [vmem:[#allocation11 + $0x14] ss:$8 sps:$4 sm:$0xff]  }
 0x2db   :  { %3261 = vmatprep.subr.bf16.mxu1 %v9929_v11  ;;  %v9996_v11 = vld [vmem:[#allocation11 + $0x10] ss:$8 sps:$4 sm:$0xff]  }
 0x2dd   :  { %3221 = vmatpush1.bf16.msra.mxu0 %v9924_v3  ;;  %v10001_v3 = vld [vmem:[#allocation11 + $0x4] ss:$8 sps:$4 sm:$0xff]  }
 0x2de   :  { %3262 = vmatpush1.bf16.msra.mxu1 %v9927_v4  ;;  %3222 = vmatprep.subr.bf16.mxu0 %v9932_v5  ;;  %v9999_v4 = vld [vmem:[#allocation11] ss:$8 sps:$4 sm:$0xff]   ;;  %v10004_v5 = vld [vmem:[#allocation11 + $0xf4] ss:$8 sps:$4 sm:$0xff]  }
 0x2df   :  { %3263 = vmatprep.subr.bf16.mxu1 %v9935_v6  ;;  %v10002_v6 = vld [vmem:[#allocation11 + $0xf0] ss:$8 sps:$4 sm:$0xff]  }
 0x2e1   :  { %3223 = vmatpush2.bf16.msra.mxu0 %v9930_v7  ;;  %v10007_v7 = vld [vmem:[#allocation11 + $0xe4] ss:$8 sps:$4 sm:$0xff]  }
 0x2e2   :  { %3264 = vmatpush2.bf16.msra.mxu1 %v9933_v8  ;;  %3224 = vmatprep.subr.bf16.mxu0 %v9938_v16  ;;  %v10005_v8 = vld [vmem:[#allocation11 + $0xe0] ss:$8 sps:$4 sm:$0xff]   ;;  %v10010_v16 = vld [vmem:[#allocation11 + $0xd4] ss:$8 sps:$4 sm:$0xff]  }
 0x2e3   :  { %3265 = vmatprep.subr.bf16.mxu1 %v9941_v17  ;;  %v10008_v17 = vld [vmem:[#allocation11 + $0xd0] ss:$8 sps:$4 sm:$0xff]  }
 0x2e5   :  { %3225 = vmatpush2.bf16.msra.mxu0 %v9936_v18  ;;  %v10013_v18 = vld [vmem:[#allocation11 + $0xc4] ss:$8 sps:$4 sm:$0xff]  }
 0x2e6   :  { %3266 = vmatpush2.bf16.msra.mxu1 %v9939_v19  ;;  %3226 = vmatprep.subr.bf16.mxu0 %v9944_v20  ;;  %v10011_v19 = vld [vmem:[#allocation11 + $0xc0] ss:$8 sps:$4 sm:$0xff]   ;;  %v10016_v20 = vld [vmem:[#allocation11 + $0xb4] ss:$8 sps:$4 sm:$0xff]  }
 0x2e7   :  { %3267 = vmatprep.subr.bf16.mxu1 %v9947_v22  ;;  %v10014_v22 = vld [vmem:[#allocation11 + $0xb0] ss:$8 sps:$4 sm:$0xff]  }
 0x2e9   :  { %3227 = vmatpush2.bf16.msra.mxu0 %v9942_v13  ;;  %v10019_v13 = vld [vmem:[#allocation11 + $0xa4] ss:$8 sps:$4 sm:$0xff]  }
 0x2ea   :  { %3268 = vmatpush2.bf16.msra.mxu1 %v9945_v25  ;;  %3228 = vmatprep.subr.bf16.mxu0 %v9950_v27  ;;  %v10017_v25 = vld [vmem:[#allocation11 + $0xa0] ss:$8 sps:$4 sm:$0xff]   ;;  %v10022_v27 = vld [vmem:[#allocation11 + $0x94] ss:$8 sps:$4 sm:$0xff]  }
 0x2eb   :  { %3269 = vmatprep.subr.bf16.mxu1 %v9953_v28  ;;  %v11300_v28 = vld [vmem:[#allocation7] sm:$0xf] }
 0x2ed   :  { %3229 = vmatpush2.bf16.msra.mxu0 %v9948_v29  ;;  %v10020_v29 = vld [vmem:[#allocation11 + $0x90] ss:$8 sps:$4 sm:$0xff]  }
 0x2ee   :  { %3270 = vmatpush2.bf16.msra.mxu1 %v9951_v30  ;;  %3230 = vmatprep.subr.bf16.mxu0 %v9956_v31  ;;  %v10025_v30 = vld [vmem:[#allocation11 + $0x84] ss:$8 sps:$4 sm:$0xff]   ;;  %v1663_v31 = vrot.slane %v11300_v28, %v11216_v10 }
 0x2ef   :  { %3271 = vmatprep.subr.bf16.mxu1 %v9959_v32  ;;  %v1667_v32 = vrot.slane %v11300_v28, %v11225_v14 }
 0x2f1   :  { %3231 = vmatpush2.bf16.msra.mxu0 %v9954_v33  ;;  %v10023_v33 = vld [vmem:[#allocation11 + $0x80] ss:$8 sps:$4 sm:$0xff]  }
 0x2f2   :  { %3272 = vmatpush2.bf16.msra.mxu1 %v9957_v34  ;;  %3232 = vmatprep.subr.bf16.mxu0 %v9962_v35 }
 0x2f3   :  { %3273 = vmatprep.subr.bf16.mxu1 %v9965_v37 }
 0x2f5   :  { %3233 = vmatpush2.bf16.msra.mxu0 %v9960_v38 }
 0x2f6   :  { %3274 = vmatpush2.bf16.msra.mxu1 %v9963_v41  ;;  %3234 = vmatprep.subr.bf16.mxu0 %v9968_v45 }
 0x2f7   :  { %3275 = vmatprep.subr.bf16.mxu1 %v9971_v46 }
 0x2f9   :  { %3235 = vmatpush2.bf16.msra.mxu0 %v9966_v43 }
 0x2fa   :  { %3276 = vmatpush2.bf16.msra.mxu1 %v9969_v47  ;;  %3236 = vmatprep.subr.bf16.mxu0 %v9974_v48 }
 0x2fb   :  { %3277 = vmatprep.subr.bf16.mxu1 %v9977_v49 }
 0x2fd   :  { %3237 = vmatpush2.bf16.msra.mxu0 %v9972_v50  ;;  %v10028_v50 = vld [vmem:[#allocation11 + $0x174] ss:$8 sps:$4 sm:$0xff]  }
 0x2fe   :  { %3278 = vmatpush2.bf16.msra.mxu1 %v9975_v51  ;;  %3829 = vmatprep.subr.bf16.mxu0 %v9980_v52  ;;  %v10026_v52 = vld [vmem:[#allocation11 + $0x170] ss:$8 sps:$4 sm:$0xff]  }
 0x2ff   :  { %3870 = vmatprep.subr.bf16.mxu1 %v10028_v50 }
 0x300   :  { %3239 = vmatmul.mubr.bf16.vlgmr.msra.gmra.mxu0 %v11274_v23  ;;  %v11291_v44 = vpop.f32.mrf.mxu0  ;;  %v9989_v23 = vld [vmem:[#allocation11 + $0x44] ss:$8 sps:$4 sm:$0xff]  }
 0x301   :  { %3280 = vmatmul.mubr.bf16.vlgmr.msra.gmra.mxu1 %v11278_v26  ;;  %v11294_v53 = vpop.f32.mrf.mxu1  ;;  %3830 = vmatpush1.bf16.msra.mxu0 %v9978_v57  ;;  %v9987_v26 = vld [vmem:[#allocation11 + $0x40] ss:$8 sps:$4 sm:$0xff]   ;;  %v2995_v34 = vadd.f32 %v11291_v44, %v1663_v31  ;;  %v10044_v31 = vld [vmem:[#allocation11 + $0x110] ss:$8 sps:$4 sm:$0xff]  }
 0x302   :  { %v11296_v54 = vpop.f32.mrf.mxu0  ;;  %3831 = vmatprep.subr.bf16.mxu0 %v9983_v9  ;;  %3871 = vmatpush1.bf16.msra.mxu1 %v10026_v52  ;;  %v10055_v52 = vld [vmem:[#allocation11 + $0x1e4] ss:$8 sps:$4 sm:$0xff]  }
 0x303   :  { %v11298_v24 = vpop.f32.mrf.mxu1  ;;  %v2997_v35 = vadd.f32 %v11296_v54, %v1667_v32  ;;  %v3036_v37 = vadd.f32 %v11294_v53, %v2995_v34 }
 0x304   :  { %v2998_v56 = vpop.f32.mrf.mxu0 }
 0x305   :  { %v3039_v58 = vpop.f32.mrf.mxu1  ;;  %3832 = vmatpush1.bf16.msra.mxu0 %v9981_v21  ;;  %v3038_v41 = vadd.f32 %v11298_v24, %v2997_v35  ;;  %v10031_v56 = vld [vmem:[#allocation11 + $0x164] ss:$8 sps:$4 sm:$0xff]   ;;  %v10029_v24 = vld [vmem:[#allocation11 + $0x160] ss:$8 sps:$4 sm:$0xff]  }
 0x306   :  { %v2999_v60 = vpop.f32.mrf.mxu0  ;;  %3833 = vmatprep.subr.bf16.mxu0 %v9986_v55  ;;  %3872 = vmatprep.subr.bf16.mxu1 %v10031_v56 }
 0x307   :  { %v3040_v61 = vpop.f32.mrf.mxu1  ;;  %3873 = vmatpush1.bf16.msra.mxu1 %v10029_v24  ;;  %v10064_v24 = vld [vmem:[#allocation11 + $0x1b4] ss:$8 sps:$4 sm:$0xff]  }
 0x308   :  { %v10034_v61 = vld [vmem:[#allocation11 + $0x154] ss:$8 sps:$4 sm:$0xff]  }
 0x309   :  { %3834 = vmatpush1.bf16.msra.mxu0 %v9984_v59  ;;  %3874 = vmatprep.subr.bf16.mxu1 %v10034_v61 }
 0x30a   :  { %3835 = vmatprep.subr.bf16.mxu0 %v9989_v23 }
 0x30d   :  { %3836 = vmatpush1.bf16.msra.mxu0 %v9987_v26  ;;  %v10032_v26 = vld [vmem:[#allocation11 + $0x150] ss:$8 sps:$4 sm:$0xff]  }
 0x30e   :  { %3837 = vmatprep.subr.bf16.mxu0 %v9992_v62  ;;  %3875 = vmatpush1.bf16.msra.mxu1 %v10032_v26 }
 0x311   :  { %3838 = vmatpush1.bf16.msra.mxu0 %v9990_v63 }
 0x312   :  { %3839 = vmatprep.subr.bf16.mxu0 %v9995_v0 }
 0x315   :  { %3840 = vmatpush1.bf16.msra.mxu0 %v9993_v1 }
 0x316   :  { %3841 = vmatprep.subr.bf16.mxu0 %v9998_v2  ;;  %v10037_v2 = vld [vmem:[#allocation11 + $0x144] ss:$8 sps:$4 sm:$0xff]  }
 0x317   :  { %3876 = vmatprep.subr.bf16.mxu1 %v10037_v2  ;;  %v10065_v2 = vld [vmem:[#allocation11 + $0x1a0] ss:$8 sps:$4 sm:$0xff]  }
 0x319   :  { %3842 = vmatpush1.bf16.msra.mxu0 %v9996_v11  ;;  %v10035_v11 = vld [vmem:[#allocation11 + $0x140] ss:$8 sps:$4 sm:$0xff]  }
 0x31a   :  { %3843 = vmatprep.subr.bf16.mxu0 %v10001_v3  ;;  %3877 = vmatpush1.bf16.msra.mxu1 %v10035_v11 }
 0x31d   :  { %3844 = vmatpush1.bf16.msra.mxu0 %v9999_v4 }
 0x31e   :  { %3845 = vmatprep.subr.bf16.mxu0 %v10004_v5 }
 0x321   :  { %3846 = vmatpush2.bf16.msra.mxu0 %v10002_v6 }
 0x322   :  { %3847 = vmatprep.subr.bf16.mxu0 %v10007_v7  ;;  %v10040_v7 = vld [vmem:[#allocation11 + $0x134] ss:$8 sps:$4 sm:$0xff]  }
 0x323   :  { %3878 = vmatprep.subr.bf16.mxu1 %v10040_v7 }
 0x325   :  { %3848 = vmatpush2.bf16.msra.mxu0 %v10005_v8  ;;  %v10038_v8 = vld [vmem:[#allocation11 + $0x130] ss:$8 sps:$4 sm:$0xff]  }
 0x326   :  { %3849 = vmatprep.subr.bf16.mxu0 %v10010_v16  ;;  %3879 = vmatpush1.bf16.msra.mxu1 %v10038_v8  ;;  %v10073_v8 = vld [vmem:[#allocation11 + $0x184] ss:$8 sps:$4 sm:$0xff]  }
 0x329   :  { %3850 = vmatpush2.bf16.msra.mxu0 %v10008_v17 }
 0x32a   :  { %3851 = vmatprep.subr.bf16.mxu0 %v10013_v18 }
 0x32d   :  { %3852 = vmatpush2.bf16.msra.mxu0 %v10011_v19 }
 0x32e   :  { %3853 = vmatprep.subr.bf16.mxu0 %v10016_v20  ;;  %v10043_v20 = vld [vmem:[#allocation11 + $0x124] ss:$8 sps:$4 sm:$0xff]  }
 0x32f   :  { %3880 = vmatprep.subr.bf16.mxu1 %v10043_v20 }
 0x331   :  { %3854 = vmatpush2.bf16.msra.mxu0 %v10014_v22  ;;  %v10041_v22 = vld [vmem:[#allocation11 + $0x120] ss:$8 sps:$4 sm:$0xff]  }
 0x332   :  { %3855 = vmatprep.subr.bf16.mxu0 %v10019_v13  ;;  %3881 = vmatpush1.bf16.msra.mxu1 %v10041_v22 }
 0x335   :  { %3856 = vmatpush2.bf16.msra.mxu0 %v10017_v25 }
 0x336   :  { %3857 = vmatprep.subr.bf16.mxu0 %v10022_v27 }
 0x339   :  { %3858 = vmatpush2.bf16.msra.mxu0 %v10020_v29 }
 0x33a   :  { %3859 = vmatprep.subr.bf16.mxu0 %v10025_v30  ;;  %v10046_v30 = vld [vmem:[#allocation11 + $0x114] ss:$8 sps:$4 sm:$0xff]  }
 0x33b   :  { %3882 = vmatprep.subr.bf16.mxu1 %v10046_v30 }
 0x33c   :  { %3883 = vmatpush1.bf16.msra.mxu1 %v10044_v31 }
 0x33d   :  { %3860 = vmatpush2.bf16.msra.mxu0 %v10023_v33 }
 0x340   :  { %v3076_v38 = vpop.f32.mrf.mxu0 }
 0x341   :  { %v3077_v45 = vadd.f32 %v3076_v38, %v3036_v37  ;;  %v3117_v46 = vpop.f32.mrf.mxu1  ;;  %v10049_v37 = vld [vmem:[#allocation11 + $0x104] ss:$8 sps:$4 sm:$0xff]   ;;  %v10047_v38 = vld [vmem:[#allocation11 + $0x100] ss:$8 sps:$4 sm:$0xff]  }
 0x342   :  { %v3078_v43 = vpop.f32.mrf.mxu0  ;;  %3884 = vmatprep.subr.bf16.mxu1 %v10049_v37 }
 0x343   :  { %v3118_v47 = vadd.f32 %v3117_v46, %v3077_v45  ;;  %v3079_v48 = vadd.f32 %v3078_v43, %v3038_v41  ;;  %v3119_v49 = vpop.f32.mrf.mxu1  ;;  %3885 = vmatpush1.bf16.msra.mxu1 %v10047_v38 }
 0x344   :  { %v3080_v51 = vpop.f32.mrf.mxu0 }
 0x345   :  { %v3290_v57 = vrot.slane %v3118_v47, 4  ;;  %v3120_v9 = vadd.f32 %v3119_v49, %v3079_v48  ;;  %v3121_v44 = vpop.f32.mrf.mxu1  ;;  %v10050_v48 = vld [vmem:[#allocation11 + $0x1f0] ss:$8 sps:$4 sm:$0xff]  }
 0x346   :  { %v3081_v21 = vpop.f32.mrf.mxu0  ;;  %v10056_v44 = vld [vmem:[#allocation11 + $0x1d0] ss:$8 sps:$4 sm:$0xff]  }
 0x347   :  { %v3291_v54 = vadd.f32 %v3290_v57, %v3118_v47  ;;  %v3296_v53 = vrot.slane %v3120_v9, 4  ;;  %v3122_v55 = vpop.f32.mrf.mxu1  ;;  %v10053_v57 = vld [vmem:[#allocation11 + $0x1e0] ss:$8 sps:$4 sm:$0xff]   ;;  %v10061_v21 = vld [vmem:[#allocation11 + $0x1c4] ss:$8 sps:$4 sm:$0xff]  }
 0x348   :  { %v11316_v55 = vld [vmem:[#allocation10] sm:$0xf] }
 0x349   :  { %v3292_v58 = vrot.slane %v3291_v54, 2  ;;  %v3297_v59 = vadd.f32 %v3296_v53, %v3120_v9  ;;  %v10059_v53 = vld [vmem:[#allocation11 + $0x1c0] ss:$8 sps:$4 sm:$0xff]  }
 0x34b   :  { %v3293_v60 = vadd.f32 %v3292_v58, %v3291_v54  ;;  %v3298_v23 = vrot.slane %v3297_v59, 2  ;;  %v11314_v54 = vld [vmem:[#allocation8] sm:$0xf] }
 0x34c   :  { %v3371_v56 = vrot.slane %v11314_v54, %v11216_v10  ;;  %v3375_v61 = vrot.slane %v11314_v54, %v11225_v14 }
 0x34d   :  { %v3294_v62 = vrot.slane %v3293_v60, 1  ;;  %v3299_v63 = vadd.f32 %v3298_v23, %v3297_v59  ;;  %v10062_v59 = vld [vmem:[#allocation11 + $0x1b0] ss:$8 sps:$4 sm:$0xff]   ;;  %v3396_v23 = vrot.slane %v11316_v55, %v11216_v10 }
 0x34f   :  { %v3295_v0 = vadd.f32 %v3294_v62, %v3293_v60  ;;  %v3300_v1 = vrot.slane %v3299_v63, 1 }
 0x351   :  { %v3315_v3 = vmul.f32 0.125, %v3295_v0  ;;  %v3301_v4 = vadd.f32 %v3300_v1, %v3299_v63  ;;  %v3400_v0 = vrot.slane %v11316_v55, %v11225_v14  ;;  %v10067_v1 = vld [vmem:[#allocation11 + $0x1a4] ss:$8 sps:$4 sm:$0xff]  }
 0x353   :  { %v3319_v5 = vsub.f32 %v3118_v47, %v3315_v3  ;;  %v3316_v6 = vmul.f32 0.125, %v3301_v4  ;;  %v10052_v47 = vld [vmem:[#allocation11 + $0x1f4] ss:$8 sps:$4 sm:$0xff]  }
 0x354   :  { %3886 = vmatprep.subr.bf16.mxu1 %v10052_v47  ;;  %v10070_v4 = vld [vmem:[#allocation11 + $0x194] ss:$8 sps:$4 sm:$0xff]  }
 0x355   :  { %v3323_v16 = vmul.f32 %v3319_v5, %v3319_v5  ;;  %v11310_v17 = vsub.f32 %v3120_v9, %v3316_v6  ;;  %3887 = vmatpush2.bf16.msra.mxu1 %v10050_v48  ;;  %v10058_v9 = vld [vmem:[#allocation11 + $0x1d4] ss:$8 sps:$4 sm:$0xff]  }
 0x356   :  { %3888 = vmatprep.subr.bf16.mxu1 %v10055_v52 }
 0x357   :  { %v3327_v18 = vrot.slane %v3323_v16, 4  ;;  %v3324_v19 = vmul.f32 %v11310_v17, %v11310_v17 }
 0x359   :  { %v3328_v13 = vadd.f32 %v3327_v18, %v3323_v16  ;;  %v3333_v25 = vrot.slane %v3324_v19, 4  ;;  %3889 = vmatpush2.bf16.msra.mxu1 %v10053_v57 }
 0x35a   :  { %3890 = vmatprep.subr.bf16.mxu1 %v10058_v9 }
 0x35b   :  { %v3329_v27 = vrot.slane %v3328_v13, 2  ;;  %v3334_v29 = vadd.f32 %v3333_v25, %v3324_v19 }
 0x35d   :  { %v3330_v32 = vadd.f32 %v3329_v27, %v3328_v13  ;;  %v3335_v33 = vrot.slane %v3334_v29, 2  ;;  %3891 = vmatpush2.bf16.msra.mxu1 %v10056_v44 }
 0x35e   :  { %3892 = vmatprep.subr.bf16.mxu1 %v10061_v21 }
 0x35f   :  { %v3331_v34 = vrot.slane %v3330_v32, 1  ;;  %v3336_v35 = vadd.f32 %v3335_v33, %v3334_v29 }
 0x361   :  { %v3332_v41 = vadd.f32 %v3331_v34, %v3330_v32  ;;  %v3337_v45 = vrot.slane %v3336_v35, 1  ;;  %3893 = vmatpush2.bf16.msra.mxu1 %v10059_v53  ;;  %v1671_v34 = vrot.slane %v11300_v28, %v11222_v12 }
 0x362   :  { %3894 = vmatprep.subr.bf16.mxu1 %v10064_v24 }
 0x363   :  { %v3351_v46 = vmul.f32 0.125, %v3332_v41  ;;  %v3338_v43 = vadd.f32 %v3337_v45, %v3336_v35  ;;  %v1675_v35 = vrot.slane %v11300_v28, %v11228_v15 }
 0x365   :  { %v3355_v49 = vadd.f32 1e-05, %v3351_v46  ;;  %v3352_v50 = vmul.f32 0.125, %v3338_v43  ;;  %3895 = vmatpush2.bf16.msra.mxu1 %v10062_v59 }
 0x366   :  { %3896 = vmatprep.subr.bf16.mxu1 %v10067_v1 }
 0x367   :  { %10418 = vrsqrt.f32 %v3355_v49  ;;  %v3356_v51 = vadd.f32 1e-05, %v3352_v50 }
 0x369   :  { %10420 = vrsqrt.f32 %v3356_v51  ;;  %3897 = vmatpush2.bf16.msra.mxu1 %v10065_v2 }
 0x36a   :  { %3898 = vmatprep.subr.bf16.mxu1 %v10070_v4 }
 0x374   :  { %v10419_v58 = vpop.eup %10418 }
 0x375   :  { %v3363_v60 = vmul.f32 %v10419_v58, %v3319_v5  ;;  %v10068_v5 = vld [vmem:[#allocation11 + $0x190] ss:$8 sps:$4 sm:$0xff]  }
 0x376   :  { %v10421_v26 = vpop.eup %10420  ;;  %3899 = vmatpush2.bf16.msra.mxu1 %v10068_v5 }
 0x377   :  { %v3388_v62 = vmul.f32 %v3371_v56, %v3363_v60  ;;  %v3364_v63 = vmul.f32 %v10421_v26, %v11310_v17  ;;  %v10071_v17 = vld [vmem:[#allocation11 + $0x180] ss:$8 sps:$4 sm:$0xff]   ;;  %3900 = vmatprep.subr.bf16.mxu1 %v10073_v8 }
 0x379   :  { %v3413_v11 = vadd.f32 %v3396_v23, %v3388_v62  ;;  %v3389_v3 = vmul.f32 %v3375_v61, %v3364_v63 }
 0x37a   :  { %3901 = vmatpush2.bf16.msra.mxu1 %v10071_v17 }
 0x37b   :  { %v3414_v6 = vadd.f32 %v3400_v0, %v3389_v3  ;;  %vm3417_vm8 = vcmp.ge.f32.partialorder %v3413_v11, 0.0  ;;  %v3421_v7 = vmul.f32 0.2, %v3413_v11 }
 0x37d   :  { %vm3418_vm9 = vcmp.ge.f32.partialorder %v3414_v6, 0.0  ;;  %v3422_v16 = vmul.f32 0.2, %v3414_v6  ;;  %v3425_v18 = vsel %vm3417_vm8, %v3413_v11, %v3421_v7 }
 0x37e   :  { %v3494_v25 = vpack.c.bf16 %v3425_v18, %v3425_v18 }
 0x37f   :  { %v3426_v19 = vsel %vm3418_vm9, %v3414_v6, %v3422_v16 }
 0x380   :  { %v3158_v20 = vpop.f32.mrf.mxu0  ;;  %v3495_v22 = vpack.c.bf16 %v3426_v19, %v3426_v19 }
 0x381   :  { %v3199_v13 = vpop.f32.mrf.mxu1  ;;  %v3159_v37 = vadd.f32 %v3158_v20, %v1671_v34 }
 0x382   :  { %v3160_v27 = vpop.f32.mrf.mxu0  ;;  %3861 = vmatprep.mubr.bf16.mxu0 %v3495_v22 }
 0x383   :  { %v3201_v29 = vpop.f32.mrf.mxu1  ;;  %3862 = vmatmul.mubr.bf16.vlgmr.msra.gmra.mxu0 %v3494_v25  ;;  %v3161_v38 = vadd.f32 %v3160_v27, %v1675_v35  ;;  %v3200_v41 = vadd.f32 %v3199_v13, %v3159_v37  ;;  %v3404_v35 = vrot.slane %v11316_v55, %v11222_v12  ;;  %v3383_v37 = vrot.slane %v11314_v54, %v11228_v15 }
 0x384   :  { %v3162_v30 = vpop.f32.mrf.mxu0 }
 0x385   :  { %v3203_v31 = vpop.f32.mrf.mxu1  ;;  %v3202_v46 = vadd.f32 %v3201_v29, %v3161_v38 }
 0x386   :  { %v3163_v32 = vpop.f32.mrf.mxu0 }
 0x387   :  { %v3204_v33 = vpop.f32.mrf.mxu1  ;;  %v3379_v32 = vrot.slane %v11314_v54, %v11222_v12 }
 0x3c0   :  { %v3240_v45 = vpop.f32.mrf.mxu0 }
 0x3c1   :  { %v3241_v43 = vadd.f32 %v3240_v45, %v3200_v41  ;;  %v3281_v47 = vpop.f32.mrf.mxu1 }
 0x3c2   :  { %v3242_v48 = vpop.f32.mrf.mxu0 }
 0x3c3   :  { %v3282_v49 = vadd.f32 %v3281_v47, %v3241_v43  ;;  %v3243_v50 = vadd.f32 %v3242_v48, %v3202_v46  ;;  %v3283_v51 = vpop.f32.mrf.mxu1  ;;  %v3408_v46 = vrot.slane %v11316_v55, %v11228_v15 }
 0x3c4   :  { %v3244_v52 = vpop.f32.mrf.mxu0 }
 0x3c5   :  { %v3302_v57 = vrot.slane %v3282_v49, 4  ;;  %v3284_v9 = vadd.f32 %v3283_v51, %v3243_v50  ;;  %v3285_v44 = vpop.f32.mrf.mxu1 }
 0x3c6   :  { %v3245_v21 = vpop.f32.mrf.mxu0 }
 0x3c7   :  { %v3303_v53 = vadd.f32 %v3302_v57, %v3282_v49  ;;  %v3308_v56 = vrot.slane %v3284_v9, 4  ;;  %v3286_v24 = vpop.f32.mrf.mxu1 }
 0x3c8   :  { %v10076_v24 = vld [vmem:[%s11549_s10 + $0x70] sm:$0xff]  }
 0x3c9   :  { %v3304_v28 = vrot.slane %v3303_v53, 2  ;;  %v3309_v58 = vadd.f32 %v3308_v56, %v3284_v9  ;;  %v10075_v56 = vld [vmem:[%s11549_s10 + $0x38] sm:$0xff]  }
 0x3cb   :  { %v3305_v59 = vadd.f32 %v3304_v28, %v3303_v53  ;;  %v3310_v60 = vrot.slane %v3309_v58, 2  ;;  %v10074_v53 = vld [vmem:[%s11549_s10 + $0x78] sm:$0xff]   ;;  %v10077_v28 = vld [vmem:[%s11549_s10 + $0x30] sm:$0xff]  }
 0x3cc   :  { %9448 = vmatprep.subr.bf16.mxu0 %v10074_v53 }
 0x3cd   :  { %v3306_v23 = vrot.slane %v3305_v59, 1  ;;  %v3311_v61 = vadd.f32 %v3310_v60, %v3309_v58  ;;  %9449 = vmatpush3.bf16.msra.mxu0 %v10075_v56  ;;  %v10078_v58 = vld [vmem:[%s11549_s10 + $0x68] sm:$0xff]   ;;  %v10080_v60 = vld [vmem:[%s11549_s10 + $0x60] sm:$0xff]  }
 0x3ce   :  { %9450 = vmatprep.subr.bf16.mxu0 %v10076_v24 }
 0x3cf   :  { %v3307_v26 = vadd.f32 %v3306_v23, %v3305_v59  ;;  %v3312_v62 = vrot.slane %v3311_v61, 1  ;;  %v10079_v59 = vld [vmem:[%s11549_s10 + $0x28] sm:$0xff]   ;;  %v10081_v23 = vld [vmem:[%s11549_s10 + $0x20] sm:$0xff]  }
 0x3d1   :  { %v3317_v63 = vmul.f32 0.125, %v3307_v26  ;;  %v3313_v0 = vadd.f32 %v3312_v62, %v3311_v61  ;;  %9451 = vmatpush3.bf16.msra.mxu0 %v10077_v28  ;;  %v10082_v61 = vld [vmem:[%s11549_s10 + $0x58] sm:$0xff]   ;;  %v10084_v62 = vld [vmem:[%s11549_s10 + $0x50] sm:$0xff]  }
 0x3d2   :  { %9452 = vmatprep.subr.bf16.mxu0 %v10078_v58  ;;  %v10083_v26 = vld [vmem:[%s11549_s10 + $0x18] sm:$0xff]  }
 0x3d3   :  { %v3321_v1 = vsub.f32 %v3282_v49, %v3317_v63  ;;  %v3318_v2 = vmul.f32 0.125, %v3313_v0  ;;  %v10085_v63 = vld [vmem:[%s11549_s10 + $0x10] sm:$0xff]   ;;  %v10086_v0 = vld [vmem:[%s11549_s10 + $0x48] sm:$0xff]  }
 0x3d5   :  { %v3325_v11 = vmul.f32 %v3321_v1, %v3321_v1  ;;  %v3322_v3 = vsub.f32 %v3284_v9, %v3318_v2  ;;  %9453 = vmatpush3.bf16.msra.mxu0 %v10079_v59  ;;  %v10088_v2 = vld [vmem:[%s11549_s10 + $0x40] sm:$0xff]   ;;  %v3911_v59 = vld [vmem:[#allocation14] sm:$0x3] }
 0x3d6   :  { %9454 = vmatprep.subr.bf16.mxu0 %v10080_v60  ;;  %v3912_v60 = vld [vmem:[#allocation16] sm:$0x3] }
 0x3d7   :  { %v3339_v4 = vrot.slane %v3325_v11, 4  ;;  %v3326_v5 = vmul.f32 %v3322_v3, %v3322_v3 }
 0x3d9   :  { %v3340_v6 = vadd.f32 %v3339_v4, %v3325_v11  ;;  %v3345_v7 = vrot.slane %v3326_v5, 4  ;;  %9455 = vmatpush3.bf16.msra.mxu0 %v10081_v23  ;;  %v10089_v11 = vld [vmem:[%s11549_s10] sm:$0xff]   ;;  %v3955_v23 = vrot.slane %v3911_v59, %v11216_v10 }
 0x3da   :  { %9456 = vmatprep.subr.bf16.mxu0 %v10082_v61 }
 0x3db   :  { %v3341_v8 = vrot.slane %v3340_v6, 2  ;;  %v3346_v16 = vadd.f32 %v3345_v7, %v3326_v5 }
 0x3dd   :  { %v3342_v18 = vadd.f32 %v3341_v8, %v3340_v6  ;;  %v3347_v17 = vrot.slane %v3346_v16, 2  ;;  %9457 = vmatpush3.bf16.msra.mxu0 %v10083_v26 }
 0x3de   :  { %9458 = vmatprep.subr.bf16.mxu0 %v10084_v62  ;;  %v3968_v62 = vrot.slane %v3912_v60, %v11216_v10 }
 0x3df   :  { %v3343_v19 = vrot.slane %v3342_v18, 1  ;;  %v3348_v20 = vadd.f32 %v3347_v17, %v3346_v16 }
 0x3e1   :  { %v3344_v22 = vadd.f32 %v3343_v19, %v3342_v18  ;;  %v3349_v13 = vrot.slane %v3348_v20, 1  ;;  %9459 = vmatpush3.bf16.msra.mxu0 %v10085_v63  ;;  %v3959_v63 = vrot.slane %v3911_v59, %v11225_v14 }
 0x3e2   :  { %9460 = vmatprep.subr.bf16.mxu0 %v10086_v0 }
 0x3e3   :  { %v3353_v25 = vmul.f32 0.125, %v3344_v22  ;;  %v3350_v27 = vadd.f32 %v3349_v13, %v3348_v20 }
 0x3e5   :  { %v3357_v29 = vadd.f32 1e-05, %v3353_v25  ;;  %v3354_v30 = vmul.f32 0.125, %v3350_v27 }
 0x3e7   :  { %10422 = vrsqrt.f32 %v3357_v29  ;;  %v3358_v31 = vadd.f32 1e-05, %v3354_v30 }
 0x3e9   :  { %10424 = vrsqrt.f32 %v3358_v31 }
 0x3f4   :  { %v10423_v33 = vpop.eup %10422 }
 0x3f5   :  { %v3365_v34 = vmul.f32 %v10423_v33, %v3321_v1  ;;  %v10087_v1 = vld [vmem:[%s11549_s10 + $0x8] sm:$0xff]  }
 0x3f6   :  { %v10425_v38 = vpop.eup %10424  ;;  %9461 = vmatpush3.bf16.msra.mxu0 %v10087_v1 }
 0x3f7   :  { %v3390_v41 = vmul.f32 %v3379_v32, %v3365_v34  ;;  %v3366_v45 = vmul.f32 %v10425_v38, %v3322_v3  ;;  %9462 = vmatprep.subr.bf16.mxu0 %v10088_v2  ;;  %v3493_v3 = vld [vmem:[#allocation13] sm:$0x3] }
 0x3f8   :  { %v3502_v4 = vrot.slane %v3493_v3, %v11216_v10  ;;  %v3506_v5 = vrot.slane %v3493_v3, %v11225_v14 }
 0x3f9   :  { %v3415_v43 = vadd.f32 %v3404_v35, %v3390_v41  ;;  %v3391_v47 = vmul.f32 %v3383_v37, %v3366_v45 }
 0x3fa   :  { %9463 = vmatpush3.bf16.msra.mxu0 %v10089_v11  ;;  %v3972_v11 = vrot.slane %v3912_v60, %v11225_v14 }
 0x3fb   :  { %v3416_v48 = vadd.f32 %v3408_v46, %v3391_v47  ;;  %vm3419_vm10 = vcmp.ge.f32.partialorder %v3415_v43, 0.0  ;;  %v3423_v49 = vmul.f32 0.2, %v3415_v43 }
 0x3fd   :  { %vm3420_vm11 = vcmp.ge.f32.partialorder %v3416_v48, 0.0  ;;  %v3424_v50 = vmul.f32 0.2, %v3416_v48  ;;  %v3427_v51 = vsel %vm3419_vm10, %v3415_v43, %v3423_v49 }
 0x3fe   :  { %v3496_v57 = vpack.c.bf16 %v3427_v51, %v3427_v51 }
 0x3ff   :  { %v3428_v52 = vsel %vm3420_vm11, %v3416_v48, %v3424_v50 }
 0x400   :  { %v3497_v54 = vpack.c.bf16 %v3428_v52, %v3428_v52 }
 0x402   :  { %3902 = vmatprep.mubr.bf16.mxu1 %v3497_v54 }
 0x403   :  { %3903 = vmatmul.mubr.bf16.vlgmr.msra.gmra.mxu1 %v3496_v57 }
 0x443   :  { %v3863_v55 = vpop.f32.mrf.mxu0 }
 0x444   :  { %v3864_v6 = vadd.f32 %v3863_v55, %v3502_v4 }
 0x445   :  { %v3865_v9 = vpop.f32.mrf.mxu0 }
 0x446   :  { %v3866_v8 = vadd.f32 %v3865_v9, %v3506_v5 }
 0x447   :  { %v3867_v44 = vpop.f32.mrf.mxu0 }
 0x449   :  { %v3868_v21 = vpop.f32.mrf.mxu0 }
 0x4c3   :  { %v3904_v7 = vpop.f32.mrf.mxu1 }
 0x4c4   :  { %v3905_v16 = vadd.f32 %v3904_v7, %v3864_v6 }
 0x4c5   :  { %v3906_v18 = vpop.f32.mrf.mxu1 }
 0x4c6   :  { %v3913_v17 = vrot.slane %v3905_v16, 4  ;;  %v3907_v19 = vadd.f32 %v3906_v18, %v3866_v8 }
 0x4c7   :  { %v3908_v20 = vpop.f32.mrf.mxu1 }
 0x4c8   :  { %v3914_v22 = vadd.f32 %v3913_v17, %v3905_v16  ;;  %v3919_v13 = vrot.slane %v3907_v19, 4  ;;  %v10974_v20 = vmov 0.0  }
 0x4c9   :  { %v3909_v25 = vpop.f32.mrf.mxu1  ;;  %9488 = vmatprep.subr.bf16.mxu1 %v10974_v20  ;;  %9508 = vmatprep.subr.bf16.mxu0 %v10974_v20 }
 0x4ca   :  { %v3915_v27 = vrot.slane %v3914_v22, 2  ;;  %v3920_v29 = vadd.f32 %v3919_v13, %v3907_v19  ;;  %v10092_v13 = vld [vmem:[#allocation22 + $0x28] sm:$0xff]   ;;  %v10093_v25 = vld [vmem:[#allocation22 + $0x20] sm:$0xff]   ;;  %9504 = vmatprep.mubr.msk.bf16.mxu1 %vm10975_vm14, %v10974_v20 }
 0x4cc   :  { %v3916_v30 = vadd.f32 %v3915_v27, %v3914_v22  ;;  %v3921_v31 = vrot.slane %v3920_v29, 2  ;;  %v10091_v22 = vld [vmem:[#allocation22 + $0x30] sm:$0xff]   ;;  %v10094_v27 = vld [vmem:[#allocation22 + $0x18] sm:$0xff]  }
 0x4ce   :  { %v3917_v32 = vrot.slane %v3916_v30, 1  ;;  %v3922_v33 = vadd.f32 %v3921_v31, %v3920_v29  ;;  %v10095_v29 = vld [vmem:[#allocation22 + $0x10] sm:$0xff]   ;;  %v10097_v31 = vld [vmem:[#allocation22] sm:$0xff]  }
 0x4d0   :  { %v3918_v34 = vadd.f32 %v3917_v32, %v3916_v30  ;;  %v3923_v35 = vrot.slane %v3922_v33, 1  ;;  %v10096_v30 = vld [vmem:[#allocation22 + $0x8] sm:$0xff]   ;;  %v10098_v32 = vld [vmem:[#allocation25 + $0x38] sm:$0xff]  }
 0x4d2   :  { %v3925_v37 = vmul.f32 0.125, %v3918_v34  ;;  %v3924_v38 = vadd.f32 %v3923_v35, %v3922_v33  ;;  %v10099_v33 = vld [vmem:[#allocation25 + $0x30] sm:$0xff]   ;;  %v10100_v34 = vld [vmem:[#allocation25 + $0x28] sm:$0xff]   ;;  %v10101_v35 = vld [vmem:[#allocation25 + $0x20] sm:$0xff]  }
 0x4d4   :  { %v3927_v41 = vsub.f32 %v3905_v16, %v3925_v37  ;;  %v3926_v45 = vmul.f32 0.125, %v3924_v38  ;;  %v10102_v37 = vld [vmem:[#allocation25 + $0x18] sm:$0xff]   ;;  %v10103_v38 = vld [vmem:[#allocation25 + $0x10] sm:$0xff]  }
 0x4d6   :  { %v3929_v46 = vmul.f32 %v3927_v41, %v3927_v41  ;;  %v3928_v43 = vsub.f32 %v3907_v19, %v3926_v45  ;;  %v10090_v19 = vld [vmem:[#allocation22 + $0x38] sm:$0xff]  }
 0x4d7   :  { %9489 = vmatpush3.bf16.msra.mxu1 %v10090_v19  ;;  %v8945_v45 = vld [vmem:[#allocation17] ss:$0 sm:$0xff]  ;;  %v10117_v19 = vld [vmem:[#allocation28 + $0x44] ss:$8 sps:$4 sm:$0xff]  }
 0x4d8   :  { %v3931_v47 = vrot.slane %v3929_v46, 4  ;;  %v3930_v48 = vmul.f32 %v3928_v43, %v3928_v43  ;;  %9490 = vmatprep.subr.bf16.mxu1 %v10974_v20 }
 0x4da   :  { %v3932_v49 = vadd.f32 %v3931_v47, %v3929_v46  ;;  %v3937_v50 = vrot.slane %v3930_v48, 4 }
 0x4db   :  { %9491 = vmatpush3.bf16.msra.mxu1 %v10091_v22  ;;  %v10115_v22 = vld [vmem:[#allocation28 + $0x40] ss:$8 sps:$4 sm:$0xff]  }
 0x4dc   :  { %v3933_v51 = vrot.slane %v3932_v49, 2  ;;  %v3938_v52 = vadd.f32 %v3937_v50, %v3930_v48  ;;  %9492 = vmatprep.subr.bf16.mxu1 %v10974_v20 }
 0x4de   :  { %v3934_v54 = vadd.f32 %v3933_v51, %v3932_v49  ;;  %v3939_v57 = vrot.slane %v3938_v52, 2 }
 0x4df   :  { %9493 = vmatpush3.bf16.msra.mxu1 %v10092_v13  ;;  %v10120_v13 = vld [vmem:[#allocation28 + $0x34] ss:$8 sps:$4 sm:$0xff]  }
 0x4e0   :  { %v3935_v55 = vrot.slane %v3934_v54, 1  ;;  %v3940_v9 = vadd.f32 %v3939_v57, %v3938_v52  ;;  %9494 = vmatprep.subr.bf16.mxu1 %v10974_v20 }
 0x4e2   :  { %v3936_v44 = vadd.f32 %v3935_v55, %v3934_v54  ;;  %v3941_v21 = vrot.slane %v3940_v9, 1 }
 0x4e3   :  { %9495 = vmatpush3.bf16.msra.mxu1 %v10093_v25  ;;  %v10123_v25 = vld [vmem:[#allocation28 + $0x24] ss:$8 sps:$4 sm:$0xff]  }
 0x4e4   :  { %v3943_v53 = vmul.f32 0.125, %v3936_v44  ;;  %v3942_v56 = vadd.f32 %v3941_v21, %v3940_v9  ;;  %9496 = vmatprep.subr.bf16.mxu1 %v10974_v20 }
 0x4e6   :  { %v3945_v24 = vadd.f32 1e-05, %v3943_v53  ;;  %v3944_v28 = vmul.f32 0.125, %v3942_v56 }
 0x4e7   :  { %9497 = vmatpush3.bf16.msra.mxu1 %v10094_v27  ;;  %v10121_v27 = vld [vmem:[#allocation28 + $0x20] ss:$8 sps:$4 sm:$0xff]  }
 0x4e8   :  { %10426 = vrsqrt.f32 %v3945_v24  ;;  %v3946_v58 = vadd.f32 1e-05, %v3944_v28  ;;  %9498 = vmatprep.subr.bf16.mxu1 %v10974_v20 }
 0x4ea   :  { %10428 = vrsqrt.f32 %v3946_v58 }
 0x4eb   :  { %9499 = vmatpush3.bf16.msra.mxu1 %v10095_v29  ;;  %v8964_v29 = vld [vmem:[#allocation23] ss:$0 sm:$0xff] }
 0x4ec   :  { %9500 = vmatprep.subr.bf16.mxu1 %v10974_v20 }
 0x4ef   :  { %9501 = vmatpush3.bf16.msra.mxu1 %v10096_v30 }
 0x4f0   :  { %9502 = vmatprep.subr.bf16.mxu1 %v10974_v20 }
 0x4f3   :  { %9503 = vmatpush3.bf16.msra.mxu1 %v10097_v31 }
 0x4f5   :  { %v10427_v61 = vpop.eup %10426 }
 0x4f6   :  { %v3949_v26 = vmul.f32 %v10427_v61, %v3927_v41 }
 0x4f7   :  { %v10429_v0 = vpop.eup %10428 }
 0x4f8   :  { %v3962_v1 = vmul.f32 %v3955_v23, %v3949_v26  ;;  %v3950_v2 = vmul.f32 %v10429_v0, %v3928_v43  ;;  %v8962_v26 = vld [vmem:[#allocation19] ss:$0 sm:$0xff] }
 0x4fa   :  { %v3975_v3 = vadd.f32 %v3968_v62, %v3962_v1  ;;  %v3963_v4 = vmul.f32 %v3959_v63, %v3950_v2  ;;  %v8963_v63 = vld [vmem:[#allocation20] ss:$0 sm:$0xff] }
 0x4fc   :  { %v3976_v5 = vadd.f32 %v3972_v11, %v3963_v4  ;;  %vm3977_vm12 = vcmp.ge.f32.partialorder %v3975_v3, 0.0  ;;  %v3979_v6 = vmul.f32 0.2, %v3975_v3  ;;  %v10104_v4 = vld [vmem:[#allocation25 + $0x8] sm:$0xff]  }
 0x4fe   :  { %vm3978_vm13 = vcmp.ge.f32.partialorder %v3976_v5, 0.0  ;;  %v3980_v7 = vmul.f32 0.2, %v3976_v5  ;;  %v3981_v8 = vsel %vm3977_vm12, %v3975_v3, %v3979_v6  ;;  %v10106_v6 = vld [vmem:[#allocation28 + $0x70] ss:$8 sps:$4 sm:$0xff]  }
 0x4ff   :  { %v4016_v17 = vpack.c.bf16 %v3981_v8, %v3981_v8  ;;  %v10111_v8 = vld [vmem:[#allocation28 + $0x64] ss:$8 sps:$4 sm:$0xff]  }
 0x500   :  { %v3982_v16 = vsel %vm3978_vm13, %v3976_v5, %v3980_v7  ;;  %v10105_v5 = vld [vmem:[#allocation25] sm:$0xff]  }
 0x501   :  { %v4017_v18 = vpack.c.bf16 %v3982_v16, %v3982_v16  ;;  %v10108_v7 = vld [vmem:[#allocation28 + $0x74] ss:$8 sps:$4 sm:$0xff]   ;;  %v10109_v16 = vld [vmem:[#allocation28 + $0x60] ss:$8 sps:$4 sm:$0xff]  }
 0x502   :  { %4539 = vmatprep.subr.bf16.mxu1 %v10108_v7  ;;  %v10160_v7 = vld [vmem:[#allocation29 + $0x40] ss:$16 sps:$4 sm:$0xff]  }
 0x503   :  { %4152 = vmatprep.mubr.bf16.mxu0 %v4017_v18  ;;  %v10114_v18 = vld [vmem:[#allocation28 + $0x54] ss:$8 sps:$4 sm:$0xff]  }
 0x504   :  { %4153 = vmatmul.mubr.bf16.vlgmr.msra.gmra.mxu0 %v4016_v17  ;;  %v10112_v17 = vld [vmem:[#allocation28 + $0x50] ss:$8 sps:$4 sm:$0xff]  }
 0x505   :  { %9524 = vmatprep.mubr.msk.bf16.mxu0 %vm10975_vm14, %v10974_v20  ;;  %9509 = vmatpush3.bf16.msra.mxu0 %v10098_v32 }
 0x506   :  { %9510 = vmatprep.subr.bf16.mxu0 %v10974_v20 }
 0x509   :  { %9511 = vmatpush3.bf16.msra.mxu0 %v10099_v33 }
 0x50a   :  { %9512 = vmatprep.subr.bf16.mxu0 %v10974_v20 }
 0x50d   :  { %9513 = vmatpush3.bf16.msra.mxu0 %v10100_v34 }
 0x50e   :  { %9514 = vmatprep.subr.bf16.mxu0 %v10974_v20 }
 0x511   :  { %9515 = vmatpush3.bf16.msra.mxu0 %v10101_v35 }
 0x512   :  { %9516 = vmatprep.subr.bf16.mxu0 %v10974_v20 }
 0x515   :  { %9517 = vmatpush3.bf16.msra.mxu0 %v10102_v37 }
 0x516   :  { %9518 = vmatprep.subr.bf16.mxu0 %v10974_v20 }
 0x519   :  { %9519 = vmatpush3.bf16.msra.mxu0 %v10103_v38 }
 0x51a   :  { %9520 = vmatprep.subr.bf16.mxu0 %v10974_v20 }
 0x51d   :  { %9521 = vmatpush3.bf16.msra.mxu0 %v10104_v4  ;;  %v10157_v4 = vld [vmem:[#allocation29 + $0x68] ss:$16 sps:$4 sm:$0xff]  }
 0x51e   :  { %9522 = vmatprep.subr.bf16.mxu0 %v10974_v20  ;;  %v10118_v20 = vld [vmem:[#allocation28 + $0x30] ss:$8 sps:$4 sm:$0xff]  }
 0x521   :  { %9523 = vmatpush3.bf16.msra.mxu0 %v10105_v5  ;;  %v10162_v5 = vld [vmem:[#allocation29 + $0x44] ss:$16 sps:$4 sm:$0xff]  }
 0x5c4   :  { %v9464_v41 = vpop.f32.mrf.mxu0 }
 0x5c6   :  { %v9465_v46 = vpop.f32.mrf.mxu0 }
 0x5c7   :  { %v9466_v43 = vadd.f32 %v9465_v46, %v9464_v41  ;;  %v10126_v41 = vld [vmem:[#allocation28 + $0x14] ss:$8 sps:$4 sm:$0xff]   ;;  %v10129_v46 = vld [vmem:[#allocation28 + $0x4] ss:$8 sps:$4 sm:$0xff]  }
 0x5c8   :  { %v9467_v47 = vpop.f32.mrf.mxu0 }
 0x5c9   :  { %v4155_v48 = vadd.f32 %v9466_v43, %v8945_v45  ;;  %v10124_v45 = vld [vmem:[#allocation28 + $0x10] ss:$8 sps:$4 sm:$0xff]   ;;  %v10127_v43 = vld [vmem:[#allocation28] ss:$8 sps:$4 sm:$0xff]   ;;  %v10976_v47 = vmov 0  }
 0x5ca   :  { %v9468_v49 = vpop.f32.mrf.mxu0 }
 0x5cb   :  { %v4162_v50 = vrot.slane %v4155_v48, 4 }
 0x5cd   :  { %v4163_v51 = vadd.f32 %v4162_v50, %v4155_v48 }
 0x5cf   :  { %v4164_v52 = vrot.slane %v4163_v51, 2 }
 0x5d1   :  { %v4165_v54 = vadd.f32 %v4164_v52, %v4163_v51 }
 0x5d3   :  { %v4166_v57 = vrot.slane %v4165_v54, 1 }
 0x5d5   :  { %v4167_v55 = vadd.f32 %v4166_v57, %v4165_v54 }
 0x5d7   :  { %v4168_v9 = vmul.f32 0.125, %v4167_v55 }
 0x5d9   :  { %v4169_v44 = vsub.f32 %v4155_v48, %v4168_v9  ;;  %v8973_v48 = vld [vmem:[#allocation26] ss:$0 sm:$0xff] }
 0x5db   :  { %v4170_v21 = vmul.f32 %v4169_v44, %v4169_v44 }
 0x5dd   :  { %v4171_v53 = vrot.slane %v4170_v21, 4 }
 0x5df   :  { %v4172_v56 = vadd.f32 %v4171_v53, %v4170_v21  ;;  %v10130_v21 = vld [vmem:[#allocation29 + $0xe0] ss:$16 sps:$4 sm:$0xff]   ;;  %v10133_v53 = vld [vmem:[#allocation29 + $0xe8] ss:$16 sps:$4 sm:$0xff]  }
 0x5e1   :  { %v4173_v24 = vrot.slane %v4172_v56, 2 }
 0x5e3   :  { %v4174_v28 = vadd.f32 %v4173_v24, %v4172_v56  ;;  %v10135_v56 = vld [vmem:[#allocation29 + $0xec] ss:$16 sps:$4 sm:$0xff]   ;;  %v10138_v24 = vld [vmem:[#allocation29 + $0xc4] ss:$16 sps:$4 sm:$0xff]  }
 0x5e5   :  { %v4175_v58 = vrot.slane %v4174_v28, 1 }
 0x5e7   :  { %v4176_v59 = vadd.f32 %v4175_v58, %v4174_v28  ;;  %v10141_v28 = vld [vmem:[#allocation29 + $0xcc] ss:$16 sps:$4 sm:$0xff]   ;;  %v10136_v58 = vld [vmem:[#allocation29 + $0xc0] ss:$16 sps:$4 sm:$0xff]  }
 0x5e9   :  { %v4177_v60 = vmul.f32 0.125, %v4176_v59  ;;  %v10139_v59 = vld [vmem:[#allocation29 + $0xc8] ss:$16 sps:$4 sm:$0xff]  }
 0x5eb   :  { %v4178_v23 = vadd.f32 1e-05, %v4177_v60  ;;  %v10144_v60 = vld [vmem:[#allocation29 + $0xa4] ss:$16 sps:$4 sm:$0xff]  }
 0x5ed   :  { %10430 = vrsqrt.f32 %v4178_v23  ;;  %v10147_v23 = vld [vmem:[#allocation29 + $0xac] ss:$16 sps:$4 sm:$0xff]  }
 0x5fa   :  { %v10431_v61 = vpop.eup %10430 }
 0x5fb   :  { %v4180_v62 = vmul.f32 %v10431_v61, %v4169_v44  ;;  %v10132_v44 = vld [vmem:[#allocation29 + $0xe4] ss:$16 sps:$4 sm:$0xff]   ;;  %v10142_v61 = vld [vmem:[#allocation29 + $0xa0] ss:$16 sps:$4 sm:$0xff]  }
 0x5fc   :  { %5060 = vmatprep.subr.bf16.mxu0 %v10132_v44  ;;  %v10216_v44 = vld [vmem:[#allocation29 + $0x124] ss:$16 sps:$4 sm:$0xff]  }
 0x5fd   :  { %v4187_v0 = vmul.f32 %v8962_v26, %v4180_v62  ;;  %v10145_v26 = vld [vmem:[#allocation29 + $0xa8] ss:$16 sps:$4 sm:$0xff]   ;;  %v10150_v62 = vld [vmem:[#allocation29 + $0x84] ss:$16 sps:$4 sm:$0xff]  }
 0x5ff   :  { %v4194_v1 = vadd.f32 %v8963_v63, %v4187_v0  ;;  %v10153_v63 = vld [vmem:[#allocation29 + $0x8c] ss:$16 sps:$4 sm:$0xff]   ;;  %v10148_v0 = vld [vmem:[#allocation29 + $0x80] ss:$16 sps:$4 sm:$0xff]  }
 0x601   :  { %vm4195_vm15 = vcmp.ge.f32.partialorder %v4194_v1, 0.0  ;;  %v4196_v2 = vmul.f32 0.2, %v4194_v1 }
 0x603   :  { %v4197_v11 = vsel %vm4195_vm15, %v4194_v1, %v4196_v2  ;;  %v10151_v1 = vld [vmem:[#allocation29 + $0x88] ss:$16 sps:$4 sm:$0xff]   ;;  %v10156_v2 = vld [vmem:[#allocation29 + $0x64] ss:$16 sps:$4 sm:$0xff]  }
 0x604   :  { %v4215_v3 = vpack.c.bf16 %v4197_v11, %v4197_v11  ;;  %v10159_v11 = vld [vmem:[#allocation29 + $0x6c] ss:$16 sps:$4 sm:$0xff]  }
 0x606   :  { %9505 = vmatmul.mubr.bf16.vlgmr.msra.gmra.mxu1 %v4215_v3  ;;  %v10154_v3 = vld [vmem:[#allocation29 + $0x60] ss:$16 sps:$4 sm:$0xff]  }
 0x607   :  { %4540 = vmatpush1.bf16.msra.mxu1 %v10106_v6  ;;  %4571 = vmatprep.mubr.bf16.mxu1 %v10976_v47  ;;  %v10165_v6 = vld [vmem:[#allocation29 + $0x4c] ss:$16 sps:$4 sm:$0xff]   ;;  %v10196_v47 = vld [vmem:[#allocation29 + $0x180] ss:$16 sps:$4 sm:$0xff]  }
 0x608   :  { %4541 = vmatprep.subr.bf16.mxu1 %v10111_v8  ;;  %v10163_v8 = vld [vmem:[#allocation29 + $0x48] ss:$16 sps:$4 sm:$0xff]  }
 0x60b   :  { %4542 = vmatpush1.bf16.msra.mxu1 %v10109_v16  ;;  %v10168_v16 = vld [vmem:[#allocation29 + $0x24] ss:$16 sps:$4 sm:$0xff]  }
 0x60c   :  { %4543 = vmatprep.subr.bf16.mxu1 %v10114_v18  ;;  %v10171_v18 = vld [vmem:[#allocation29 + $0x2c] ss:$16 sps:$4 sm:$0xff]  }
 0x60f   :  { %4544 = vmatpush1.bf16.msra.mxu1 %v10112_v17  ;;  %v10166_v17 = vld [vmem:[#allocation29 + $0x20] ss:$16 sps:$4 sm:$0xff]  }
 0x610   :  { %4545 = vmatprep.subr.bf16.mxu1 %v10117_v19  ;;  %v10169_v19 = vld [vmem:[#allocation29 + $0x28] ss:$16 sps:$4 sm:$0xff]  }
 0x613   :  { %4546 = vmatpush1.bf16.msra.mxu1 %v10115_v22  ;;  %v10174_v22 = vld [vmem:[#allocation29 + $0x4] ss:$16 sps:$4 sm:$0xff]  }
 0x614   :  { %4547 = vmatprep.subr.bf16.mxu1 %v10120_v13  ;;  %v10177_v13 = vld [vmem:[#allocation29 + $0xc] ss:$16 sps:$4 sm:$0xff]  }
 0x617   :  { %4548 = vmatpush1.bf16.msra.mxu1 %v10118_v20  ;;  %v10172_v20 = vld [vmem:[#allocation29] ss:$16 sps:$4 sm:$0xff]  }
 0x618   :  { %4549 = vmatprep.subr.bf16.mxu1 %v10123_v25  ;;  %v10175_v25 = vld [vmem:[#allocation29 + $0x8] ss:$16 sps:$4 sm:$0xff]  }
 0x61b   :  { %4550 = vmatpush1.bf16.msra.mxu1 %v10121_v27  ;;  %v10180_v27 = vld [vmem:[#allocation29 + $0x1e4] ss:$16 sps:$4 sm:$0xff]  }
 0x61c   :  { %4551 = vmatprep.subr.bf16.mxu1 %v10126_v41  ;;  %v10190_v41 = vld [vmem:[#allocation29 + $0x1a0] ss:$16 sps:$4 sm:$0xff]  }
 0x61f   :  { %4552 = vmatpush1.bf16.msra.mxu1 %v10124_v45  ;;  %v10193_v45 = vld [vmem:[#allocation29 + $0x1a8] ss:$16 sps:$4 sm:$0xff]  }
 0x620   :  { %4553 = vmatprep.subr.bf16.mxu1 %v10129_v46  ;;  %v10198_v46 = vld [vmem:[#allocation29 + $0x184] ss:$16 sps:$4 sm:$0xff]  }
 0x623   :  { %4554 = vmatpush1.bf16.msra.mxu1 %v10127_v43  ;;  %v10201_v43 = vld [vmem:[#allocation29 + $0x18c] ss:$16 sps:$4 sm:$0xff]  }
 0x624   :  { %5101 = vmatprep.subr.bf16.mxu1 %v10135_v56  ;;  %v10217_v56 = vld [vmem:[#allocation29 + $0x128] ss:$16 sps:$4 sm:$0xff]  }
 0x6c6   :  { %v4304_v30 = vpop.f32.mrf.mxu1 }
 0x6c7   :  { %v4305_v31 = vadd.f32 %v8964_v29, %v4304_v30  ;;  %v10183_v29 = vld [vmem:[#allocation29 + $0x1ec] ss:$16 sps:$4 sm:$0xff]   ;;  %v10178_v30 = vld [vmem:[#allocation29 + $0x1e0] ss:$16 sps:$4 sm:$0xff]  }
 0x6c8   :  { %v9506_v32 = vpop.f32.mrf.mxu1 }
 0x6c9   :  { %vm4310_vm0 = vcmp.ge.f32.partialorder %v4305_v31, 0.0  ;;  %v4311_v33 = vmul.f32 0.2, %v4305_v31  ;;  %v10186_v32 = vld [vmem:[#allocation29 + $0x1c4] ss:$16 sps:$4 sm:$0xff]  }
 0x6ca   :  { %v4307_v34 = vpop.f32.mrf.mxu1 }
 0x6cb   :  { %v4312_v35 = vsel %vm4310_vm0, %v4305_v31, %v4311_v33  ;;  %v10181_v31 = vld [vmem:[#allocation29 + $0x1e8] ss:$16 sps:$4 sm:$0xff]   ;;  %v10189_v33 = vld [vmem:[#allocation29 + $0x1cc] ss:$16 sps:$4 sm:$0xff]   ;;  %v10184_v34 = vld [vmem:[#allocation29 + $0x1c0] ss:$16 sps:$4 sm:$0xff]  }
 0x6cc   :  { %v4332_v37 = vpack.c.bf16 %v4312_v35, %v4312_v35  ;;  %v9507_v38 = vpop.f32.mrf.mxu1  ;;  %4314 = vst.msk [vmem:[#allocation34] sm:$0xff] %vm4313_vm1, %v4312_v35  ;;  %v10187_v35 = vld [vmem:[#allocation29 + $0x1c8] ss:$16 sps:$4 sm:$0xff]  }
 0x6cd   :  { %v10195_v38 = vld [vmem:[#allocation29 + $0x1ac] ss:$16 sps:$4 sm:$0xff]  }
 0x6ce   :  { %9525 = vmatmul.mubr.bf16.vlgmr.msra.gmra.mxu0 %v4332_v37  ;;  %v10192_v37 = vld [vmem:[#allocation29 + $0x1a4] ss:$16 sps:$4 sm:$0xff]  }
 0x6cf   :  { %5061 = vmatpush1.bf16.msra.mxu0 %v10130_v21  ;;  %v10214_v21 = vld [vmem:[#allocation29 + $0x120] ss:$16 sps:$4 sm:$0xff]  }
 0x6d0   :  { %5062 = vmatprep.subr.bf16.mxu0 %v10138_v24  ;;  %v10222_v24 = vld [vmem:[#allocation29 + $0x104] ss:$16 sps:$4 sm:$0xff]  }
 0x6d3   :  { %5063 = vmatpush1.bf16.msra.mxu0 %v10136_v58  ;;  %v10220_v58 = vld [vmem:[#allocation29 + $0x100] ss:$16 sps:$4 sm:$0xff]  }
 0x6d4   :  { %5064 = vmatprep.subr.bf16.mxu0 %v10144_v60  ;;  %v4446_v60 = vld [vmem:[%s11550_s24] sm:$0x3] }
 0x6d7   :  { %5065 = vmatpush1.bf16.msra.mxu0 %v10142_v61  ;;  %v4456_v61 = vrot.slane %v4446_v60, %v11225_v14 }
 0x6d8   :  { %5066 = vmatprep.subr.bf16.mxu0 %v10150_v62 }
 0x6db   :  { %5067 = vmatpush1.bf16.msra.mxu0 %v10148_v0 }
 0x6dc   :  { %5068 = vmatprep.subr.bf16.mxu0 %v10156_v2 }
 0x6df   :  { %5069 = vmatpush1.bf16.msra.mxu0 %v10154_v3 }
 0x6e0   :  { %5070 = vmatprep.subr.bf16.mxu0 %v10162_v5 }
 0x6e3   :  { %5071 = vmatpush1.bf16.msra.mxu0 %v10160_v7 }
 0x6e4   :  { %5072 = vmatprep.subr.bf16.mxu0 %v10168_v16 }
 0x6e7   :  { %5073 = vmatpush1.bf16.msra.mxu0 %v10166_v17 }
 0x6e8   :  { %5074 = vmatprep.subr.bf16.mxu0 %v10174_v22 }
 0x6eb   :  { %5075 = vmatpush1.bf16.msra.mxu0 %v10172_v20 }
 0x6ec   :  { %5076 = vmatprep.subr.bf16.mxu0 %v10180_v27 }
 0x6ef   :  { %5077 = vmatpush2.bf16.msra.mxu0 %v10178_v30 }
 0x6f0   :  { %5078 = vmatprep.subr.bf16.mxu0 %v10186_v32 }
 0x6f3   :  { %5079 = vmatpush2.bf16.msra.mxu0 %v10184_v34 }
 0x6f4   :  { %5080 = vmatprep.subr.bf16.mxu0 %v10192_v37 }
 0x6f7   :  { %5081 = vmatpush2.bf16.msra.mxu0 %v10190_v41 }
 0x6f8   :  { %5082 = vmatprep.subr.bf16.mxu0 %v10198_v46 }
 0x6fb   :  { %5083 = vmatpush2.bf16.msra.mxu0 %v10196_v47 }
 0x78e   :  { %v4421_v49 = vpop.f32.mrf.mxu0 }
 0x78f   :  { %v4422_v50 = vadd.f32 %v8973_v48, %v4421_v49  ;;  %v10199_v48 = vld [vmem:[#allocation29 + $0x188] ss:$16 sps:$4 sm:$0xff]   ;;  %v10204_v49 = vld [vmem:[#allocation29 + $0x164] ss:$16 sps:$4 sm:$0xff]  }
 0x790   :  { %v9526_v51 = vpop.f32.mrf.mxu0  ;;  %5084 = vmatprep.subr.bf16.mxu0 %v10204_v49 }
 0x791   :  { %vm4427_vm2 = vcmp.ge.f32.partialorder %v4422_v50, 0.0  ;;  %v4428_v52 = vmul.f32 0.2, %v4422_v50  ;;  %v10202_v51 = vld [vmem:[#allocation29 + $0x160] ss:$16 sps:$4 sm:$0xff]  }
 0x792   :  { %v4424_v54 = vpop.f32.mrf.mxu0  ;;  %5085 = vmatpush2.bf16.msra.mxu0 %v10202_v51 }
 0x793   :  { %v4429_v57 = vsel %vm4427_vm2, %v4422_v50, %v4428_v52  ;;  %v10207_v50 = vld [vmem:[#allocation29 + $0x16c] ss:$16 sps:$4 sm:$0xff]   ;;  %v10205_v52 = vld [vmem:[#allocation29 + $0x168] ss:$16 sps:$4 sm:$0xff]   ;;  %v10210_v54 = vld [vmem:[#allocation29 + $0x144] ss:$16 sps:$4 sm:$0xff]  }
 0x794   :  { %v4447_v55 = vpack.c.bf16 %v4429_v57, %v4429_v57  ;;  %v9527_v9 = vpop.f32.mrf.mxu0  ;;  %v10213_v57 = vld [vmem:[#allocation29 + $0x14c] ss:$16 sps:$4 sm:$0xff]   ;;  %5086 = vmatprep.subr.bf16.mxu0 %v10210_v54  ;;  %v4581_v54 = vld [vmem:[%s11552_s23] sm:$0x3] }
 0x795   :  { %v10211_v9 = vld [vmem:[#allocation29 + $0x148] ss:$16 sps:$4 sm:$0xff]  }
 0x796   :  { %4572 = vmatmul.mubr.bf16.vlgmr.msra.gmra.mxu1 %v4447_v55  ;;  %v10208_v55 = vld [vmem:[#allocation29 + $0x140] ss:$16 sps:$4 sm:$0xff]  }
 0x797   :  { %5102 = vmatpush1.bf16.msra.mxu1 %v10133_v53  ;;  %5087 = vmatpush2.bf16.msra.mxu0 %v10208_v55  ;;  %v10219_v53 = vld [vmem:[#allocation29 + $0x12c] ss:$16 sps:$4 sm:$0xff]  }
 0x798   :  { %5103 = vmatprep.subr.bf16.mxu1 %v10141_v28  ;;  %5088 = vmatprep.subr.bf16.mxu0 %v10216_v44  ;;  %v10225_v28 = vld [vmem:[#allocation29 + $0x10c] ss:$16 sps:$4 sm:$0xff]   ;;  %v4637_v44 = vrot.slane %v4581_v54, %v11216_v10 }
 0x79b   :  { %5104 = vmatpush1.bf16.msra.mxu1 %v10139_v59  ;;  %5089 = vmatpush2.bf16.msra.mxu0 %v10214_v21  ;;  %v10223_v59 = vld [vmem:[#allocation29 + $0x108] ss:$16 sps:$4 sm:$0xff]  }
 0x79c   :  { %5105 = vmatprep.subr.bf16.mxu1 %v10147_v23  ;;  %5090 = vmatprep.subr.bf16.mxu0 %v10222_v24  ;;  %v4452_v23 = vrot.slane %v4446_v60, %v11216_v10 }
 0x79f   :  { %5106 = vmatpush1.bf16.msra.mxu1 %v10145_v26  ;;  %5091 = vmatpush2.bf16.msra.mxu0 %v10220_v58 }
 0x7a0   :  { %5107 = vmatprep.subr.bf16.mxu1 %v10153_v63 }
 0x7a3   :  { %5108 = vmatpush1.bf16.msra.mxu1 %v10151_v1 }
 0x7a4   :  { %5109 = vmatprep.subr.bf16.mxu1 %v10159_v11 }
 0x7a7   :  { %5110 = vmatpush1.bf16.msra.mxu1 %v10157_v4 }
 0x7a8   :  { %5111 = vmatprep.subr.bf16.mxu1 %v10165_v6 }
 0x7ab   :  { %5112 = vmatpush1.bf16.msra.mxu1 %v10163_v8 }
 0x7ac   :  { %5113 = vmatprep.subr.bf16.mxu1 %v10171_v18 }
 0x7af   :  { %5114 = vmatpush1.bf16.msra.mxu1 %v10169_v19 }
 0x7b0   :  { %5115 = vmatprep.subr.bf16.mxu1 %v10177_v13 }
 0x7b3   :  { %5116 = vmatpush1.bf16.msra.mxu1 %v10175_v25 }
 0x7b4   :  { %5117 = vmatprep.subr.bf16.mxu1 %v10183_v29 }
 0x7b7   :  { %5118 = vmatpush2.bf16.msra.mxu1 %v10181_v31 }
 0x7b8   :  { %5119 = vmatprep.subr.bf16.mxu1 %v10189_v33 }
 0x7bb   :  { %5120 = vmatpush2.bf16.msra.mxu1 %v10187_v35 }
 0x7bc   :  { %5121 = vmatprep.subr.bf16.mxu1 %v10195_v38 }
 0x7bf   :  { %5122 = vmatpush2.bf16.msra.mxu1 %v10193_v45 }
 0x7c0   :  { %5123 = vmatprep.subr.bf16.mxu1 %v10201_v43 }
 0x7c3   :  { %5124 = vmatpush2.bf16.msra.mxu1 %v10199_v48 }
 0x7c4   :  { %5125 = vmatprep.subr.bf16.mxu1 %v10207_v50 }
 0x7c7   :  { %5126 = vmatpush2.bf16.msra.mxu1 %v10205_v52  ;;  %v4580_v52 = vld [vmem:[%s11551_s1] sm:$0x3] }
 0x7c8   :  { %5127 = vmatprep.subr.bf16.mxu1 %v10213_v57  ;;  %v4624_v57 = vrot.slane %v4580_v52, %v11216_v10  ;;  %v4628_v21 = vrot.slane %v4580_v52, %v11225_v14  ;;  %v5438_v52 = vld [vmem:[#allocation31 + $0x4e0] sm:$0xff] }
 0x7cb   :  { %5128 = vmatpush2.bf16.msra.mxu1 %v10211_v9 }
 0x7cc   :  { %5129 = vmatprep.subr.bf16.mxu1 %v10219_v53 }
 0x7cf   :  { %5130 = vmatpush2.bf16.msra.mxu1 %v10217_v56 }
 0x7d0   :  { %5131 = vmatprep.subr.bf16.mxu1 %v10225_v28  ;;  %v4641_v28 = vrot.slane %v4581_v54, %v11225_v14 }
 0x7d3   :  { %5132 = vmatpush2.bf16.msra.mxu1 %v10223_v59 }
 0x856   :  { %v4573_v26 = vpop.f32.mrf.mxu1 }
 0x857   :  { %v4574_v62 = vadd.f32 %v4573_v26, %v4452_v23 }
 0x858   :  { %v4575_v63 = vpop.f32.mrf.mxu1 }
 0x859   :  { %v4582_v0 = vrot.slane %v4574_v62, 4  ;;  %v4576_v1 = vadd.f32 %v4575_v63, %v4456_v61 }
 0x85a   :  { %v4577_v2 = vpop.f32.mrf.mxu1 }
 0x85b   :  { %v4583_v11 = vadd.f32 %v4582_v0, %v4574_v62  ;;  %v4588_v3 = vrot.slane %v4576_v1, 4  ;;  %v5342_v2 = vld [vmem:[#allocation31 + $0x1e0] sm:$0xff] }
 0x85c   :  { %v4578_v4 = vpop.f32.mrf.mxu1 }
 0x85d   :  { %v4584_v5 = vrot.slane %v4583_v11, 2  ;;  %v4589_v6 = vadd.f32 %v4588_v3, %v4576_v1  ;;  %v5470_v4 = vld [vmem:[#allocation31 + $0x5e0] sm:$0xff] }
 0x85f   :  { %v4585_v7 = vadd.f32 %v4584_v5, %v4583_v11  ;;  %v4590_v8 = vrot.slane %v4589_v6, 2  ;;  %v5466_v11 = vld [vmem:[#allocation31 + $0x5c0] sm:$0xff] }
 0x861   :  { %v4586_v16 = vrot.slane %v4585_v7, 1  ;;  %v4591_v18 = vadd.f32 %v4590_v8, %v4589_v6  ;;  %v9246_v6 = vcombine.low %v5466_v11, %v5470_v4  ;;  %v5330_v8 = vld [vmem:[#allocation31 + $0x180] sm:$0xff] }
 0x863   :  { %v4587_v17 = vadd.f32 %v4586_v16, %v4585_v7  ;;  %v4592_v19 = vrot.slane %v4591_v18, 1  ;;  %v9247_v7 = vcombine.high %v5466_v11, %v5470_v4  ;;  %v5334_v16 = vld [vmem:[#allocation31 + $0x1a0] sm:$0xff] }
 0x864   :  { %v5410_v11 = vld [vmem:[#allocation31 + $0x400] sm:$0xff] }
 0x865   :  { %v4594_v22 = vmul.f32 0.125, %v4587_v17  ;;  %v4593_v13 = vadd.f32 %v4592_v19, %v4591_v18  ;;  %6905 = vmatprep.subr.bf16.mxu1 %v9247_v7  ;;  %v5458_v18 = vld [vmem:[#allocation31 + $0x580] sm:$0xff]  ;;  %v9111_v17 = vcombine.high %v5330_v8, %v5334_v16 }
 0x866   :  { %v5462_v19 = vld [vmem:[#allocation31 + $0x5a0] sm:$0xff] }
 0x867   :  { %v4596_v20 = vsub.f32 %v4574_v62, %v4594_v22  ;;  %v4595_v25 = vmul.f32 0.125, %v4593_v13  ;;  %v9110_v22 = vcombine.low %v5330_v8, %v5334_v16  ;;  %v9238_v13 = vcombine.low %v5458_v18, %v5462_v19  ;;  %v5414_v4 = vld [vmem:[#allocation31 + $0x420] sm:$0xff] }
 0x868   :  { %v9191_v7 = vcombine.high %v5410_v11, %v5414_v4  ;;  %v5402_v8 = vld [vmem:[#allocation31 + $0x3c0] sm:$0xff] }
 0x869   :  { %v4598_v27 = vmul.f32 %v4596_v20, %v4596_v20  ;;  %v4597_v29 = vsub.f32 %v4576_v1, %v4595_v25  ;;  %v5338_v1 = vld [vmem:[#allocation31 + $0x1c0] sm:$0xff] }
 0x86a   :  { %v9119_v3 = vcombine.high %v5338_v1, %v5342_v2  ;;  %v9118_v5 = vcombine.low %v5338_v1, %v5342_v2  ;;  %v5322_v25 = vld [vmem:[#allocation31 + $0x140] sm:$0xff] }
 0x86b   :  { %v4600_v30 = vrot.slane %v4598_v27, 4  ;;  %v4599_v31 = vmul.f32 %v4597_v29, %v4597_v29  ;;  %v5282_v1 = vld [vmem:[#allocation31] sm:$0xff] }
 0x86c   :  { %6864 = vmatprep.subr.bf16.mxu0 %v9119_v3  ;;  %v5286_v2 = vld [vmem:[#allocation31 + $0x20] sm:$0xff] }
 0x86d   :  { %v4601_v32 = vadd.f32 %v4600_v30, %v4598_v27  ;;  %v4606_v33 = vrot.slane %v4599_v31, 4  ;;  %v5326_v27 = vld [vmem:[#allocation31 + $0x160] sm:$0xff]  ;;  %v9063_v3 = vcombine.high %v5282_v1, %v5286_v2 }
 0x86e   :  { %v9103_v30 = vcombine.high %v5322_v25, %v5326_v27  ;;  %v5406_v16 = vld [vmem:[#allocation31 + $0x3e0] sm:$0xff] }
 0x86f   :  { %v4602_v34 = vrot.slane %v4601_v32, 2  ;;  %v4607_v35 = vadd.f32 %v4606_v33, %v4599_v31  ;;  %v5454_v31 = vld [vmem:[#allocation31 + $0x560] sm:$0xff] }
 0x871   :  { %v4603_v37 = vadd.f32 %v4602_v34, %v4601_v32  ;;  %v4608_v38 = vrot.slane %v4607_v35, 2  ;;  %v9102_v32 = vcombine.low %v5322_v25, %v5326_v27  ;;  %v5394_v25 = vld [vmem:[#allocation31 + $0x380] sm:$0xff] }
 0x872   :  { %v5398_v27 = vld [vmem:[#allocation31 + $0x3a0] sm:$0xff] }
 0x873   :  { %v4604_v41 = vrot.slane %v4603_v37, 1  ;;  %v4609_v45 = vadd.f32 %v4608_v38, %v4607_v35  ;;  %v5314_v35 = vld [vmem:[#allocation31 + $0x100] sm:$0xff] }
 0x874   :  { %v5442_v38 = vld [vmem:[#allocation31 + $0x500] sm:$0xff] }
 0x875   :  { %v4605_v46 = vadd.f32 %v4604_v41, %v4603_v37  ;;  %v4610_v43 = vrot.slane %v4609_v45, 1  ;;  %v5318_v37 = vld [vmem:[#allocation31 + $0x120] sm:$0xff] }
 0x876   :  { %v9095_v41 = vcombine.high %v5314_v35, %v5318_v37 }
 0x877   :  { %v4612_v47 = vmul.f32 0.125, %v4605_v46  ;;  %v4611_v48 = vadd.f32 %v4610_v43, %v4609_v45  ;;  %v5446_v45 = vld [vmem:[#allocation31 + $0x520] sm:$0xff]  ;;  %v9094_v46 = vcombine.low %v5314_v35, %v5318_v37 }
 0x878   :  { %v9222_v43 = vcombine.low %v5442_v38, %v5446_v45  ;;  %v5386_v35 = vld [vmem:[#allocation31 + $0x340] sm:$0xff] }
 0x879   :  { %v4614_v49 = vadd.f32 1e-05, %v4612_v47  ;;  %v4613_v50 = vmul.f32 0.125, %v4611_v48  ;;  %v9223_v47 = vcombine.high %v5442_v38, %v5446_v45  ;;  %v5306_v48 = vld [vmem:[#allocation31 + $0xc0] sm:$0xff] }
 0x87a   :  { %v5390_v37 = vld [vmem:[#allocation31 + $0x360] sm:$0xff] }
 0x87b   :  { %10432 = vrsqrt.f32 %v4614_v49  ;;  %v4615_v51 = vadd.f32 1e-05, %v4613_v50  ;;  %v5310_v49 = vld [vmem:[#allocation31 + $0xe0] sm:$0xff] }
 0x87c   :  { %v5434_v50 = vld [vmem:[#allocation31 + $0x4c0] sm:$0xff]  ;;  %v9086_v54 = vcombine.low %v5306_v48, %v5310_v49 }
 0x87d   :  { %10434 = vrsqrt.f32 %v4615_v51  ;;  %v9087_v51 = vcombine.high %v5306_v48, %v5310_v49  ;;  %v5514_v38 = vld [vmem:[#allocation31 + $0x740] sm:$0xff] }
 0x87e   :  { %v5518_v45 = vld [vmem:[#allocation31 + $0x760] sm:$0xff] }
 0x87f   :  { %v5378_v48 = vld [vmem:[#allocation31 + $0x300] sm:$0xff] }
 0x880   :  { %v5382_v49 = vld [vmem:[#allocation31 + $0x320] sm:$0xff] }
 0x888   :  { %v10433_v55 = vpop.eup %10432 }
 0x889   :  { %v4618_v9 = vmul.f32 %v10433_v55, %v4596_v20  ;;  %v9239_v20 = vcombine.high %v5458_v18, %v5462_v19  ;;  %v9215_v55 = vcombine.high %v5434_v50, %v5438_v52  ;;  %v5530_v18 = vld [vmem:[#allocation31 + $0x7c0] sm:$0xff] }
 0x88a   :  { %v10435_v53 = vpop.eup %10434  ;;  %v5534_v19 = vld [vmem:[#allocation31 + $0x7e0] sm:$0xff] }
 0x88b   :  { %v4631_v56 = vmul.f32 %v4624_v57, %v4618_v9  ;;  %v4619_v24 = vmul.f32 %v10435_v53, %v4597_v29  ;;  %v5450_v29 = vld [vmem:[#allocation31 + $0x540] sm:$0xff]  ;;  %v9214_v57 = vcombine.low %v5434_v50, %v5438_v52 }
 0x88c   :  { %v9230_v33 = vcombine.low %v5450_v29, %v5454_v31  ;;  %v9231_v34 = vcombine.high %v5450_v29, %v5454_v31  ;;  %v5298_v9 = vld [vmem:[#allocation31 + $0x80] sm:$0xff] }
 0x88d   :  { %v4644_v58 = vadd.f32 %v4637_v44, %v4631_v56  ;;  %v4632_v59 = vmul.f32 %v4628_v21, %v4619_v24  ;;  %v5302_v44 = vld [vmem:[#allocation31 + $0xa0] sm:$0xff] }
 0x88e   :  { %v5426_v21 = vld [vmem:[#allocation31 + $0x480] sm:$0xff]  ;;  %v9079_v53 = vcombine.high %v5298_v9, %v5302_v44  ;;  %v9078_v24 = vcombine.low %v5298_v9, %v5302_v44 }
 0x88f   :  { %v4645_v60 = vadd.f32 %v4641_v28, %v4632_v59  ;;  %vm4646_vm3 = vcmp.ge.f32.partialorder %v4644_v58, 0.0  ;;  %v4648_v23 = vmul.f32 0.2, %v4644_v58  ;;  %v5430_v56 = vld [vmem:[#allocation31 + $0x4a0] sm:$0xff] }
 0x890   :  { %v9206_v28 = vcombine.low %v5426_v21, %v5430_v56  ;;  %v5290_v59 = vld [vmem:[#allocation31 + $0x40] sm:$0xff] }
 0x891   :  { %vm4647_vm4 = vcmp.ge.f32.partialorder %v4645_v60, 0.0  ;;  %v4649_v61 = vmul.f32 0.2, %v4645_v60  ;;  %v4650_v26 = vsel %vm4646_vm3, %v4644_v58, %v4648_v23  ;;  %v9207_v58 = vcombine.high %v5426_v21, %v5430_v56  ;;  %v5418_v23 = vld [vmem:[#allocation31 + $0x440] sm:$0xff] }
 0x892   :  { %v4717_v0 = vpack.c.bf16 %v4650_v26, %v4650_v26  ;;  %v5422_v26 = vld [vmem:[#allocation31 + $0x460] sm:$0xff] }
 0x893   :  { %v4651_v62 = vsel %vm4647_vm4, %v4645_v60, %v4649_v61  ;;  %v5294_v60 = vld [vmem:[#allocation31 + $0x60] sm:$0xff] }
 0x894   :  { %v4718_v63 = vpack.c.bf16 %v4651_v62, %v4651_v62  ;;  %v9071_v61 = vcombine.high %v5290_v59, %v5294_v60  ;;  %v9070_v62 = vcombine.low %v5290_v59, %v5294_v60  ;;  %v5522_v29 = vld [vmem:[#allocation31 + $0x780] sm:$0xff] }
 0x895   :  { %v5526_v31 = vld [vmem:[#allocation31 + $0x7a0] sm:$0xff] }
 0x896   :  { %5092 = vmatprep.mubr.bf16.mxu0 %v4718_v63  ;;  %5133 = vmatprep.mubr.bf16.mxu1 %v4718_v63  ;;  %v9198_v63 = vcombine.low %v5418_v23, %v5422_v26  ;;  %v5506_v50 = vld [vmem:[#allocation31 + $0x700] sm:$0xff] }
 0x897   :  { %5093 = vmatmul.mubr.bf16.vlgmr.msra.gmra.mxu0 %v4717_v0  ;;  %5134 = vmatmul.mubr.bf16.vlgmr.msra.gmra.mxu1 %v4717_v0  ;;  %v9199_v0 = vcombine.high %v5418_v23, %v5422_v26  ;;  %v5510_v52 = vld [vmem:[#allocation31 + $0x720] sm:$0xff] }
 0x898   :  { %6865 = vmatpush1.bf16.msra.mxu0 %v9118_v5  ;;  %6906 = vmatpush1.bf16.msra.mxu1 %v9246_v6  ;;  %v9062_v5 = vcombine.low %v5282_v1, %v5286_v2  ;;  %v9190_v6 = vcombine.low %v5410_v11, %v5414_v4  ;;  %v5370_v9 = vld [vmem:[#allocation31 + $0x2c0] sm:$0xff] }
 0x899   :  { %6866 = vmatprep.subr.bf16.mxu0 %v9111_v17  ;;  %6907 = vmatprep.subr.bf16.mxu1 %v9239_v20  ;;  %v9183_v17 = vcombine.high %v5402_v8, %v5406_v16  ;;  %v9311_v20 = vcombine.high %v5530_v18, %v5534_v19  ;;  %v5374_v44 = vld [vmem:[#allocation31 + $0x2e0] sm:$0xff] }
 0x89a   :  { %v5498_v21 = vld [vmem:[#allocation31 + $0x6c0] sm:$0xff] }
 0x89b   :  { %v5502_v56 = vld [vmem:[#allocation31 + $0x6e0] sm:$0xff] }
 0x89c   :  { %6867 = vmatpush1.bf16.msra.mxu0 %v9110_v22  ;;  %6908 = vmatpush1.bf16.msra.mxu1 %v9238_v13  ;;  %v9182_v22 = vcombine.low %v5402_v8, %v5406_v16  ;;  %v9310_v13 = vcombine.low %v5530_v18, %v5534_v19  ;;  %v5362_v59 = vld [vmem:[#allocation31 + $0x280] sm:$0xff] }
 0x89d   :  { %6868 = vmatprep.subr.bf16.mxu0 %v9103_v30  ;;  %6909 = vmatprep.subr.bf16.mxu1 %v9231_v34  ;;  %v9175_v30 = vcombine.high %v5394_v25, %v5398_v27  ;;  %v9303_v34 = vcombine.high %v5522_v29, %v5526_v31  ;;  %v5366_v60 = vld [vmem:[#allocation31 + $0x2a0] sm:$0xff] }
 0x89e   :  { %v5490_v23 = vld [vmem:[#allocation31 + $0x680] sm:$0xff] }
 0x89f   :  { %v5494_v26 = vld [vmem:[#allocation31 + $0x6a0] sm:$0xff] }
 0x8a0   :  { %6869 = vmatpush1.bf16.msra.mxu0 %v9102_v32  ;;  %6910 = vmatpush1.bf16.msra.mxu1 %v9230_v33  ;;  %v9174_v32 = vcombine.low %v5394_v25, %v5398_v27  ;;  %v9302_v33 = vcombine.low %v5522_v29, %v5526_v31  ;;  %v5354_v1 = vld [vmem:[#allocation31 + $0x240] sm:$0xff]  ;;  %v11388_v25 = vld [vmem:[#allocation31 + $0x1c8] sm:$0xff] }
 0x8a1   :  { %6870 = vmatprep.subr.bf16.mxu0 %v9095_v41  ;;  %6911 = vmatprep.subr.bf16.mxu1 %v9223_v47  ;;  %v9167_v41 = vcombine.high %v5386_v35, %v5390_v37  ;;  %v9295_v47 = vcombine.high %v5514_v38, %v5518_v45  ;;  %v5358_v2 = vld [vmem:[#allocation31 + $0x260] sm:$0xff]  ;;  %v11390_v27 = vld [vmem:[#allocation31 + $0x1e8] sm:$0xff] }
 0x8a2   :  { %v5482_v11 = vld [vmem:[#allocation31 + $0x640] sm:$0xff]  ;;  %v11392_v29 = vld [vmem:[#allocation31 + $0x5c8] sm:$0xff] }
 0x8a3   :  { %v5486_v4 = vld [vmem:[#allocation31 + $0x660] sm:$0xff]  ;;  %v11396_v31 = vld [vmem:[#allocation31 + $0x5e8] sm:$0xff] }
 0x8a4   :  { %6871 = vmatpush1.bf16.msra.mxu0 %v9094_v46  ;;  %6912 = vmatpush1.bf16.msra.mxu1 %v9222_v43  ;;  %v9166_v46 = vcombine.low %v5386_v35, %v5390_v37  ;;  %v9294_v43 = vcombine.low %v5514_v38, %v5518_v45  ;;  %v5346_v8 = vld [vmem:[#allocation31 + $0x200] sm:$0xff] }
 0x8a5   :  { %6872 = vmatprep.subr.bf16.mxu0 %v9087_v51  ;;  %6913 = vmatprep.subr.bf16.mxu1 %v9215_v55  ;;  %v9159_v51 = vcombine.high %v5378_v48, %v5382_v49  ;;  %v9287_v55 = vcombine.high %v5506_v50, %v5510_v52  ;;  %v5350_v16 = vld [vmem:[#allocation31 + $0x220] sm:$0xff] }
 0x8a6   :  { %v5474_v18 = vld [vmem:[#allocation31 + $0x600] sm:$0xff]  ;;  %v9127_v19 = vcombine.high %v5346_v8, %v5350_v16 }
 0x8a7   :  { %v4716_v35 = vld [vmem:[%s11553_s26] sm:$0xf] }
 0x8a8   :  { %6873 = vmatpush1.bf16.msra.mxu0 %v9086_v54  ;;  %6914 = vmatpush1.bf16.msra.mxu1 %v9214_v57  ;;  %v9158_v54 = vcombine.low %v5378_v48, %v5382_v49  ;;  %v9286_v57 = vcombine.low %v5506_v50, %v5510_v52  ;;  %v4723_v37 = vrot.slane %v4716_v35, %v11216_v10 }
 0x8a9   :  { %6874 = vmatprep.subr.bf16.mxu0 %v9079_v53  ;;  %6915 = vmatprep.subr.bf16.mxu1 %v9207_v58  ;;  %v9151_v53 = vcombine.high %v5370_v9, %v5374_v44  ;;  %v9279_v58 = vcombine.high %v5498_v21, %v5502_v56  ;;  %v4731_v38 = vrot.slane %v4716_v35, %v11222_v12 }
 0x8aa   :  { %v4735_v45 = vrot.slane %v4716_v35, %v11228_v15 }
 0x8ac   :  { %6875 = vmatpush1.bf16.msra.mxu0 %v9078_v24  ;;  %6916 = vmatpush1.bf16.msra.mxu1 %v9206_v28  ;;  %v9150_v24 = vcombine.low %v5370_v9, %v5374_v44  ;;  %v9278_v28 = vcombine.low %v5498_v21, %v5502_v56 }
 0x8ad   :  { %6876 = vmatprep.subr.bf16.mxu0 %v9071_v61  ;;  %6917 = vmatprep.subr.bf16.mxu1 %v9199_v0  ;;  %v9143_v61 = vcombine.high %v5362_v59, %v5366_v60  ;;  %v9271_v0 = vcombine.high %v5490_v23, %v5494_v26 }
 0x8b0   :  { %6877 = vmatpush1.bf16.msra.mxu0 %v9070_v62  ;;  %6918 = vmatpush1.bf16.msra.mxu1 %v9198_v63  ;;  %v9142_v62 = vcombine.low %v5362_v59, %v5366_v60  ;;  %v9270_v63 = vcombine.low %v5490_v23, %v5494_v26 }
 0x8b1   :  { %6878 = vmatprep.subr.bf16.mxu0 %v9063_v3  ;;  %6919 = vmatprep.subr.bf16.mxu1 %v9191_v7  ;;  %v9135_v3 = vcombine.high %v5354_v1, %v5358_v2  ;;  %v9263_v7 = vcombine.high %v5482_v11, %v5486_v4 }
 0x8b4   :  { %6879 = vmatpush1.bf16.msra.mxu0 %v9062_v5  ;;  %6920 = vmatpush1.bf16.msra.mxu1 %v9190_v6  ;;  %v9134_v5 = vcombine.low %v5354_v1, %v5358_v2  ;;  %v9262_v6 = vcombine.low %v5482_v11, %v5486_v4 }
 0x8b5   :  { %6880 = vmatprep.subr.bf16.mxu0 %v9183_v17  ;;  %6921 = vmatprep.subr.bf16.mxu1 %v9311_v20  ;;  %v9126_v17 = vcombine.low %v5346_v8, %v5350_v16 }
 0x8b8   :  { %6881 = vmatpush2.bf16.msra.mxu0 %v9182_v22  ;;  %6922 = vmatpush2.bf16.msra.mxu1 %v9310_v13  ;;  %v5478_v22 = vld [vmem:[#allocation31 + $0x620] sm:$0xff] }
 0x8b9   :  { %6882 = vmatprep.subr.bf16.mxu0 %v9175_v30  ;;  %6923 = vmatprep.subr.bf16.mxu1 %v9303_v34  ;;  %v9255_v13 = vcombine.high %v5474_v18, %v5478_v22  ;;  %v9254_v20 = vcombine.low %v5474_v18, %v5478_v22  ;;  %v9121_v30 = vcombine.high %v11388_v25, %v11390_v27 }
 0x8ba   :  { %v9249_v34 = vcombine.high %v11392_v29, %v11396_v31 }
 0x8bc   :  { %6883 = vmatpush2.bf16.msra.mxu0 %v9174_v32  ;;  %6924 = vmatpush2.bf16.msra.mxu1 %v9302_v33  ;;  %v9120_v32 = vcombine.low %v11388_v25, %v11390_v27  ;;  %v9248_v33 = vcombine.low %v11392_v29, %v11396_v31 }
 0x8bd   :  { %6884 = vmatprep.subr.bf16.mxu0 %v9167_v41  ;;  %6925 = vmatprep.subr.bf16.mxu1 %v9295_v47  ;;  %v4727_v41 = vrot.slane %v4716_v35, %v11225_v14 }
 0x8c0   :  { %6885 = vmatpush2.bf16.msra.mxu0 %v9166_v46  ;;  %6926 = vmatpush2.bf16.msra.mxu1 %v9294_v43 }
 0x8c1   :  { %6886 = vmatprep.subr.bf16.mxu0 %v9159_v51  ;;  %6927 = vmatprep.subr.bf16.mxu1 %v9287_v55 }
 0x8c4   :  { %6887 = vmatpush2.bf16.msra.mxu0 %v9158_v54  ;;  %6928 = vmatpush2.bf16.msra.mxu1 %v9286_v57 }
 0x8c5   :  { %6888 = vmatprep.subr.bf16.mxu0 %v9151_v53  ;;  %6929 = vmatprep.subr.bf16.mxu1 %v9279_v58 }
 0x8c8   :  { %6889 = vmatpush2.bf16.msra.mxu0 %v9150_v24  ;;  %6930 = vmatpush2.bf16.msra.mxu1 %v9278_v28 }
 0x8c9   :  { %6890 = vmatprep.subr.bf16.mxu0 %v9143_v61  ;;  %6931 = vmatprep.subr.bf16.mxu1 %v9271_v0 }
 0x8cc   :  { %6891 = vmatpush2.bf16.msra.mxu0 %v9142_v62  ;;  %6932 = vmatpush2.bf16.msra.mxu1 %v9270_v63 }
 0x8cd   :  { %6892 = vmatprep.subr.bf16.mxu0 %v9135_v3  ;;  %6933 = vmatprep.subr.bf16.mxu1 %v9263_v7 }
 0x8d0   :  { %6893 = vmatpush2.bf16.msra.mxu0 %v9134_v5  ;;  %6934 = vmatpush2.bf16.msra.mxu1 %v9262_v6 }
 0x8d1   :  { %6894 = vmatprep.subr.bf16.mxu0 %v9127_v19  ;;  %6935 = vmatprep.subr.bf16.mxu1 %v9255_v13 }
 0x8d4   :  { %6895 = vmatpush2.bf16.msra.mxu0 %v9126_v17  ;;  %6936 = vmatpush2.bf16.msra.mxu1 %v9254_v20 }
 0x8d5   :  { %6946 = vmatprep.subr.bf16.mxu0 %v9121_v30  ;;  %6987 = vmatprep.subr.bf16.mxu1 %v9249_v34 }
 0x957   :  { %v5094_v46 = vpop.f32.mrf.mxu0  ;;  %v5135_v43 = vpop.f32.mrf.mxu1 }
 0x958   :  { %v5095_v47 = vadd.f32 %v5094_v46, %v4723_v37  ;;  %v5136_v48 = vadd.f32 %v5135_v43, %v4731_v38 }
 0x959   :  { %v5096_v49 = vpop.f32.mrf.mxu0  ;;  %v5137_v50 = vpop.f32.mrf.mxu1 }
 0x95a   :  { %v5144_v51 = vrot.slane %v5095_v47, 4  ;;  %v5156_v52 = vrot.slane %v5136_v48, 4  ;;  %v5097_v54 = vadd.f32 %v5096_v49, %v4727_v41  ;;  %v5138_v57 = vadd.f32 %v5137_v50, %v4735_v45 }
 0x95b   :  { %v5098_v55 = vpop.f32.mrf.mxu0  ;;  %v5139_v9 = vpop.f32.mrf.mxu1 }
 0x95c   :  { %v5145_v44 = vadd.f32 %v5144_v51, %v5095_v47  ;;  %v5157_v21 = vadd.f32 %v5156_v52, %v5136_v48  ;;  %v5150_v53 = vrot.slane %v5097_v54, 4  ;;  %v5162_v56 = vrot.slane %v5138_v57, 4 }
 0x95d   :  { %v5099_v24 = vpop.f32.mrf.mxu0  ;;  %v5140_v28 = vpop.f32.mrf.mxu1 }
 0x95e   :  { %v5146_v58 = vrot.slane %v5145_v44, 2  ;;  %v5158_v59 = vrot.slane %v5157_v21, 2  ;;  %v5151_v60 = vadd.f32 %v5150_v53, %v5097_v54  ;;  %v5163_v23 = vadd.f32 %v5162_v56, %v5138_v57 }
 0x960   :  { %v5147_v61 = vadd.f32 %v5146_v58, %v5145_v44  ;;  %v5159_v26 = vadd.f32 %v5158_v59, %v5157_v21  ;;  %v5152_v62 = vrot.slane %v5151_v60, 2  ;;  %v5164_v63 = vrot.slane %v5163_v23, 2 }
 0x962   :  { %v5148_v0 = vrot.slane %v5147_v61, 1  ;;  %v5160_v1 = vrot.slane %v5159_v26, 1  ;;  %v5153_v2 = vadd.f32 %v5152_v62, %v5151_v60  ;;  %v5165_v11 = vadd.f32 %v5164_v63, %v5163_v23 }
 0x964   :  { %v5149_v3 = vadd.f32 %v5148_v0, %v5147_v61  ;;  %v5161_v4 = vadd.f32 %v5160_v1, %v5159_v26  ;;  %v5154_v5 = vrot.slane %v5153_v2, 1  ;;  %v5166_v6 = vrot.slane %v5165_v11, 1 }
 0x966   :  { %v5168_v7 = vmul.f32 0.125, %v5149_v3  ;;  %v5170_v8 = vmul.f32 0.125, %v5161_v4  ;;  %v5155_v16 = vadd.f32 %v5154_v5, %v5153_v2  ;;  %v5167_v18 = vadd.f32 %v5166_v6, %v5165_v11  ;;  %v5142_v3 = vld [vmem:[%s11554_s12] sm:$0xf] }
 0x967   :  { %v5143_v4 = vld [vmem:[%s11555_s8] sm:$0xf]  ;;  %v5224_v5 = vrot.slane %v5142_v3, %v11216_v10 }
 0x968   :  { %v5172_v17 = vsub.f32 %v5095_v47, %v5168_v7  ;;  %v5174_v19 = vsub.f32 %v5136_v48, %v5170_v8  ;;  %v5169_v22 = vmul.f32 0.125, %v5155_v16  ;;  %v5171_v13 = vmul.f32 0.125, %v5167_v18 }
 0x969   :  { %v5232_v7 = vrot.slane %v5142_v3, %v11222_v12  ;;  %v5249_v18 = vrot.slane %v5143_v4, %v11216_v10 }
 0x96a   :  { %v5176_v20 = vmul.f32 %v5172_v17, %v5172_v17  ;;  %v5178_v30 = vmul.f32 %v5174_v19, %v5174_v19  ;;  %v5173_v34 = vsub.f32 %v5097_v54, %v5169_v22  ;;  %v5175_v35 = vsub.f32 %v5138_v57, %v5171_v13 }
 0x96b   :  { %v5228_v22 = vrot.slane %v5142_v3, %v11225_v14 }
 0x96c   :  { %v5180_v37 = vrot.slane %v5176_v20, 4  ;;  %v5192_v38 = vrot.slane %v5178_v30, 4  ;;  %v5177_v41 = vmul.f32 %v5173_v34, %v5173_v34  ;;  %v5179_v45 = vmul.f32 %v5175_v35, %v5175_v35 }
 0x96e   :  { %v5181_v46 = vadd.f32 %v5180_v37, %v5176_v20  ;;  %v5193_v43 = vadd.f32 %v5192_v38, %v5178_v30  ;;  %v5186_v49 = vrot.slane %v5177_v41, 4  ;;  %v5198_v50 = vrot.slane %v5179_v45, 4 }
 0x96f   :  { %v5257_v30 = vrot.slane %v5143_v4, %v11222_v12  ;;  %v5236_v37 = vrot.slane %v5142_v3, %v11228_v15 }
 0x970   :  { %v5182_v51 = vrot.slane %v5181_v46, 2  ;;  %v5194_v52 = vrot.slane %v5193_v43, 2  ;;  %v5187_v55 = vadd.f32 %v5186_v49, %v5177_v41  ;;  %v5199_v9 = vadd.f32 %v5198_v50, %v5179_v45 }
 0x971   :  { %v5261_v50 = vrot.slane %v5143_v4, %v11228_v15 }
 0x972   :  { %v5183_v47 = vadd.f32 %v5182_v51, %v5181_v46  ;;  %v5195_v48 = vadd.f32 %v5194_v52, %v5193_v43  ;;  %v5188_v44 = vrot.slane %v5187_v55, 2  ;;  %v5200_v21 = vrot.slane %v5199_v9, 2 }
 0x973   :  { %v5253_v46 = vrot.slane %v5143_v4, %v11225_v14 }
 0x974   :  { %v5184_v53 = vrot.slane %v5183_v47, 1  ;;  %v5196_v56 = vrot.slane %v5195_v48, 1  ;;  %v5189_v54 = vadd.f32 %v5188_v44, %v5187_v55  ;;  %v5201_v57 = vadd.f32 %v5200_v21, %v5199_v9 }
 0x976   :  { %v5185_v24 = vadd.f32 %v5184_v53, %v5183_v47  ;;  %v5197_v28 = vadd.f32 %v5196_v56, %v5195_v48  ;;  %v5190_v58 = vrot.slane %v5189_v54, 1  ;;  %v5202_v59 = vrot.slane %v5201_v57, 1 }
 0x978   :  { %v5204_v60 = vmul.f32 0.125, %v5185_v24  ;;  %v5206_v23 = vmul.f32 0.125, %v5197_v28  ;;  %v5191_v61 = vadd.f32 %v5190_v58, %v5189_v54  ;;  %v5203_v26 = vadd.f32 %v5202_v59, %v5201_v57  ;;  %v5335_v54 = vld [vmem:[#allocation31 + $0x1a8] sm:$0xff] }
 0x979   :  { %v5459_v28 = vld [vmem:[#allocation31 + $0x588] sm:$0xff] }
 0x97a   :  { %v5208_v62 = vadd.f32 1e-05, %v5204_v60  ;;  %v5210_v63 = vadd.f32 1e-05, %v5206_v23  ;;  %v5205_v0 = vmul.f32 0.125, %v5191_v61  ;;  %v5207_v1 = vmul.f32 0.125, %v5203_v26 }
 0x97b   :  { %v5463_v58 = vld [vmem:[#allocation31 + $0x5a8] sm:$0xff] }
 0x97c   :  { %10436 = vrsqrt.f32 %v5208_v62  ;;  %v5209_v2 = vadd.f32 1e-05, %v5205_v0  ;;  %v5211_v11 = vadd.f32 1e-05, %v5207_v1  ;;  %v5323_v26 = vld [vmem:[#allocation31 + $0x148] sm:$0xff] }
 0x97d   :  { %10438 = vrsqrt.f32 %v5210_v63  ;;  %v5327_v62 = vld [vmem:[#allocation31 + $0x168] sm:$0xff]  ;;  %v9241_v63 = vcombine.high %v5459_v28, %v5463_v58 }
 0x97e   :  { %10440 = vrsqrt.f32 %v5209_v2  ;;  %v5451_v0 = vld [vmem:[#allocation31 + $0x548] sm:$0xff]  ;;  %v9105_v3 = vcombine.high %v5323_v26, %v5327_v62  ;;  %v9104_v25 = vcombine.low %v5323_v26, %v5327_v62 }
 0x97f   :  { %10442 = vrsqrt.f32 %v5211_v11  ;;  %v5455_v1 = vld [vmem:[#allocation31 + $0x568] sm:$0xff]  ;;  %v9240_v11 = vcombine.low %v5459_v28, %v5463_v58 }
 0x980   :  { %v9233_v4 = vcombine.high %v5451_v0, %v5455_v1  ;;  %v9232_v27 = vcombine.low %v5451_v0, %v5455_v1  ;;  %v5403_v28 = vld [vmem:[#allocation31 + $0x3c8] sm:$0xff] }
 0x981   :  { %v5407_v58 = vld [vmem:[#allocation31 + $0x3e8] sm:$0xff] }
 0x982   :  { %v5535_v26 = vld [vmem:[#allocation31 + $0x7e8] sm:$0xff]  ;;  %v9185_v0 = vcombine.high %v5403_v28, %v5407_v58 }
 0x989   :  { %v10437_v6 = vpop.eup %10436 }
 0x98a   :  { %v10439_v8 = vpop.eup %10438  ;;  %v5216_v16 = vmul.f32 %v10437_v6, %v5172_v17  ;;  %v5319_v6 = vld [vmem:[#allocation31 + $0x128] sm:$0xff] }
 0x98b   :  { %v10441_v13 = vpop.eup %10440  ;;  %v5218_v20 = vmul.f32 %v10439_v8, %v5174_v19  ;;  %v5447_v8 = vld [vmem:[#allocation31 + $0x528] sm:$0xff] }
 0x98c   :  { %v10443_v38 = vpop.eup %10442  ;;  %v5241_v41 = vmul.f32 %v5224_v5, %v5216_v16  ;;  %v5217_v45 = vmul.f32 %v10441_v13, %v5173_v34  ;;  %v5315_v5 = vld [vmem:[#allocation31 + $0x108] sm:$0xff] }
 0x98d   :  { %v5243_v43 = vmul.f32 %v5232_v7, %v5218_v20  ;;  %v5219_v49 = vmul.f32 %v10443_v38, %v5175_v35  ;;  %v5331_v35 = vld [vmem:[#allocation31 + $0x188] sm:$0xff]  ;;  %v9097_v29 = vcombine.high %v5315_v5, %v5319_v6 }
 0x98e   :  { %v5266_v17 = vadd.f32 %v5249_v18, %v5241_v41  ;;  %v5242_v51 = vmul.f32 %v5228_v22, %v5217_v45  ;;  %v9113_v61 = vcombine.high %v5331_v35, %v5335_v54  ;;  %v9112_v2 = vcombine.low %v5331_v35, %v5335_v54  ;;  %v5443_v7 = vld [vmem:[#allocation31 + $0x508] sm:$0xff] }
 0x98f   :  { %v5268_v52 = vadd.f32 %v5257_v30, %v5243_v43  ;;  %v5244_v55 = vmul.f32 %v5236_v37, %v5219_v49  ;;  %v9225_v31 = vcombine.high %v5443_v7, %v5447_v8  ;;  %v5435_v16 = vld [vmem:[#allocation31 + $0x4c8] sm:$0xff]  ;;  %v9096_v22 = vcombine.low %v5315_v5, %v5319_v6 }
 0x990   :  { %v5267_v9 = vadd.f32 %v5253_v46, %v5242_v51  ;;  %vm5270_vm5 = vcmp.ge.f32.partialorder %v5266_v17, 0.0  ;;  %v5274_v19 = vmul.f32 0.2, %v5266_v17  ;;  %v5439_v18 = vld [vmem:[#allocation31 + $0x4e8] sm:$0xff]  ;;  %v9224_v13 = vcombine.low %v5443_v7, %v5447_v8 }
 0x991   :  { %v5269_v47 = vadd.f32 %v5261_v50, %v5244_v55  ;;  %vm5272_vm6 = vcmp.ge.f32.partialorder %v5268_v52, 0.0  ;;  %v5276_v48 = vmul.f32 0.2, %v5268_v52  ;;  %v9217_v30 = vcombine.high %v5435_v16, %v5439_v18  ;;  %v5299_v37 = vld [vmem:[#allocation31 + $0x88] sm:$0xff] }
 0x992   :  { %vm5271_vm7 = vcmp.ge.f32.partialorder %v5267_v9, 0.0  ;;  %v5275_v44 = vmul.f32 0.2, %v5267_v9  ;;  %v5278_v21 = vsel %vm5270_vm5, %v5266_v17, %v5274_v19  ;;  %v5303_v38 = vld [vmem:[#allocation31 + $0xa8] sm:$0xff]  ;;  %v9216_v43 = vcombine.low %v5435_v16, %v5439_v18 }
 0x993   :  { %vm5273_vm8 = vcmp.ge.f32.partialorder %v5269_v47, 0.0  ;;  %v5277_v34 = vmul.f32 0.2, %v5269_v47  ;;  %v5280_v56 = vsel %vm5272_vm6, %v5268_v52, %v5276_v48  ;;  %v11423_v60 = vpack.c.bf16 %v5278_v21, %v5278_v21  ;;  %v5427_v41 = vld [vmem:[#allocation31 + $0x488] sm:$0xff] }
 0x994   :  { %v5279_v53 = vsel %vm5271_vm7, %v5267_v9, %v5275_v44  ;;  %v11426_v23 = vpack.c.bf16 %v5280_v56, %v5280_v56  ;;  %v5431_v45 = vld [vmem:[#allocation31 + $0x4a8] sm:$0xff]  ;;  %v9081_v49 = vcombine.high %v5299_v37, %v5303_v38  ;;  %v9080_v9 = vcombine.low %v5299_v37, %v5303_v38 }
 0x995   :  { %v11419_v57 = vpack.c.bf16 %v5279_v53, %v5279_v53  ;;  %v5281_v24 = vsel %vm5273_vm8, %v5269_v47, %v5277_v34  ;;  %v9209_v50 = vcombine.high %v5427_v41, %v5431_v45  ;;  %v5291_v17 = vld [vmem:[#allocation31 + $0x48] sm:$0xff]  ;;  %v9208_v19 = vcombine.low %v5427_v41, %v5431_v45 }
 0x996   :  { %v11421_v59 = vpack.c.bf16 %v5281_v24, %v5281_v24  ;;  %v5295_v51 = vld [vmem:[#allocation31 + $0x68] sm:$0xff]  ;;  %v9184_v5 = vcombine.low %v5403_v28, %v5407_v58 }
 0x997   :  { %6896 = vmatprep.mubr.bf16.mxu0 %v11419_v57  ;;  %v5419_v52 = vld [vmem:[#allocation31 + $0x448] sm:$0xff]  ;;  %v9073_v47 = vcombine.high %v5291_v17, %v5295_v51  ;;  %v9072_v56 = vcombine.low %v5291_v17, %v5295_v51 }
 0x998   :  { %6937 = vmatprep.mubr.bf16.mxu1 %v11421_v59  ;;  %6897 = vmatmul.mubr.bf16.vlgmr.msra.gmra.mxu0 %v11423_v60  ;;  %v5423_v55 = vld [vmem:[#allocation31 + $0x468] sm:$0xff] }
 0x999   :  { %6938 = vmatmul.mubr.bf16.vlgmr.msra.gmra.mxu1 %v11426_v23  ;;  %6947 = vmatpush1.bf16.msra.mxu0 %v9120_v32  ;;  %v5307_v32 = vld [vmem:[#allocation31 + $0xc8] sm:$0xff]  ;;  %v9201_v48 = vcombine.high %v5419_v52, %v5423_v55  ;;  %v9200_v35 = vcombine.low %v5419_v52, %v5423_v55 }
 0x99a   :  { %6988 = vmatpush1.bf16.msra.mxu1 %v9248_v33  ;;  %6978 = vmatprep.mubr.bf16.mxu0 %v11419_v57  ;;  %v5311_v33 = vld [vmem:[#allocation31 + $0xe8] sm:$0xff] }
 0x99b   :  { %7019 = vmatprep.mubr.bf16.mxu1 %v11421_v59  ;;  %6948 = vmatprep.subr.bf16.mxu0 %v9113_v61  ;;  %v9089_v20 = vcombine.high %v5307_v32, %v5311_v33  ;;  %v9088_v46 = vcombine.low %v5307_v32, %v5311_v33  ;;  %v5283_v44 = vld [vmem:[#allocation31 + $0x8] sm:$0xff] }
 0x99c   :  { %6989 = vmatprep.subr.bf16.mxu1 %v9241_v63  ;;  %v5287_v34 = vld [vmem:[#allocation31 + $0x28] sm:$0xff] }
 0x99d   :  { %6949 = vmatpush1.bf16.msra.mxu0 %v9112_v2  ;;  %v5411_v21 = vld [vmem:[#allocation31 + $0x408] sm:$0xff]  ;;  %v9065_v54 = vcombine.high %v5283_v44, %v5287_v34  ;;  %v9064_v62 = vcombine.low %v5283_v44, %v5287_v34 }
 0x99e   :  { %6990 = vmatpush1.bf16.msra.mxu1 %v9240_v11  ;;  %6950 = vmatprep.subr.bf16.mxu0 %v9105_v3  ;;  %v5415_v53 = vld [vmem:[#allocation31 + $0x428] sm:$0xff] }
 0x99f   :  { %6991 = vmatprep.subr.bf16.mxu1 %v9233_v4  ;;  %v9193_v24 = vcombine.high %v5411_v21, %v5415_v53  ;;  %v5531_v61 = vld [vmem:[#allocation31 + $0x7c8] sm:$0xff]  ;;  %v9192_v63 = vcombine.low %v5411_v21, %v5415_v53 }
 0x9a0   :  { %v9313_v1 = vcombine.high %v5531_v61, %v5535_v26  ;;  %v5395_v2 = vld [vmem:[#allocation31 + $0x388] sm:$0xff]  ;;  %v9312_v6 = vcombine.low %v5531_v61, %v5535_v26 }
 0x9a1   :  { %6951 = vmatpush1.bf16.msra.mxu0 %v9104_v25  ;;  %v5399_v11 = vld [vmem:[#allocation31 + $0x3a8] sm:$0xff] }
 0x9a2   :  { %6992 = vmatpush1.bf16.msra.mxu1 %v9232_v27  ;;  %6952 = vmatprep.subr.bf16.mxu0 %v9097_v29  ;;  %v5523_v3 = vld [vmem:[#allocation31 + $0x788] sm:$0xff]  ;;  %v9177_v7 = vcombine.high %v5395_v2, %v5399_v11  ;;  %v9176_v32 = vcombine.low %v5395_v2, %v5399_v11 }
 0x9a3   :  { %6993 = vmatprep.subr.bf16.mxu1 %v9225_v31  ;;  %v5527_v4 = vld [vmem:[#allocation31 + $0x7a8] sm:$0xff] }
 0x9a4   :  { %v9305_v8 = vcombine.high %v5523_v3, %v5527_v4  ;;  %v5387_v25 = vld [vmem:[#allocation31 + $0x348] sm:$0xff]  ;;  %v9304_v33 = vcombine.low %v5523_v3, %v5527_v4 }
 0x9a5   :  { %6953 = vmatpush1.bf16.msra.mxu0 %v9096_v22  ;;  %v5391_v27 = vld [vmem:[#allocation31 + $0x368] sm:$0xff] }
 0x9a6   :  { %6994 = vmatpush1.bf16.msra.mxu1 %v9224_v13  ;;  %6954 = vmatprep.subr.bf16.mxu0 %v9089_v20  ;;  %v5515_v29 = vld [vmem:[#allocation31 + $0x748] sm:$0xff]  ;;  %v9169_v16 = vcombine.high %v5387_v25, %v5391_v27  ;;  %v9168_v37 = vcombine.low %v5387_v25, %v5391_v27 }
 0x9a7   :  { %6995 = vmatprep.subr.bf16.mxu1 %v9217_v30  ;;  %v5519_v31 = vld [vmem:[#allocation31 + $0x768] sm:$0xff] }
 0x9a8   :  { %v9297_v18 = vcombine.high %v5515_v29, %v5519_v31  ;;  %v5379_v22 = vld [vmem:[#allocation31 + $0x308] sm:$0xff]  ;;  %v9296_v38 = vcombine.low %v5515_v29, %v5519_v31 }
 0x9a9   :  { %6955 = vmatpush1.bf16.msra.mxu0 %v9088_v46  ;;  %v5383_v13 = vld [vmem:[#allocation31 + $0x328] sm:$0xff] }
 0x9aa   :  { %6996 = vmatpush1.bf16.msra.mxu1 %v9216_v43  ;;  %6956 = vmatprep.subr.bf16.mxu0 %v9081_v49  ;;  %v5507_v20 = vld [vmem:[#allocation31 + $0x708] sm:$0xff]  ;;  %v9161_v41 = vcombine.high %v5379_v22, %v5383_v13  ;;  %v9160_v17 = vcombine.low %v5379_v22, %v5383_v13  ;;  %v5464_v22 = vld [vmem:[#allocation31 + $0x5b0] sm:$0xff] }
 0x9ab   :  { %6997 = vmatprep.subr.bf16.mxu1 %v9209_v50  ;;  %v5511_v30 = vld [vmem:[#allocation31 + $0x728] sm:$0xff] }
 0x9ac   :  { %v9289_v45 = vcombine.high %v5507_v20, %v5511_v30  ;;  %v5371_v46 = vld [vmem:[#allocation31 + $0x2c8] sm:$0xff]  ;;  %v9288_v51 = vcombine.low %v5507_v20, %v5511_v30  ;;  %v5324_v30 = vld [vmem:[#allocation31 + $0x150] sm:$0xff] }
 0x9ad   :  { %6957 = vmatpush1.bf16.msra.mxu0 %v9080_v9  ;;  %v5375_v43 = vld [vmem:[#allocation31 + $0x2e8] sm:$0xff] }
 0x9ae   :  { %6998 = vmatpush1.bf16.msra.mxu1 %v9208_v19  ;;  %6958 = vmatprep.subr.bf16.mxu0 %v9073_v47  ;;  %v5499_v49 = vld [vmem:[#allocation31 + $0x6c8] sm:$0xff]  ;;  %v9153_v52 = vcombine.high %v5371_v46, %v5375_v43  ;;  %v9152_v44 = vcombine.low %v5371_v46, %v5375_v43 }
 0x9af   :  { %6999 = vmatprep.subr.bf16.mxu1 %v9201_v48  ;;  %v5503_v50 = vld [vmem:[#allocation31 + $0x6e8] sm:$0xff] }
 0x9b0   :  { %v9281_v55 = vcombine.high %v5499_v49, %v5503_v50  ;;  %v5363_v9 = vld [vmem:[#allocation31 + $0x288] sm:$0xff]  ;;  %v9280_v34 = vcombine.low %v5499_v49, %v5503_v50 }
 0x9b1   :  { %6959 = vmatpush1.bf16.msra.mxu0 %v9072_v56  ;;  %v5367_v19 = vld [vmem:[#allocation31 + $0x2a8] sm:$0xff] }
 0x9b2   :  { %7000 = vmatpush1.bf16.msra.mxu1 %v9200_v35  ;;  %6960 = vmatprep.subr.bf16.mxu0 %v9065_v54  ;;  %v5491_v47 = vld [vmem:[#allocation31 + $0x688] sm:$0xff]  ;;  %v9145_v21 = vcombine.high %v5363_v9, %v5367_v19  ;;  %v9144_v28 = vcombine.low %v5363_v9, %v5367_v19 }
 0x9b3   :  { %7001 = vmatprep.subr.bf16.mxu1 %v9193_v24  ;;  %v5495_v48 = vld [vmem:[#allocation31 + $0x6a8] sm:$0xff] }
 0x9b4   :  { %v9273_v53 = vcombine.high %v5491_v47, %v5495_v48  ;;  %v5355_v56 = vld [vmem:[#allocation31 + $0x248] sm:$0xff]  ;;  %v9272_v58 = vcombine.low %v5491_v47, %v5495_v48 }
 0x9b5   :  { %6961 = vmatpush1.bf16.msra.mxu0 %v9064_v62  ;;  %v5359_v35 = vld [vmem:[#allocation31 + $0x268] sm:$0xff] }
 0x9b6   :  { %7002 = vmatpush1.bf16.msra.mxu1 %v9192_v63  ;;  %6962 = vmatprep.subr.bf16.mxu0 %v9185_v0  ;;  %v5483_v54 = vld [vmem:[#allocation31 + $0x648] sm:$0xff]  ;;  %v9137_v61 = vcombine.high %v5355_v56, %v5359_v35  ;;  %v9136_v2 = vcombine.low %v5355_v56, %v5359_v35 }
 0x9b7   :  { %7003 = vmatprep.subr.bf16.mxu1 %v9313_v1  ;;  %v5487_v24 = vld [vmem:[#allocation31 + $0x668] sm:$0xff] }
 0x9b8   :  { %v9265_v26 = vcombine.high %v5483_v54, %v5487_v24  ;;  %v5347_v62 = vld [vmem:[#allocation31 + $0x208] sm:$0xff]  ;;  %v9264_v11 = vcombine.low %v5483_v54, %v5487_v24 }
 0x9b9   :  { %6963 = vmatpush2.bf16.msra.mxu0 %v9184_v5  ;;  %v5351_v63 = vld [vmem:[#allocation31 + $0x228] sm:$0xff]  ;;  %v5340_v5 = vld [vmem:[#allocation31 + $0x1d0] sm:$0xff] }
 0x9ba   :  { %7004 = vmatpush2.bf16.msra.mxu1 %v9312_v6  ;;  %6964 = vmatprep.subr.bf16.mxu0 %v9177_v7  ;;  %v5475_v0 = vld [vmem:[#allocation31 + $0x608] sm:$0xff]  ;;  %v9129_v3 = vcombine.high %v5347_v62, %v5351_v63  ;;  %v5344_v6 = vld [vmem:[#allocation31 + $0x1f0] sm:$0xff]  ;;  %v9128_v25 = vcombine.low %v5347_v62, %v5351_v63 }
 0x9bb   :  { %7005 = vmatprep.subr.bf16.mxu1 %v9305_v8  ;;  %v5479_v1 = vld [vmem:[#allocation31 + $0x628] sm:$0xff]  ;;  %v5468_v7 = vld [vmem:[#allocation31 + $0x5d0] sm:$0xff]  ;;  %v9123_v29 = vcombine.high %v5340_v5, %v5344_v6 }
 0x9bc   :  { %v9257_v4 = vcombine.high %v5475_v0, %v5479_v1  ;;  %v5472_v8 = vld [vmem:[#allocation31 + $0x5f0] sm:$0xff]  ;;  %v9256_v27 = vcombine.low %v5475_v0, %v5479_v1 }
 0x9bd   :  { %6965 = vmatpush2.bf16.msra.mxu0 %v9176_v32  ;;  %v9251_v31 = vcombine.high %v5468_v7, %v5472_v8  ;;  %v5332_v32 = vld [vmem:[#allocation31 + $0x190] sm:$0xff]  ;;  %v9250_v13 = vcombine.low %v5468_v7, %v5472_v8 }
 0x9be   :  { %7006 = vmatpush2.bf16.msra.mxu1 %v9304_v33  ;;  %6966 = vmatprep.subr.bf16.mxu0 %v9169_v16  ;;  %v5336_v33 = vld [vmem:[#allocation31 + $0x1b0] sm:$0xff]  ;;  %v9122_v16 = vcombine.low %v5340_v5, %v5344_v6 }
 0x9bf   :  { %7007 = vmatprep.subr.bf16.mxu1 %v9297_v18  ;;  %v5460_v18 = vld [vmem:[#allocation31 + $0x590] sm:$0xff]  ;;  %v9115_v20 = vcombine.high %v5332_v32, %v5336_v33  ;;  %v9114_v46 = vcombine.low %v5332_v32, %v5336_v33 }
 0x9c0   :  { %v9242_v43 = vcombine.low %v5460_v18, %v5464_v22 }
 0x9c1   :  { %6967 = vmatpush2.bf16.msra.mxu0 %v9168_v37  ;;  %v5328_v37 = vld [vmem:[#allocation31 + $0x170] sm:$0xff] }
 0x9c2   :  { %7008 = vmatpush2.bf16.msra.mxu1 %v9296_v38  ;;  %6968 = vmatprep.subr.bf16.mxu0 %v9161_v41  ;;  %v9243_v38 = vcombine.high %v5460_v18, %v5464_v22  ;;  %v5452_v41 = vld [vmem:[#allocation31 + $0x550] sm:$0xff]  ;;  %v9107_v49 = vcombine.high %v5324_v30, %v5328_v37  ;;  %v9106_v9 = vcombine.low %v5324_v30, %v5328_v37 }
 0x9c3   :  { %7009 = vmatprep.subr.bf16.mxu1 %v9289_v45  ;;  %v5456_v45 = vld [vmem:[#allocation31 + $0x570] sm:$0xff] }
 0x9c4   :  { %v9235_v50 = vcombine.high %v5452_v41, %v5456_v45  ;;  %v9234_v19 = vcombine.low %v5452_v41, %v5456_v45  ;;  %v5404_v22 = vld [vmem:[#allocation31 + $0x3d0] sm:$0xff] }
 0x9c5   :  { %6969 = vmatpush2.bf16.msra.mxu0 %v9160_v17  ;;  %v5316_v17 = vld [vmem:[#allocation31 + $0x110] sm:$0xff] }
 0x9c6   :  { %7010 = vmatpush2.bf16.msra.mxu1 %v9288_v51  ;;  %6970 = vmatprep.subr.bf16.mxu0 %v9153_v52  ;;  %v5320_v51 = vld [vmem:[#allocation31 + $0x130] sm:$0xff] }
 0x9c7   :  { %7011 = vmatprep.subr.bf16.mxu1 %v9281_v55  ;;  %v5444_v52 = vld [vmem:[#allocation31 + $0x510] sm:$0xff]  ;;  %v9099_v47 = vcombine.high %v5316_v17, %v5320_v51  ;;  %v9098_v56 = vcombine.low %v5316_v17, %v5320_v51 }
 0x9c8   :  { %v5448_v55 = vld [vmem:[#allocation31 + $0x530] sm:$0xff] }
 0x9c9   :  { %6971 = vmatpush2.bf16.msra.mxu0 %v9152_v44  ;;  %v9227_v48 = vcombine.high %v5444_v52, %v5448_v55  ;;  %v5308_v44 = vld [vmem:[#allocation31 + $0xd0] sm:$0xff]  ;;  %v9226_v35 = vcombine.low %v5444_v52, %v5448_v55 }
 0x9ca   :  { %7012 = vmatpush2.bf16.msra.mxu1 %v9280_v34  ;;  %6972 = vmatprep.subr.bf16.mxu0 %v9145_v21  ;;  %v5312_v34 = vld [vmem:[#allocation31 + $0xf0] sm:$0xff] }
 0x9cb   :  { %7013 = vmatprep.subr.bf16.mxu1 %v9273_v53  ;;  %v5436_v21 = vld [vmem:[#allocation31 + $0x4d0] sm:$0xff]  ;;  %v9091_v54 = vcombine.high %v5308_v44, %v5312_v34  ;;  %v9090_v62 = vcombine.low %v5308_v44, %v5312_v34 }
 0x9cc   :  { %v5440_v53 = vld [vmem:[#allocation31 + $0x4f0] sm:$0xff] }
 0x9cd   :  { %6973 = vmatpush2.bf16.msra.mxu0 %v9144_v28  ;;  %v9219_v24 = vcombine.high %v5436_v21, %v5440_v53  ;;  %v5300_v28 = vld [vmem:[#allocation31 + $0x90] sm:$0xff]  ;;  %v9218_v63 = vcombine.low %v5436_v21, %v5440_v53 }
 0x9ce   :  { %7014 = vmatpush2.bf16.msra.mxu1 %v9272_v58  ;;  %6974 = vmatprep.subr.bf16.mxu0 %v9137_v61  ;;  %v5304_v58 = vld [vmem:[#allocation31 + $0xb0] sm:$0xff] }
 0x9cf   :  { %7015 = vmatprep.subr.bf16.mxu1 %v9265_v26  ;;  %v5428_v61 = vld [vmem:[#allocation31 + $0x490] sm:$0xff]  ;;  %v9083_v0 = vcombine.high %v5300_v28, %v5304_v58  ;;  %v9082_v5 = vcombine.low %v5300_v28, %v5304_v58 }
 0x9d0   :  { %v5432_v26 = vld [vmem:[#allocation31 + $0x4b0] sm:$0xff] }
 0x9d1   :  { %6975 = vmatpush2.bf16.msra.mxu0 %v9136_v2  ;;  %v9211_v1 = vcombine.high %v5428_v61, %v5432_v26  ;;  %v5292_v2 = vld [vmem:[#allocation31 + $0x50] sm:$0xff]  ;;  %v9210_v6 = vcombine.low %v5428_v61, %v5432_v26 }
 0x9d2   :  { %7016 = vmatpush2.bf16.msra.mxu1 %v9264_v11  ;;  %6976 = vmatprep.subr.bf16.mxu0 %v9129_v3  ;;  %v5296_v11 = vld [vmem:[#allocation31 + $0x70] sm:$0xff] }
 0x9d3   :  { %7017 = vmatprep.subr.bf16.mxu1 %v9257_v4  ;;  %v5420_v3 = vld [vmem:[#allocation31 + $0x450] sm:$0xff]  ;;  %v9075_v7 = vcombine.high %v5292_v2, %v5296_v11  ;;  %v9074_v32 = vcombine.low %v5292_v2, %v5296_v11 }
 0x9d4   :  { %v5424_v4 = vld [vmem:[#allocation31 + $0x470] sm:$0xff] }
 0x9d5   :  { %6977 = vmatpush2.bf16.msra.mxu0 %v9128_v25  ;;  %v9203_v8 = vcombine.high %v5420_v3, %v5424_v4  ;;  %v5284_v25 = vld [vmem:[#allocation31 + $0x10] sm:$0xff]  ;;  %v9202_v33 = vcombine.low %v5420_v3, %v5424_v4 }
 0x9d6   :  { %7018 = vmatpush2.bf16.msra.mxu1 %v9256_v27  ;;  %7028 = vmatprep.subr.bf16.mxu0 %v9123_v29  ;;  %v5288_v27 = vld [vmem:[#allocation31 + $0x30] sm:$0xff] }
 0x9d7   :  { %7069 = vmatprep.subr.bf16.mxu1 %v9251_v31  ;;  %v5412_v29 = vld [vmem:[#allocation31 + $0x410] sm:$0xff]  ;;  %v9066_v37 = vcombine.low %v5284_v25, %v5288_v27 }
 0x9d8   :  { %6979 = vmatmul.mubr.bf16.vlgmr.msra.gmra.mxu0 %v11423_v60  ;;  %v5416_v31 = vld [vmem:[#allocation31 + $0x430] sm:$0xff] }
 0x9d9   :  { %7020 = vmatmul.mubr.bf16.vlgmr.msra.gmra.mxu1 %v11426_v23  ;;  %7029 = vmatpush1.bf16.msra.mxu0 %v9122_v16  ;;  %v9067_v16 = vcombine.high %v5284_v25, %v5288_v27  ;;  %v9195_v18 = vcombine.high %v5412_v29, %v5416_v31  ;;  %v5536_v30 = vld [vmem:[#allocation31 + $0x7f0] sm:$0xff] }
 0x9da   :  { %7060 = vmatprep.mubr.bf16.mxu0 %v11419_v57  ;;  %7070 = vmatpush1.bf16.msra.mxu1 %v9250_v13  ;;  %v5408_v13 = vld [vmem:[#allocation31 + $0x3f0] sm:$0xff] }
 0x9db   :  { %7101 = vmatprep.mubr.bf16.mxu1 %v11421_v59  ;;  %7030 = vmatprep.subr.bf16.mxu0 %v9115_v20  ;;  %v5532_v20 = vld [vmem:[#allocation31 + $0x7d0] sm:$0xff]  ;;  %v9187_v41 = vcombine.high %v5404_v22, %v5408_v13  ;;  %v9186_v17 = vcombine.low %v5404_v22, %v5408_v13 }
 0x9dc   :  { %7071 = vmatprep.subr.bf16.mxu1 %v9243_v38  ;;  %v9194_v38 = vcombine.low %v5412_v29, %v5416_v31  ;;  %v9315_v45 = vcombine.high %v5532_v20, %v5536_v30  ;;  %v9314_v51 = vcombine.low %v5532_v20, %v5536_v30 }
 0x9dd   :  { %7031 = vmatpush1.bf16.msra.mxu0 %v9114_v46  ;;  %v5396_v46 = vld [vmem:[#allocation31 + $0x390] sm:$0xff] }
 0x9de   :  { %7072 = vmatpush1.bf16.msra.mxu1 %v9242_v43  ;;  %7032 = vmatprep.subr.bf16.mxu0 %v9107_v49  ;;  %v5400_v43 = vld [vmem:[#allocation31 + $0x3b0] sm:$0xff] }
 0x9df   :  { %7073 = vmatprep.subr.bf16.mxu1 %v9235_v50  ;;  %v5524_v49 = vld [vmem:[#allocation31 + $0x790] sm:$0xff]  ;;  %v9179_v52 = vcombine.high %v5396_v46, %v5400_v43  ;;  %v9178_v44 = vcombine.low %v5396_v46, %v5400_v43 }
 0x9e0   :  { %v5528_v50 = vld [vmem:[#allocation31 + $0x7b0] sm:$0xff] }
 0x9e1   :  { %7033 = vmatpush1.bf16.msra.mxu0 %v9106_v9  ;;  %v9307_v55 = vcombine.high %v5524_v49, %v5528_v50  ;;  %v5388_v9 = vld [vmem:[#allocation31 + $0x350] sm:$0xff]  ;;  %v9306_v34 = vcombine.low %v5524_v49, %v5528_v50 }
 0x9e2   :  { %7074 = vmatpush1.bf16.msra.mxu1 %v9234_v19  ;;  %7034 = vmatprep.subr.bf16.mxu0 %v9099_v47  ;;  %v5392_v19 = vld [vmem:[#allocation31 + $0x370] sm:$0xff] }
 0x9e3   :  { %7075 = vmatprep.subr.bf16.mxu1 %v9227_v48  ;;  %v5516_v47 = vld [vmem:[#allocation31 + $0x750] sm:$0xff]  ;;  %v9171_v21 = vcombine.high %v5388_v9, %v5392_v19  ;;  %v9170_v28 = vcombine.low %v5388_v9, %v5392_v19 }
 0x9e4   :  { %v5520_v48 = vld [vmem:[#allocation31 + $0x770] sm:$0xff] }
 0x9e5   :  { %7035 = vmatpush1.bf16.msra.mxu0 %v9098_v56  ;;  %v9299_v53 = vcombine.high %v5516_v47, %v5520_v48  ;;  %v5380_v56 = vld [vmem:[#allocation31 + $0x310] sm:$0xff]  ;;  %v9298_v58 = vcombine.low %v5516_v47, %v5520_v48 }
 0x9e6   :  { %7076 = vmatpush1.bf16.msra.mxu1 %v9226_v35  ;;  %7036 = vmatprep.subr.bf16.mxu0 %v9091_v54  ;;  %v5384_v35 = vld [vmem:[#allocation31 + $0x330] sm:$0xff] }
 0x9e7   :  { %7077 = vmatprep.subr.bf16.mxu1 %v9219_v24  ;;  %v5508_v54 = vld [vmem:[#allocation31 + $0x710] sm:$0xff]  ;;  %v9163_v61 = vcombine.high %v5380_v56, %v5384_v35  ;;  %v9162_v2 = vcombine.low %v5380_v56, %v5384_v35  ;;  %v5465_v56 = vld [vmem:[#allocation31 + $0x5b8] sm:$0xff] }
 0x9e8   :  { %v5512_v24 = vld [vmem:[#allocation31 + $0x730] sm:$0xff] }
 0x9e9   :  { %7037 = vmatpush1.bf16.msra.mxu0 %v9090_v62  ;;  %v9291_v26 = vcombine.high %v5508_v54, %v5512_v24  ;;  %v5372_v62 = vld [vmem:[#allocation31 + $0x2d0] sm:$0xff]  ;;  %v9290_v11 = vcombine.low %v5508_v54, %v5512_v24  ;;  %v5325_v24 = vld [vmem:[#allocation31 + $0x158] sm:$0xff] }
 0x9ea   :  { %7078 = vmatpush1.bf16.msra.mxu1 %v9218_v63  ;;  %7038 = vmatprep.subr.bf16.mxu0 %v9083_v0  ;;  %v5376_v63 = vld [vmem:[#allocation31 + $0x2f0] sm:$0xff] }
 0x9eb   :  { %7079 = vmatprep.subr.bf16.mxu1 %v9211_v1  ;;  %v5500_v0 = vld [vmem:[#allocation31 + $0x6d0] sm:$0xff]  ;;  %v9155_v3 = vcombine.high %v5372_v62, %v5376_v63  ;;  %v9154_v25 = vcombine.low %v5372_v62, %v5376_v63 }
 0x9ec   :  { %v5504_v1 = vld [vmem:[#allocation31 + $0x6f0] sm:$0xff] }
 0x9ed   :  { %7039 = vmatpush1.bf16.msra.mxu0 %v9082_v5  ;;  %v9283_v4 = vcombine.high %v5500_v0, %v5504_v1  ;;  %v5364_v5 = vld [vmem:[#allocation31 + $0x290] sm:$0xff]  ;;  %v9282_v27 = vcombine.low %v5500_v0, %v5504_v1 }
 0x9ee   :  { %7080 = vmatpush1.bf16.msra.mxu1 %v9210_v6  ;;  %7040 = vmatprep.subr.bf16.mxu0 %v9075_v7  ;;  %v5368_v6 = vld [vmem:[#allocation31 + $0x2b0] sm:$0xff] }
 0x9ef   :  { %7081 = vmatprep.subr.bf16.mxu1 %v9203_v8  ;;  %v5492_v7 = vld [vmem:[#allocation31 + $0x690] sm:$0xff]  ;;  %v9147_v29 = vcombine.high %v5364_v5, %v5368_v6  ;;  %v9146_v22 = vcombine.low %v5364_v5, %v5368_v6 }
 0x9f0   :  { %v5496_v8 = vld [vmem:[#allocation31 + $0x6b0] sm:$0xff] }
 0x9f1   :  { %7041 = vmatpush1.bf16.msra.mxu0 %v9074_v32  ;;  %v9275_v31 = vcombine.high %v5492_v7, %v5496_v8  ;;  %v5356_v32 = vld [vmem:[#allocation31 + $0x250] sm:$0xff]  ;;  %v9274_v13 = vcombine.low %v5492_v7, %v5496_v8  ;;  %v5309_v8 = vld [vmem:[#allocation31 + $0xd8] sm:$0xff] }
 0x9f2   :  { %7082 = vmatpush1.bf16.msra.mxu1 %v9202_v33  ;;  %7042 = vmatprep.subr.bf16.mxu0 %v9067_v16  ;;  %v5360_v33 = vld [vmem:[#allocation31 + $0x270] sm:$0xff] }
 0x9f3   :  { %7083 = vmatprep.subr.bf16.mxu1 %v9195_v18  ;;  %v5484_v16 = vld [vmem:[#allocation31 + $0x650] sm:$0xff]  ;;  %v9139_v20 = vcombine.high %v5356_v32, %v5360_v33  ;;  %v9138_v46 = vcombine.low %v5356_v32, %v5360_v33 }
 0x9f4   :  { %v5488_v18 = vld [vmem:[#allocation31 + $0x670] sm:$0xff] }
 0x9f5   :  { %7043 = vmatpush1.bf16.msra.mxu0 %v9066_v37  ;;  %v9267_v30 = vcombine.high %v5484_v16, %v5488_v18  ;;  %v5348_v37 = vld [vmem:[#allocation31 + $0x210] sm:$0xff]  ;;  %v9266_v43 = vcombine.low %v5484_v16, %v5488_v18  ;;  %v5301_v16 = vld [vmem:[#allocation31 + $0x98] sm:$0xff] }
 0x9f6   :  { %7084 = vmatpush1.bf16.msra.mxu1 %v9194_v38  ;;  %7044 = vmatprep.subr.bf16.mxu0 %v9187_v41  ;;  %v5352_v38 = vld [vmem:[#allocation31 + $0x230] sm:$0xff]  ;;  %v5305_v18 = vld [vmem:[#allocation31 + $0xb8] sm:$0xff] }
 0x9f7   :  { %7085 = vmatprep.subr.bf16.mxu1 %v9315_v45  ;;  %v5476_v41 = vld [vmem:[#allocation31 + $0x610] sm:$0xff]  ;;  %v9131_v49 = vcombine.high %v5348_v37, %v5352_v38  ;;  %v9130_v9 = vcombine.low %v5348_v37, %v5352_v38  ;;  %v9085_v37 = vcombine.high %v5301_v16, %v5305_v18 }
 0x9f8   :  { %v5480_v45 = vld [vmem:[#allocation31 + $0x630] sm:$0xff] }
 0x9f9   :  { %7045 = vmatpush2.bf16.msra.mxu0 %v9186_v17  ;;  %v9259_v50 = vcombine.high %v5476_v41, %v5480_v45  ;;  %v5341_v17 = vld [vmem:[#allocation31 + $0x1d8] sm:$0xff]  ;;  %v9258_v19 = vcombine.low %v5476_v41, %v5480_v45 }
 0x9fa   :  { %7086 = vmatpush2.bf16.msra.mxu1 %v9314_v51  ;;  %7046 = vmatprep.subr.bf16.mxu0 %v9179_v52  ;;  %v5345_v51 = vld [vmem:[#allocation31 + $0x1f8] sm:$0xff] }
 0x9fb   :  { %7087 = vmatprep.subr.bf16.mxu1 %v9307_v55  ;;  %v5469_v52 = vld [vmem:[#allocation31 + $0x5d8] sm:$0xff]  ;;  %v9125_v47 = vcombine.high %v5341_v17, %v5345_v51 }
 0x9fc   :  { %v5473_v55 = vld [vmem:[#allocation31 + $0x5f8] sm:$0xff] }
 0x9fd   :  { %7047 = vmatpush2.bf16.msra.mxu0 %v9178_v44  ;;  %v9253_v48 = vcombine.high %v5469_v52, %v5473_v55  ;;  %v5333_v44 = vld [vmem:[#allocation31 + $0x198] sm:$0xff]  ;;  %v9252_v35 = vcombine.low %v5469_v52, %v5473_v55 }
 0x9fe   :  { %7088 = vmatpush2.bf16.msra.mxu1 %v9306_v34  ;;  %7048 = vmatprep.subr.bf16.mxu0 %v9171_v21  ;;  %v5337_v34 = vld [vmem:[#allocation31 + $0x1b8] sm:$0xff]  ;;  %v9124_v21 = vcombine.low %v5341_v17, %v5345_v51 }
 0x9ff   :  { %7089 = vmatprep.subr.bf16.mxu1 %v9299_v53  ;;  %v5461_v53 = vld [vmem:[#allocation31 + $0x598] sm:$0xff]  ;;  %v9117_v54 = vcombine.high %v5333_v44, %v5337_v34  ;;  %v9116_v62 = vcombine.low %v5333_v44, %v5337_v34 }
 0xa00   :  { %v9244_v63 = vcombine.low %v5461_v53, %v5465_v56  ;;  %v5293_v41 = vld [vmem:[#allocation31 + $0x58] sm:$0xff] }
 0xa01   :  { %7049 = vmatpush2.bf16.msra.mxu0 %v9170_v28  ;;  %v5329_v28 = vld [vmem:[#allocation31 + $0x178] sm:$0xff] }
 0xa02   :  { %7090 = vmatpush2.bf16.msra.mxu1 %v9298_v58  ;;  %7050 = vmatprep.subr.bf16.mxu0 %v9163_v61  ;;  %v9245_v58 = vcombine.high %v5461_v53, %v5465_v56  ;;  %v5453_v61 = vld [vmem:[#allocation31 + $0x558] sm:$0xff]  ;;  %v9109_v0 = vcombine.high %v5325_v24, %v5329_v28  ;;  %v9108_v5 = vcombine.low %v5325_v24, %v5329_v28 }
 0xa03   :  { %7091 = vmatprep.subr.bf16.mxu1 %v9291_v26  ;;  %v5457_v26 = vld [vmem:[#allocation31 + $0x578] sm:$0xff] }
 0xa04   :  { %v9237_v1 = vcombine.high %v5453_v61, %v5457_v26  ;;  %v9236_v6 = vcombine.low %v5453_v61, %v5457_v26  ;;  %v5297_v45 = vld [vmem:[#allocation31 + $0x78] sm:$0xff] }
 0xa05   :  { %7051 = vmatpush2.bf16.msra.mxu0 %v9162_v2  ;;  %v5317_v2 = vld [vmem:[#allocation31 + $0x118] sm:$0xff]  ;;  %v9077_v17 = vcombine.high %v5293_v41, %v5297_v45 }
 0xa06   :  { %7092 = vmatpush2.bf16.msra.mxu1 %v9290_v11  ;;  %7052 = vmatprep.subr.bf16.mxu0 %v9155_v3  ;;  %v5321_v11 = vld [vmem:[#allocation31 + $0x138] sm:$0xff] }
 0xa07   :  { %7093 = vmatprep.subr.bf16.mxu1 %v9283_v4  ;;  %v5445_v3 = vld [vmem:[#allocation31 + $0x518] sm:$0xff]  ;;  %v9101_v7 = vcombine.high %v5317_v2, %v5321_v11 }
 0xa08   :  { %v5449_v4 = vld [vmem:[#allocation31 + $0x538] sm:$0xff] }
 0xa09   :  { %7053 = vmatpush2.bf16.msra.mxu0 %v9154_v25  ;;  %v5313_v25 = vld [vmem:[#allocation31 + $0xf8] sm:$0xff] }
 0xa0a   :  { %7094 = vmatpush2.bf16.msra.mxu1 %v9282_v27  ;;  %7054 = vmatprep.subr.bf16.mxu0 %v9147_v29  ;;  %v5437_v27 = vld [vmem:[#allocation31 + $0x4d8] sm:$0xff]  ;;  %v9093_v32 = vcombine.high %v5309_v8, %v5313_v25 }
 0xa0b   :  { %7095 = vmatprep.subr.bf16.mxu1 %v9275_v31  ;;  %v5441_v29 = vld [vmem:[#allocation31 + $0x4f8] sm:$0xff]  ;;  %v9228_v31 = vcombine.low %v5445_v3, %v5449_v4 }
 0xa0c   :  { %v9221_v33 = vcombine.high %v5437_v27, %v5441_v29  ;;  %v5285_v52 = vld [vmem:[#allocation31 + $0x18] sm:$0xff] }
 0xa0d   :  { %7055 = vmatpush2.bf16.msra.mxu0 %v9146_v22  ;;  %v5429_v22 = vld [vmem:[#allocation31 + $0x498] sm:$0xff] }
 0xa0e   :  { %7096 = vmatpush2.bf16.msra.mxu1 %v9274_v13  ;;  %7056 = vmatprep.subr.bf16.mxu0 %v9139_v20  ;;  %v5433_v13 = vld [vmem:[#allocation31 + $0x4b8] sm:$0xff]  ;;  %v9092_v20 = vcombine.low %v5309_v8, %v5313_v25 }
 0xa0f   :  { %7097 = vmatprep.subr.bf16.mxu1 %v9267_v30  ;;  %v9220_v30 = vcombine.low %v5437_v27, %v5441_v29  ;;  %v9213_v38 = vcombine.high %v5429_v22, %v5433_v13  ;;  %v5289_v55 = vld [vmem:[#allocation31 + $0x38] sm:$0xff] }
 0xa10   :  { %v9069_v44 = vcombine.high %v5285_v52, %v5289_v55  ;;  %v5409_v53 = vld [vmem:[#allocation31 + $0x3f8] sm:$0xff] }
 0xa11   :  { %7057 = vmatpush2.bf16.msra.mxu0 %v9138_v46  ;;  %v5421_v46 = vld [vmem:[#allocation31 + $0x458] sm:$0xff] }
 0xa12   :  { %7098 = vmatpush2.bf16.msra.mxu1 %v9266_v43  ;;  %7058 = vmatprep.subr.bf16.mxu0 %v9131_v49  ;;  %v5425_v43 = vld [vmem:[#allocation31 + $0x478] sm:$0xff]  ;;  %v9084_v49 = vcombine.low %v5301_v16, %v5305_v18 }
 0xa13   :  { %7099 = vmatprep.subr.bf16.mxu1 %v9259_v50  ;;  %v9212_v50 = vcombine.low %v5429_v22, %v5433_v13  ;;  %v9205_v51 = vcombine.high %v5421_v46, %v5425_v43  ;;  %v5533_v56 = vld [vmem:[#allocation31 + $0x7d8] sm:$0xff] }
 0xa14   :  { %v5397_v61 = vld [vmem:[#allocation31 + $0x398] sm:$0xff] }
 0xa15   :  { %7059 = vmatpush2.bf16.msra.mxu0 %v9130_v9  ;;  %v5413_v9 = vld [vmem:[#allocation31 + $0x418] sm:$0xff] }
 0xa16   :  { %7100 = vmatpush2.bf16.msra.mxu1 %v9258_v19  ;;  %7110 = vmatprep.subr.bf16.mxu0 %v9125_v47  ;;  %v5417_v19 = vld [vmem:[#allocation31 + $0x438] sm:$0xff]  ;;  %v9076_v47 = vcombine.low %v5293_v41, %v5297_v45 }
 0xa17   :  { %7151 = vmatprep.subr.bf16.mxu1 %v9253_v48  ;;  %v9204_v48 = vcombine.low %v5421_v46, %v5425_v43  ;;  %v9197_v34 = vcombine.high %v5413_v9, %v5417_v19  ;;  %v9196_v24 = vcombine.low %v5413_v9, %v5417_v19  ;;  %v5401_v26 = vld [vmem:[#allocation31 + $0x3b8] sm:$0xff] }
 0xa18   :  { %7061 = vmatmul.mubr.bf16.vlgmr.msra.gmra.mxu0 %v11423_v60  ;;  %v5381_v27 = vld [vmem:[#allocation31 + $0x318] sm:$0xff] }
 0xa19   :  { %7102 = vmatmul.mubr.bf16.vlgmr.msra.gmra.mxu1 %v11426_v23  ;;  %7111 = vmatpush1.bf16.msra.mxu0 %v9124_v21  ;;  %v5405_v21 = vld [vmem:[#allocation31 + $0x3d8] sm:$0xff] }
 0xa1a   :  { %7142 = vmatprep.mubr.bf16.mxu0 %v11419_v57  ;;  %7152 = vmatpush1.bf16.msra.mxu1 %v9252_v35  ;;  %v9229_v57 = vcombine.high %v5445_v3, %v5449_v4  ;;  %v5537_v35 = vld [vmem:[#allocation31 + $0x7f8] sm:$0xff]  ;;  %v9189_v28 = vcombine.high %v5405_v21, %v5409_v53 }
 0xa1b   :  { %7183 = vmatprep.mubr.bf16.mxu1 %v11421_v59  ;;  %7112 = vmatprep.subr.bf16.mxu0 %v9117_v54  ;;  %v9100_v59 = vcombine.low %v5317_v2, %v5321_v11  ;;  %v9068_v54 = vcombine.low %v5285_v52, %v5289_v55  ;;  %v9181_v2 = vcombine.high %v5397_v61, %v5401_v26  ;;  %v5389_v3 = vld [vmem:[#allocation31 + $0x358] sm:$0xff] }
 0xa1c   :  { %7153 = vmatprep.subr.bf16.mxu1 %v9245_v58  ;;  %v9317_v58 = vcombine.high %v5533_v56, %v5537_v35  ;;  %v5393_v4 = vld [vmem:[#allocation31 + $0x378] sm:$0xff] }
 0xa1d   :  { %7113 = vmatpush1.bf16.msra.mxu0 %v9116_v62  ;;  %v5525_v62 = vld [vmem:[#allocation31 + $0x798] sm:$0xff]  ;;  %v9173_v8 = vcombine.high %v5389_v3, %v5393_v4 }
 0xa1e   :  { %7154 = vmatpush1.bf16.msra.mxu1 %v9244_v63  ;;  %7114 = vmatprep.subr.bf16.mxu0 %v9109_v0  ;;  %v5529_v63 = vld [vmem:[#allocation31 + $0x7b8] sm:$0xff]  ;;  %v9188_v0 = vcombine.low %v5405_v21, %v5409_v53 }
 0xa1f   :  { %7155 = vmatprep.subr.bf16.mxu1 %v9237_v1  ;;  %v9316_v1 = vcombine.low %v5533_v56, %v5537_v35  ;;  %v9309_v11 = vcombine.high %v5525_v62, %v5529_v63  ;;  %v5385_v29 = vld [vmem:[#allocation31 + $0x338] sm:$0xff] }
 0xa20   :  { %v9165_v16 = vcombine.high %v5381_v27, %v5385_v29  ;;  %v5373_v22 = vld [vmem:[#allocation31 + $0x2d8] sm:$0xff] }
 0xa21   :  { %7115 = vmatpush1.bf16.msra.mxu0 %v9108_v5  ;;  %v5517_v5 = vld [vmem:[#allocation31 + $0x758] sm:$0xff] }
 0xa22   :  { %7156 = vmatpush1.bf16.msra.mxu1 %v9236_v6  ;;  %7116 = vmatprep.subr.bf16.mxu0 %v9101_v7  ;;  %v5521_v6 = vld [vmem:[#allocation31 + $0x778] sm:$0xff]  ;;  %v9180_v7 = vcombine.low %v5397_v61, %v5401_v26 }
 0xa23   :  { %7157 = vmatprep.subr.bf16.mxu1 %v9229_v57  ;;  %v9308_v57 = vcombine.low %v5525_v62, %v5529_v63  ;;  %v9301_v25 = vcombine.high %v5517_v5, %v5521_v6  ;;  %v5377_v13 = vld [vmem:[#allocation31 + $0x2f8] sm:$0xff] }
 0xa24   :  { %v9157_v41 = vcombine.high %v5373_v22, %v5377_v13  ;;  %v5365_v46 = vld [vmem:[#allocation31 + $0x298] sm:$0xff] }
 0xa25   :  { %7117 = vmatpush1.bf16.msra.mxu0 %v9100_v59  ;;  %v5509_v59 = vld [vmem:[#allocation31 + $0x718] sm:$0xff] }
 0xa26   :  { %7158 = vmatpush1.bf16.msra.mxu1 %v9228_v31  ;;  %7118 = vmatprep.subr.bf16.mxu0 %v9093_v32  ;;  %v5513_v31 = vld [vmem:[#allocation31 + $0x738] sm:$0xff]  ;;  %v9172_v32 = vcombine.low %v5389_v3, %v5393_v4  ;;  %v10231_v4 = vld [vmem:[#allocation32 + $0x64] ss:$8 sps:$4 sm:$0xff]  }
 0xa27   :  { %7159 = vmatprep.subr.bf16.mxu1 %v9221_v33  ;;  %v9300_v33 = vcombine.low %v5517_v5, %v5521_v6  ;;  %v9293_v18 = vcombine.high %v5509_v59, %v5513_v31  ;;  %v5369_v43 = vld [vmem:[#allocation31 + $0x2b8] sm:$0xff] }
 0xa28   :  { %v9149_v52 = vcombine.high %v5365_v46, %v5369_v43  ;;  %v5357_v9 = vld [vmem:[#allocation31 + $0x258] sm:$0xff] }
 0xa29   :  { %7119 = vmatpush1.bf16.msra.mxu0 %v9092_v20  ;;  %v5501_v20 = vld [vmem:[#allocation31 + $0x6d8] sm:$0xff] }
 0xa2a   :  { %7160 = vmatpush1.bf16.msra.mxu1 %v9220_v30  ;;  %7120 = vmatprep.subr.bf16.mxu0 %v9085_v37  ;;  %v5505_v30 = vld [vmem:[#allocation31 + $0x6f8] sm:$0xff]  ;;  %v9164_v37 = vcombine.low %v5381_v27, %v5385_v29  ;;  %v10229_v27 = vld [vmem:[#allocation32 + $0x60] ss:$8 sps:$4 sm:$0xff]  }
 0xa2b   :  { %7161 = vmatprep.subr.bf16.mxu1 %v9213_v38  ;;  %v9292_v38 = vcombine.low %v5509_v59, %v5513_v31  ;;  %v9285_v45 = vcombine.high %v5501_v20, %v5505_v30  ;;  %v5361_v19 = vld [vmem:[#allocation31 + $0x278] sm:$0xff]  ;;  %v10277_v31 = vld [vmem:[#allocation32 + $0x160] ss:$8 sps:$4 sm:$0xff]  }
 0xa2c   :  { %v9141_v21 = vcombine.high %v5357_v9, %v5361_v19  ;;  %v5349_v56 = vld [vmem:[#allocation31 + $0x218] sm:$0xff] }
 0xa2d   :  { %7121 = vmatpush1.bf16.msra.mxu0 %v9084_v49  ;;  %v5493_v49 = vld [vmem:[#allocation31 + $0x698] sm:$0xff] }
 0xa2e   :  { %7162 = vmatpush1.bf16.msra.mxu1 %v9212_v50  ;;  %7122 = vmatprep.subr.bf16.mxu0 %v9077_v17  ;;  %v5497_v50 = vld [vmem:[#allocation31 + $0x6b8] sm:$0xff]  ;;  %v9156_v17 = vcombine.low %v5373_v22, %v5377_v13 }
 0xa2f   :  { %7163 = vmatprep.subr.bf16.mxu1 %v9205_v51  ;;  %v9284_v51 = vcombine.low %v5501_v20, %v5505_v30  ;;  %v9277_v55 = vcombine.high %v5493_v49, %v5497_v50  ;;  %v5353_v35 = vld [vmem:[#allocation31 + $0x238] sm:$0xff] }
 0xa30   :  { %v9133_v61 = vcombine.high %v5349_v56, %v5353_v35  ;;  %v9132_v62 = vcombine.low %v5349_v56, %v5353_v35  ;;  %v10226_v3 = vld [vmem:[#allocation32 + $0x70] ss:$8 sps:$4 sm:$0xff]   ;;  %v10234_v59 = vld [vmem:[#allocation32 + $0x54] ss:$8 sps:$4 sm:$0xff]   ;;  %v10291_v35 = vld [vmem:[#allocation32 + $0x124] ss:$8 sps:$4 sm:$0xff]  }
 0xa31   :  { %7123 = vmatpush1.bf16.msra.mxu0 %v9076_v47  ;;  %v5485_v47 = vld [vmem:[#allocation31 + $0x658] sm:$0xff] }
 0xa32   :  { %7164 = vmatpush1.bf16.msra.mxu1 %v9204_v48  ;;  %7124 = vmatprep.subr.bf16.mxu0 %v9069_v44  ;;  %v5489_v48 = vld [vmem:[#allocation31 + $0x678] sm:$0xff]  ;;  %v9148_v44 = vcombine.low %v5365_v46, %v5369_v43  ;;  %v10285_v43 = vld [vmem:[#allocation32 + $0x144] ss:$8 sps:$4 sm:$0xff]  }
 0xa33   :  { %7165 = vmatprep.subr.bf16.mxu1 %v9197_v34  ;;  %v9276_v34 = vcombine.low %v5493_v49, %v5497_v50  ;;  %v9269_v53 = vcombine.high %v5485_v47, %v5489_v48  ;;  %v10274_v5 = vld [vmem:[#allocation32 + $0x170] ss:$8 sps:$4 sm:$0xff]  }
 0xa35   :  { %7125 = vmatpush1.bf16.msra.mxu0 %v9068_v54  ;;  %v5477_v54 = vld [vmem:[#allocation31 + $0x618] sm:$0xff] }
 0xa36   :  { %7166 = vmatpush1.bf16.msra.mxu1 %v9196_v24  ;;  %7126 = vmatprep.subr.bf16.mxu0 %v9189_v28  ;;  %v5481_v24 = vld [vmem:[#allocation31 + $0x638] sm:$0xff]  ;;  %v9140_v28 = vcombine.low %v5357_v9, %v5361_v19 }
 0xa37   :  { %7167 = vmatprep.subr.bf16.mxu1 %v9317_v58  ;;  %v9268_v58 = vcombine.low %v5485_v47, %v5489_v48  ;;  %v9261_v26 = vcombine.high %v5477_v54, %v5481_v24  ;;  %v9260_v63 = vcombine.low %v5477_v54, %v5481_v24  ;;  %v10288_v19 = vld [vmem:[#allocation32 + $0x134] ss:$8 sps:$4 sm:$0xff]  }
 0xa39   :  { %7127 = vmatpush2.bf16.msra.mxu0 %v9188_v0  ;;  %v11448_v0 = vld [vmem:[%s11556_s27] sm:$0xff] }
 0xa3a   :  { %7168 = vmatpush2.bf16.msra.mxu1 %v9316_v1  ;;  %7128 = vmatprep.subr.bf16.mxu0 %v9181_v2  ;;  %v10228_v1 = vld [vmem:[#allocation32 + $0x74] ss:$8 sps:$4 sm:$0xff]   ;;  %v5551_v6 = vrot.slane %v11448_v0, %v11225_v14 }
 0xa3b   :  { %7169 = vmatprep.subr.bf16.mxu1 %v9309_v11  ;;  %v10276_v2 = vld [vmem:[#allocation32 + $0x174] ss:$8 sps:$4 sm:$0xff]   ;;  %v5547_v11 = vrot.slane %v11448_v0, %v11216_v10 }
 0xa3d   :  { %7129 = vmatpush2.bf16.msra.mxu0 %v9180_v7  ;;  %v10279_v7 = vld [vmem:[#allocation32 + $0x164] ss:$8 sps:$4 sm:$0xff]  }
 0xa3e   :  { %7170 = vmatpush2.bf16.msra.mxu1 %v9308_v57  ;;  %7130 = vmatprep.subr.bf16.mxu0 %v9173_v8 }
 0xa3f   :  { %7171 = vmatprep.subr.bf16.mxu1 %v9301_v25 }
 0xa41   :  { %7131 = vmatpush2.bf16.msra.mxu0 %v9172_v32 }
 0xa42   :  { %7172 = vmatpush2.bf16.msra.mxu1 %v9300_v33  ;;  %7132 = vmatprep.subr.bf16.mxu0 %v9165_v16 }
 0xa43   :  { %7173 = vmatprep.subr.bf16.mxu1 %v9293_v18  ;;  %v10282_v18 = vld [vmem:[#allocation32 + $0x154] ss:$8 sps:$4 sm:$0xff]  }
 0xa45   :  { %7133 = vmatpush2.bf16.msra.mxu0 %v9164_v37  ;;  %v10237_v37 = vld [vmem:[#allocation32 + $0x44] ss:$8 sps:$4 sm:$0xff]  }
 0xa46   :  { %7174 = vmatpush2.bf16.msra.mxu1 %v9292_v38  ;;  %7134 = vmatprep.subr.bf16.mxu0 %v9157_v41  ;;  %v10280_v38 = vld [vmem:[#allocation32 + $0x150] ss:$8 sps:$4 sm:$0xff]  }
 0xa47   :  { %7175 = vmatprep.subr.bf16.mxu1 %v9285_v45 }
 0xa49   :  { %7135 = vmatpush2.bf16.msra.mxu0 %v9156_v17  ;;  %v10235_v17 = vld [vmem:[#allocation32 + $0x40] ss:$8 sps:$4 sm:$0xff]  }
 0xa4a   :  { %7176 = vmatpush2.bf16.msra.mxu1 %v9284_v51  ;;  %7136 = vmatprep.subr.bf16.mxu0 %v9149_v52  ;;  %v10240_v51 = vld [vmem:[#allocation32 + $0x34] ss:$8 sps:$4 sm:$0xff]   ;;  %v10283_v52 = vld [vmem:[#allocation32 + $0x140] ss:$8 sps:$4 sm:$0xff]  }
 0xa4b   :  { %7177 = vmatprep.subr.bf16.mxu1 %v9277_v55 }
 0xa4d   :  { %7137 = vmatpush2.bf16.msra.mxu0 %v9148_v44  ;;  %v10238_v44 = vld [vmem:[#allocation32 + $0x30] ss:$8 sps:$4 sm:$0xff]  }
 0xa4e   :  { %7178 = vmatpush2.bf16.msra.mxu1 %v9276_v34  ;;  %7138 = vmatprep.subr.bf16.mxu0 %v9141_v21  ;;  %v10243_v34 = vld [vmem:[#allocation32 + $0x24] ss:$8 sps:$4 sm:$0xff]   ;;  %v10286_v21 = vld [vmem:[#allocation32 + $0x130] ss:$8 sps:$4 sm:$0xff]  }
 0xa4f   :  { %7179 = vmatprep.subr.bf16.mxu1 %v9269_v53 }
 0xa51   :  { %7139 = vmatpush2.bf16.msra.mxu0 %v9140_v28  ;;  %v10241_v28 = vld [vmem:[#allocation32 + $0x20] ss:$8 sps:$4 sm:$0xff]  }
 0xa52   :  { %7180 = vmatpush2.bf16.msra.mxu1 %v9268_v58  ;;  %7140 = vmatprep.subr.bf16.mxu0 %v9133_v61  ;;  %v10246_v58 = vld [vmem:[#allocation32 + $0x14] ss:$8 sps:$4 sm:$0xff]   ;;  %v10289_v61 = vld [vmem:[#allocation32 + $0x120] ss:$8 sps:$4 sm:$0xff]  }
 0xa53   :  { %7181 = vmatprep.subr.bf16.mxu1 %v9261_v26 }
 0xa55   :  { %7141 = vmatpush2.bf16.msra.mxu0 %v9132_v62 }
 0xa56   :  { %7182 = vmatpush2.bf16.msra.mxu1 %v9260_v63  ;;  %8256 = vmatprep.subr.bf16.mxu0 %v10228_v1  ;;  %v10294_v63 = vld [vmem:[#allocation32 + $0x114] ss:$8 sps:$4 sm:$0xff]  }
 0xa57   :  { %8297 = vmatprep.subr.bf16.mxu1 %v10276_v2 }
 0xa58   :  { %7143 = vmatmul.mubr.bf16.vlgmr.msra.gmra.mxu0 %v11423_v60  ;;  %v6898_v57 = vpop.f32.mrf.mxu0 }
 0xa59   :  { %7184 = vmatmul.mubr.bf16.vlgmr.msra.gmra.mxu1 %v11426_v23  ;;  %v6899_v8 = vadd.f32 %v6898_v57, %v5547_v11  ;;  %v6939_v25 = vpop.f32.mrf.mxu1  ;;  %8257 = vmatpush1.bf16.msra.mxu0 %v10226_v3  ;;  %v10232_v23 = vld [vmem:[#allocation32 + $0x50] ss:$8 sps:$4 sm:$0xff]   ;;  %v10249_v3 = vld [vmem:[#allocation32 + $0x4] ss:$8 sps:$4 sm:$0xff]  }
 0xa5a   :  { %v6900_v29 = vpop.f32.mrf.mxu0  ;;  %8258 = vmatprep.subr.bf16.mxu0 %v10231_v4  ;;  %8298 = vmatpush1.bf16.msra.mxu1 %v10274_v5  ;;  %v10244_v11 = vld [vmem:[#allocation32 + $0x10] ss:$8 sps:$4 sm:$0xff]  }
 0xa5b   :  { %v6940_v32 = vadd.f32 %v6939_v25, %v6899_v8  ;;  %v6901_v33 = vadd.f32 %v6900_v29, %v5551_v6  ;;  %v6941_v16 = vpop.f32.mrf.mxu1  ;;  %8299 = vmatprep.subr.bf16.mxu1 %v10279_v7  ;;  %v10292_v4 = vld [vmem:[#allocation32 + $0x110] ss:$8 sps:$4 sm:$0xff]   ;;  %v10297_v7 = vld [vmem:[#allocation32 + $0x104] ss:$8 sps:$4 sm:$0xff]   ;;  %v10247_v25 = vld [vmem:[#allocation32] ss:$8 sps:$4 sm:$0xff]  }
 0xa5c   :  { %v6902_v22 = vpop.f32.mrf.mxu0  ;;  %v10295_v29 = vld [vmem:[#allocation32 + $0x100] ss:$8 sps:$4 sm:$0xff]  }
 0xa5d   :  { %v7194_v13 = vrot.slane %v6940_v32, 4  ;;  %v6942_v60 = vadd.f32 %v6941_v16, %v6901_v33  ;;  %v6943_v20 = vpop.f32.mrf.mxu1  ;;  %8259 = vmatpush1.bf16.msra.mxu0 %v10229_v27  ;;  %v10252_v27 = vld [vmem:[#allocation32 + $0xf4] ss:$8 sps:$4 sm:$0xff]   ;;  %v10255_v22 = vld [vmem:[#allocation32 + $0xe4] ss:$8 sps:$4 sm:$0xff]  }
 0xa5e   :  { %v6903_v30 = vpop.f32.mrf.mxu0  ;;  %8260 = vmatprep.subr.bf16.mxu0 %v10234_v59  ;;  %8300 = vmatpush1.bf16.msra.mxu1 %v10277_v31 }
 0xa5f   :  { %v7195_v41 = vadd.f32 %v7194_v13, %v6940_v32  ;;  %v7200_v45 = vrot.slane %v6942_v60, 4  ;;  %v6944_v46 = vpop.f32.mrf.mxu1  ;;  %8301 = vmatprep.subr.bf16.mxu1 %v10282_v18  ;;  %v10250_v18 = vld [vmem:[#allocation32 + $0xf0] ss:$8 sps:$4 sm:$0xff]  }
 0xa60   :  { %v10298_v13 = vld [vmem:[#allocation32 + $0x1f0] ss:$8 sps:$4 sm:$0xff]  }
 0xa61   :  { %v7196_v49 = vrot.slane %v7195_v41, 2  ;;  %v7201_v50 = vadd.f32 %v7200_v45, %v6942_v60  ;;  %8261 = vmatpush1.bf16.msra.mxu0 %v10232_v23  ;;  %v10303_v23 = vld [vmem:[#allocation32 + $0x1e4] ss:$8 sps:$4 sm:$0xff]   ;;  %v10301_v45 = vld [vmem:[#allocation32 + $0x1e0] ss:$8 sps:$4 sm:$0xff]  }
 0xa62   :  { %8262 = vmatprep.subr.bf16.mxu0 %v10237_v37  ;;  %8302 = vmatpush1.bf16.msra.mxu1 %v10280_v38  ;;  %v10253_v38 = vld [vmem:[#allocation32 + $0xe0] ss:$8 sps:$4 sm:$0xff]  }
 0xa63   :  { %v7197_v55 = vadd.f32 %v7196_v49, %v7195_v41  ;;  %v7202_v9 = vrot.slane %v7201_v50, 2  ;;  %8303 = vmatprep.subr.bf16.mxu1 %v10285_v43  ;;  %v10258_v41 = vld [vmem:[#allocation32 + $0xd4] ss:$8 sps:$4 sm:$0xff]  }
 0xa64   :  { %v10306_v49 = vld [vmem:[#allocation32 + $0x1d4] ss:$8 sps:$4 sm:$0xff]  }
 0xa65   :  { %v7198_v47 = vrot.slane %v7197_v55, 1  ;;  %v7203_v48 = vadd.f32 %v7202_v9, %v7201_v50  ;;  %8263 = vmatpush1.bf16.msra.mxu0 %v10235_v17 }
 0xa66   :  { %8264 = vmatprep.subr.bf16.mxu0 %v10240_v51  ;;  %8304 = vmatpush1.bf16.msra.mxu1 %v10283_v52  ;;  %v10256_v51 = vld [vmem:[#allocation32 + $0xd0] ss:$8 sps:$4 sm:$0xff]   ;;  %v10261_v52 = vld [vmem:[#allocation32 + $0xc4] ss:$8 sps:$4 sm:$0xff]  }
 0xa67   :  { %v7199_v53 = vadd.f32 %v7198_v47, %v7197_v55  ;;  %v7204_v56 = vrot.slane %v7203_v48, 1  ;;  %8305 = vmatprep.subr.bf16.mxu1 %v10288_v19  ;;  %v10304_v55 = vld [vmem:[#allocation32 + $0x1d0] ss:$8 sps:$4 sm:$0xff]   ;;  %v10309_v19 = vld [vmem:[#allocation32 + $0x1c4] ss:$8 sps:$4 sm:$0xff]  }
 0xa68   :  { %v10259_v47 = vld [vmem:[#allocation32 + $0xc0] ss:$8 sps:$4 sm:$0xff]  }
 0xa69   :  { %v7242_v54 = vmul.f32 0.125, %v7199_v53  ;;  %v7205_v24 = vadd.f32 %v7204_v56, %v7203_v48  ;;  %8265 = vmatpush1.bf16.msra.mxu0 %v10238_v44  ;;  %v10264_v48 = vld [vmem:[#allocation32 + $0xb4] ss:$8 sps:$4 sm:$0xff]   ;;  %v10307_v44 = vld [vmem:[#allocation32 + $0x1c0] ss:$8 sps:$4 sm:$0xff]  }
 0xa6a   :  { %8266 = vmatprep.subr.bf16.mxu0 %v10243_v34  ;;  %8306 = vmatpush1.bf16.msra.mxu1 %v10286_v21  ;;  %v10312_v34 = vld [vmem:[#allocation32 + $0x1b4] ss:$8 sps:$4 sm:$0xff]   ;;  %v10262_v21 = vld [vmem:[#allocation32 + $0xb0] ss:$8 sps:$4 sm:$0xff]   ;;  %v10267_v53 = vld [vmem:[#allocation32 + $0xa4] ss:$8 sps:$4 sm:$0xff]  }
 0xa6b   :  { %v11456_v26 = vsub.f32 %v6940_v32, %v7242_v54  ;;  %v7243_v62 = vmul.f32 0.125, %v7205_v24  ;;  %8307 = vmatprep.subr.bf16.mxu1 %v10291_v35  ;;  %v10300_v32 = vld [vmem:[#allocation32 + $0x1f4] ss:$8 sps:$4 sm:$0xff]   ;;  %v10310_v56 = vld [vmem:[#allocation32 + $0x1b0] ss:$8 sps:$4 sm:$0xff]   ;;  %v11465_v54 = vld [vmem:[%s11557_s19] sm:$0xff] }
 0xa6c   :  { %v10315_v35 = vld [vmem:[#allocation32 + $0x1a4] ss:$8 sps:$4 sm:$0xff]   ;;  %v10265_v24 = vld [vmem:[#allocation32 + $0xa0] ss:$8 sps:$4 sm:$0xff]  }
 0xa6d   :  { %v7258_v1 = vmul.f32 %v11456_v26, %v11456_v26  ;;  %v11460_v2 = vsub.f32 %v6942_v60, %v7243_v62  ;;  %8267 = vmatpush1.bf16.msra.mxu0 %v10241_v28  ;;  %v11468_v28 = vld [vmem:[%s11558_s3] sm:$0xff]  ;;  %v7350_v62 = vrot.slane %v11465_v54, %v11216_v10 }
 0xa6e   :  { %8268 = vmatprep.subr.bf16.mxu0 %v10246_v58  ;;  %8308 = vmatpush1.bf16.msra.mxu1 %v10289_v61  ;;  %v10270_v58 = vld [vmem:[#allocation32 + $0x94] ss:$8 sps:$4 sm:$0xff]   ;;  %v10313_v61 = vld [vmem:[#allocation32 + $0x1a0] ss:$8 sps:$4 sm:$0xff]  }
 0xa6f   :  { %v7266_v5 = vrot.slane %v7258_v1, 4  ;;  %v7259_v6 = vmul.f32 %v11460_v2, %v11460_v2  ;;  %8309 = vmatprep.subr.bf16.mxu1 %v10294_v63  ;;  %v10318_v63 = vld [vmem:[#allocation32 + $0x194] ss:$8 sps:$4 sm:$0xff]  }
 0xa71   :  { %v7267_v57 = vadd.f32 %v7266_v5, %v7258_v1  ;;  %v7272_v8 = vrot.slane %v7259_v6, 4  ;;  %8269 = vmatpush1.bf16.msra.mxu0 %v10244_v11  ;;  %v10268_v5 = vld [vmem:[#allocation32 + $0x90] ss:$8 sps:$4 sm:$0xff]  }
 0xa72   :  { %8270 = vmatprep.subr.bf16.mxu0 %v10249_v3  ;;  %8310 = vmatpush1.bf16.msra.mxu1 %v10292_v4  ;;  %v7399_v3 = vrot.slane %v11468_v28, %v11216_v10  ;;  %v7354_v4 = vrot.slane %v11465_v54, %v11225_v14 }
 0xa73   :  { %v7268_v59 = vrot.slane %v7267_v57, 2  ;;  %v7273_v31 = vadd.f32 %v7272_v8, %v7259_v6  ;;  %8311 = vmatprep.subr.bf16.mxu1 %v10297_v7  ;;  %v10273_v7 = vld [vmem:[#allocation32 + $0x84] ss:$8 sps:$4 sm:$0xff]  }
 0xa75   :  { %v7269_v33 = vadd.f32 %v7268_v59, %v7267_v57  ;;  %v7274_v16 = vrot.slane %v7273_v31, 2  ;;  %8271 = vmatpush1.bf16.msra.mxu0 %v10247_v25  ;;  %v10316_v57 = vld [vmem:[#allocation32 + $0x190] ss:$8 sps:$4 sm:$0xff]  }
 0xa76   :  { %8272 = vmatprep.subr.bf16.mxu0 %v10252_v27  ;;  %8312 = vmatpush1.bf16.msra.mxu1 %v10295_v29  ;;  %v7403_v27 = vrot.slane %v11468_v28, %v11225_v14 }
 0xa77   :  { %v7270_v60 = vrot.slane %v7269_v33, 1  ;;  %v7275_v20 = vadd.f32 %v7274_v16, %v7273_v31  ;;  %8313 = vmatprep.subr.bf16.mxu1 %v10300_v32  ;;  %v10271_v31 = vld [vmem:[#allocation32 + $0x80] ss:$8 sps:$4 sm:$0xff]  }
 0xa78   :  { %v10319_v32 = vld [vmem:[#allocation32 + $0x180] ss:$8 sps:$4 sm:$0xff]  }
 0xa79   :  { %v7271_v30 = vadd.f32 %v7270_v60, %v7269_v33  ;;  %v7276_v37 = vrot.slane %v7275_v20, 1  ;;  %8273 = vmatpush2.bf16.msra.mxu0 %v10250_v18  ;;  %v10324_v33 = vld [vmem:[#allocation32 + $0x274] ss:$8 sps:$4 sm:$0xff]   ;;  %v5559_v60 = vrot.slane %v11448_v0, %v11228_v15 }
 0xa7a   :  { %8274 = vmatprep.subr.bf16.mxu0 %v10255_v22  ;;  %8314 = vmatpush2.bf16.msra.mxu1 %v10298_v13 }
 0xa7b   :  { %v7314_v46 = vmul.f32 0.125, %v7271_v30  ;;  %v7277_v43 = vadd.f32 %v7276_v37, %v7275_v20  ;;  %8315 = vmatprep.subr.bf16.mxu1 %v10303_v23  ;;  %v10322_v37 = vld [vmem:[#allocation32 + $0x270] ss:$8 sps:$4 sm:$0xff]  }
 0xa7d   :  { %v7322_v50 = vadd.f32 1e-05, %v7314_v46  ;;  %v7315_v17 = vmul.f32 0.125, %v7277_v43  ;;  %8275 = vmatpush2.bf16.msra.mxu0 %v10253_v38  ;;  %v10327_v46 = vld [vmem:[#allocation32 + $0x264] ss:$8 sps:$4 sm:$0xff]  }
 0xa7e   :  { %8276 = vmatprep.subr.bf16.mxu0 %v10258_v41  ;;  %8316 = vmatpush2.bf16.msra.mxu1 %v10301_v45 }
 0xa7f   :  { %10444 = vrsqrt.f32 %v7322_v50  ;;  %v7323_v9 = vadd.f32 1e-05, %v7315_v17  ;;  %8317 = vmatprep.subr.bf16.mxu1 %v10306_v49 }
 0xa81   :  { %10446 = vrsqrt.f32 %v7323_v9  ;;  %8277 = vmatpush2.bf16.msra.mxu0 %v10256_v51  ;;  %v10372_v51 = vld [vmem:[#allocation32 + $0x374] ss:$8 sps:$4 sm:$0xff]  }
 0xa82   :  { %8278 = vmatprep.subr.bf16.mxu0 %v10261_v52  ;;  %8318 = vmatpush2.bf16.msra.mxu1 %v10304_v55  ;;  %v10325_v55 = vld [vmem:[#allocation32 + $0x260] ss:$8 sps:$4 sm:$0xff]  }
 0xa83   :  { %8319 = vmatprep.subr.bf16.mxu1 %v10309_v19 }
 0xa85   :  { %8279 = vmatpush2.bf16.msra.mxu0 %v10259_v47 }
 0xa86   :  { %8280 = vmatprep.subr.bf16.mxu0 %v10264_v48  ;;  %8320 = vmatpush2.bf16.msra.mxu1 %v10307_v44  ;;  %v10330_v48 = vld [vmem:[#allocation32 + $0x254] ss:$8 sps:$4 sm:$0xff]  }
 0xa87   :  { %8321 = vmatprep.subr.bf16.mxu1 %v10312_v34 }
 0xa89   :  { %8281 = vmatpush2.bf16.msra.mxu0 %v10262_v21 }
 0xa8a   :  { %8282 = vmatprep.subr.bf16.mxu0 %v10267_v53  ;;  %8322 = vmatpush2.bf16.msra.mxu1 %v10310_v56  ;;  %v10328_v56 = vld [vmem:[#allocation32 + $0x250] ss:$8 sps:$4 sm:$0xff]  }
 0xa8b   :  { %8323 = vmatprep.subr.bf16.mxu1 %v10315_v35 }
 0xa8c   :  { %v10445_v1 = vpop.eup %10444 }
 0xa8d   :  { %v7338_v11 = vmul.f32 %v10445_v1, %v11456_v26  ;;  %8283 = vmatpush2.bf16.msra.mxu0 %v10265_v24  ;;  %v10321_v26 = vld [vmem:[#allocation32 + $0x184] ss:$8 sps:$4 sm:$0xff]  }
 0xa8e   :  { %v10447_v6 = vpop.eup %10446  ;;  %8284 = vmatprep.subr.bf16.mxu0 %v10270_v58  ;;  %8324 = vmatpush2.bf16.msra.mxu1 %v10313_v61  ;;  %v10333_v58 = vld [vmem:[#allocation32 + $0x244] ss:$8 sps:$4 sm:$0xff]  }
 0xa8f   :  { %v7387_v8 = vmul.f32 %v7350_v62, %v7338_v11  ;;  %v7339_v25 = vmul.f32 %v10447_v6, %v11460_v2  ;;  %8325 = vmatprep.subr.bf16.mxu1 %v10318_v63  ;;  %v5555_v2 = vrot.slane %v11448_v0, %v11222_v12  ;;  %v10331_v63 = vld [vmem:[#allocation32 + $0x240] ss:$8 sps:$4 sm:$0xff]   ;;  %v10334_v6 = vld [vmem:[#allocation32 + $0x230] ss:$8 sps:$4 sm:$0xff]  }
 0xa91   :  { %v7436_v29 = vadd.f32 %v7399_v3, %v7387_v8  ;;  %v7388_v59 = vmul.f32 %v7354_v4, %v7339_v25  ;;  %8285 = vmatpush2.bf16.msra.mxu0 %v10268_v5  ;;  %v10336_v3 = vld [vmem:[#allocation32 + $0x234] ss:$8 sps:$4 sm:$0xff]   ;;  %v10339_v8 = vld [vmem:[#allocation32 + $0x224] ss:$8 sps:$4 sm:$0xff]  }
 0xa92   :  { %8286 = vmatprep.subr.bf16.mxu0 %v10273_v7  ;;  %8326 = vmatpush2.bf16.msra.mxu1 %v10316_v57 }
 0xa93   :  { %v7437_v16 = vadd.f32 %v7403_v27, %v7388_v59  ;;  %vm7444_vm9 = vcmp.ge.f32.partialorder %v7436_v29, 0.0  ;;  %v7452_v18 = vmul.f32 0.2, %v7436_v29  ;;  %8327 = vmatprep.subr.bf16.mxu1 %v10321_v26  ;;  %v10337_v26 = vld [vmem:[#allocation32 + $0x220] ss:$8 sps:$4 sm:$0xff]  }
 0xa95   :  { %8287 = vmatpush2.bf16.msra.mxu0 %v10271_v31  ;;  %vm7445_vm10 = vcmp.ge.f32.partialorder %v7437_v16, 0.0  ;;  %v7453_v22 = vmul.f32 0.2, %v7437_v16  ;;  %v7460_v13 = vsel %vm7444_vm9, %v7436_v29, %v7452_v18  ;;  %v10342_v31 = vld [vmem:[#allocation32 + $0x214] ss:$8 sps:$4 sm:$0xff]  }
 0xa96   :  { %8328 = vmatpush2.bf16.msra.mxu1 %v10319_v32  ;;  %8338 = vmatprep.subr.bf16.mxu0 %v10324_v33  ;;  %v7597_v45 = vpack.c.bf16 %v7460_v13, %v7460_v13 }
 0xa97   :  { %v7461_v20 = vsel %vm7445_vm10, %v7437_v16, %v7453_v22  ;;  %8379 = vmatprep.subr.bf16.mxu1 %v10372_v51  ;;  %v10340_v16 = vld [vmem:[#allocation32 + $0x210] ss:$8 sps:$4 sm:$0xff]   ;;  %v10345_v22 = vld [vmem:[#allocation32 + $0x204] ss:$8 sps:$4 sm:$0xff]   ;;  %v10349_v51 = vld [vmem:[#allocation32 + $0x2e0] ss:$8 sps:$4 sm:$0xff]  }
 0xa98   :  { %v6980_v23 = vpop.f32.mrf.mxu0  ;;  %v7598_v30 = vpack.c.bf16 %v7461_v20, %v7461_v20  ;;  %v10343_v20 = vld [vmem:[#allocation32 + $0x200] ss:$8 sps:$4 sm:$0xff]  }
 0xa99   :  { %v6981_v38 = vadd.f32 %v6980_v23, %v5555_v2  ;;  %v7021_v41 = vpop.f32.mrf.mxu1 }
 0xa9a   :  { %v6982_v43 = vpop.f32.mrf.mxu0  ;;  %8288 = vmatprep.mubr.bf16.mxu0 %v7598_v30 }
 0xa9b   :  { %v7022_v49 = vadd.f32 %v7021_v41, %v6981_v38  ;;  %v6983_v50 = vadd.f32 %v6982_v43, %v5559_v60  ;;  %v7023_v17 = vpop.f32.mrf.mxu1  ;;  %8289 = vmatmul.mubr.bf16.vlgmr.msra.gmra.mxu0 %v7597_v45  ;;  %v10346_v45 = vld [vmem:[#allocation32 + $0x2f0] ss:$8 sps:$4 sm:$0xff]  }
 0xa9c   :  { %v6984_v52 = vpop.f32.mrf.mxu0  ;;  %8339 = vmatpush1.bf16.msra.mxu0 %v10322_v37  ;;  %v10348_v37 = vld [vmem:[#allocation32 + $0x2f4] ss:$8 sps:$4 sm:$0xff]  }
 0xa9d   :  { %v7206_v9 = vrot.slane %v7022_v49, 4  ;;  %v7024_v19 = vadd.f32 %v7023_v17, %v6983_v50  ;;  %v7025_v47 = vpop.f32.mrf.mxu1  ;;  %8340 = vmatprep.subr.bf16.mxu0 %v10327_v46 }
 0xa9e   :  { %v6985_v44 = vpop.f32.mrf.mxu0  ;;  %v10352_v47 = vld [vmem:[#allocation32 + $0x2d0] ss:$8 sps:$4 sm:$0xff]  }
 0xa9f   :  { %v7207_v34 = vadd.f32 %v7206_v9, %v7022_v49  ;;  %v7212_v21 = vrot.slane %v7024_v19, 4  ;;  %v7026_v53 = vpop.f32.mrf.mxu1  ;;  %v10354_v9 = vld [vmem:[#allocation32 + $0x2d4] ss:$8 sps:$4 sm:$0xff]   ;;  %v10355_v44 = vld [vmem:[#allocation32 + $0x2c0] ss:$8 sps:$4 sm:$0xff]  }
 0xaa0   :  { %8341 = vmatpush1.bf16.msra.mxu0 %v10325_v55  ;;  %v10363_v53 = vld [vmem:[#allocation32 + $0x2a4] ss:$8 sps:$4 sm:$0xff]  }
 0xaa1   :  { %v7208_v35 = vrot.slane %v7207_v34, 2  ;;  %v7213_v24 = vadd.f32 %v7212_v21, %v7024_v19  ;;  %8342 = vmatprep.subr.bf16.mxu0 %v10330_v48  ;;  %v10357_v48 = vld [vmem:[#allocation32 + $0x2c4] ss:$8 sps:$4 sm:$0xff]   ;;  %v10358_v21 = vld [vmem:[#allocation32 + $0x2b0] ss:$8 sps:$4 sm:$0xff]  }
 0xaa3   :  { %v7209_v61 = vadd.f32 %v7208_v35, %v7207_v34  ;;  %v7214_v62 = vrot.slane %v7213_v24, 2  ;;  %v10360_v34 = vld [vmem:[#allocation32 + $0x2b4] ss:$8 sps:$4 sm:$0xff]  }
 0xaa4   :  { %8343 = vmatpush1.bf16.msra.mxu0 %v10328_v56  ;;  %v7358_v56 = vrot.slane %v11465_v54, %v11222_v12 }
 0xaa5   :  { %v7210_v1 = vrot.slane %v7209_v61, 1  ;;  %v7215_v11 = vadd.f32 %v7214_v62, %v7213_v24  ;;  %8344 = vmatprep.subr.bf16.mxu0 %v10333_v58  ;;  %v10361_v24 = vld [vmem:[#allocation32 + $0x2a0] ss:$8 sps:$4 sm:$0xff]   ;;  %v7362_v62 = vrot.slane %v11465_v54, %v11228_v15 }
 0xaa7   :  { %v7211_v4 = vadd.f32 %v7210_v1, %v7209_v61  ;;  %v7216_v5 = vrot.slane %v7215_v11, 1  ;;  %v7407_v61 = vrot.slane %v11468_v28, %v11222_v12 }
 0xaa8   :  { %8345 = vmatpush1.bf16.msra.mxu0 %v10331_v63  ;;  %v10366_v63 = vld [vmem:[#allocation32 + $0x294] ss:$8 sps:$4 sm:$0xff]  }
 0xaa9   :  { %v7244_v7 = vmul.f32 0.125, %v7211_v4  ;;  %v7217_v57 = vadd.f32 %v7216_v5, %v7215_v11  ;;  %8346 = vmatprep.subr.bf16.mxu0 %v10336_v3  ;;  %v7411_v4 = vrot.slane %v11468_v28, %v11228_v15  ;;  %v10364_v5 = vld [vmem:[#allocation32 + $0x290] ss:$8 sps:$4 sm:$0xff]   ;;  %v5567_v15 = vrot.slane %v11448_v0, %v11257_v40 }
 0xaab   :  { %v7252_v25 = vsub.f32 %v7022_v49, %v7244_v7  ;;  %v7245_v27 = vmul.f32 0.125, %v7217_v57  ;;  %v10351_v49 = vld [vmem:[#allocation32 + $0x2e4] ss:$8 sps:$4 sm:$0xff]  }
 0xaac   :  { %8347 = vmatpush1.bf16.msra.mxu0 %v10334_v6  ;;  %v10369_v57 = vld [vmem:[#allocation32 + $0x284] ss:$8 sps:$4 sm:$0xff]  }
 0xaad   :  { %v7260_v29 = vmul.f32 %v7252_v25, %v7252_v25  ;;  %v7253_v59 = vsub.f32 %v7024_v19, %v7245_v27  ;;  %8348 = vmatprep.subr.bf16.mxu0 %v10339_v8  ;;  %v5563_v27 = vrot.slane %v11448_v0, %v11251_v36 }
 0xaaf   :  { %v7278_v32 = vrot.slane %v7260_v29, 4  ;;  %v7261_v33 = vmul.f32 %v7253_v59, %v7253_v59 }
 0xab0   :  { %8349 = vmatpush1.bf16.msra.mxu0 %v10337_v26 }
 0xab1   :  { %v7279_v18 = vadd.f32 %v7278_v32, %v7260_v29  ;;  %v7284_v2 = vrot.slane %v7261_v33, 4  ;;  %8350 = vmatprep.subr.bf16.mxu0 %v10342_v31 }
 0xab3   :  { %v7280_v13 = vrot.slane %v7279_v18, 2  ;;  %v7285_v60 = vadd.f32 %v7284_v2, %v7261_v33  ;;  %v10370_v33 = vld [vmem:[#allocation32 + $0x370] ss:$8 sps:$4 sm:$0xff]  }
 0xab4   :  { %8351 = vmatpush1.bf16.msra.mxu0 %v10340_v16 }
 0xab5   :  { %v7281_v23 = vadd.f32 %v7280_v13, %v7279_v18  ;;  %v7286_v30 = vrot.slane %v7285_v60, 2  ;;  %8352 = vmatprep.subr.bf16.mxu0 %v10345_v22  ;;  %v10375_v22 = vld [vmem:[#allocation32 + $0x364] ss:$8 sps:$4 sm:$0xff]  }
 0xab7   :  { %v7282_v38 = vrot.slane %v7281_v23, 1  ;;  %v7287_v41 = vadd.f32 %v7286_v30, %v7285_v60 }
 0xab8   :  { %8353 = vmatpush1.bf16.msra.mxu0 %v10343_v20 }
 0xab9   :  { %v7283_v46 = vadd.f32 %v7282_v38, %v7281_v23  ;;  %v7288_v43 = vrot.slane %v7287_v41, 1  ;;  %8354 = vmatprep.subr.bf16.mxu0 %v10348_v37  ;;  %v10373_v37 = vld [vmem:[#allocation32 + $0x360] ss:$8 sps:$4 sm:$0xff]  }
 0xabb   :  { %v7316_v50 = vmul.f32 0.125, %v7283_v46  ;;  %v7289_v17 = vadd.f32 %v7288_v43, %v7287_v41  ;;  %v10378_v46 = vld [vmem:[#allocation32 + $0x354] ss:$8 sps:$4 sm:$0xff]  }
 0xabc   :  { %8355 = vmatpush2.bf16.msra.mxu0 %v10346_v45 }
 0xabd   :  { %v7324_v52 = vadd.f32 1e-05, %v7316_v50  ;;  %v7317_v55 = vmul.f32 0.125, %v7289_v17  ;;  %8356 = vmatprep.subr.bf16.mxu0 %v10351_v49 }
 0xabf   :  { %10448 = vrsqrt.f32 %v7324_v52  ;;  %v7325_v19 = vadd.f32 1e-05, %v7317_v55 }
 0xac0   :  { %8357 = vmatpush2.bf16.msra.mxu0 %v10349_v51  ;;  %v10376_v51 = vld [vmem:[#allocation32 + $0x350] ss:$8 sps:$4 sm:$0xff]  }
 0xac1   :  { %10450 = vrsqrt.f32 %v7325_v19  ;;  %8358 = vmatprep.subr.bf16.mxu0 %v10354_v9  ;;  %v10381_v9 = vld [vmem:[#allocation32 + $0x344] ss:$8 sps:$4 sm:$0xff]  }
 0xac4   :  { %8359 = vmatpush2.bf16.msra.mxu0 %v10352_v47 }
 0xac5   :  { %8360 = vmatprep.subr.bf16.mxu0 %v10357_v48  ;;  %v10379_v48 = vld [vmem:[#allocation32 + $0x340] ss:$8 sps:$4 sm:$0xff]  }
 0xac8   :  { %8361 = vmatpush2.bf16.msra.mxu0 %v10355_v44 }
 0xac9   :  { %8362 = vmatprep.subr.bf16.mxu0 %v10360_v34 }
 0xacc   :  { %v10449_v35 = vpop.eup %10448  ;;  %8363 = vmatpush2.bf16.msra.mxu0 %v10358_v21  ;;  %v10384_v21 = vld [vmem:[#allocation32 + $0x334] ss:$8 sps:$4 sm:$0xff]  }
 0xacd   :  { %v7340_v58 = vmul.f32 %v10449_v35, %v7252_v25  ;;  %8364 = vmatprep.subr.bf16.mxu0 %v10363_v53  ;;  %v10367_v25 = vld [vmem:[#allocation32 + $0x280] ss:$8 sps:$4 sm:$0xff]   ;;  %v10382_v35 = vld [vmem:[#allocation32 + $0x330] ss:$8 sps:$4 sm:$0xff]  }
 0xace   :  { %v10451_v1 = vpop.eup %10450 }
 0xacf   :  { %v7389_v11 = vmul.f32 %v7358_v56, %v7340_v58  ;;  %v7341_v3 = vmul.f32 %v10451_v1, %v7253_v59  ;;  %v10385_v1 = vld [vmem:[#allocation32 + $0x320] ss:$8 sps:$4 sm:$0xff]  }
 0xad0   :  { %8365 = vmatpush2.bf16.msra.mxu0 %v10361_v24 }
 0xad1   :  { %v7438_v6 = vadd.f32 %v7407_v61, %v7389_v11  ;;  %v7390_v7 = vmul.f32 %v7362_v62, %v7341_v3  ;;  %8366 = vmatprep.subr.bf16.mxu0 %v10366_v63  ;;  %v10387_v61 = vld [vmem:[#allocation32 + $0x324] ss:$8 sps:$4 sm:$0xff]  }
 0xad3   :  { %v7439_v8 = vadd.f32 %v7411_v4, %v7390_v7  ;;  %vm7446_vm11 = vcmp.ge.f32.partialorder %v7438_v6, 0.0  ;;  %v7454_v12 = vmul.f32 0.2, %v7438_v6  ;;  %v10390_v4 = vld [vmem:[#allocation32 + $0x314] ss:$8 sps:$4 sm:$0xff]  }
 0xad4   :  { %8367 = vmatpush2.bf16.msra.mxu0 %v10364_v5  ;;  %v10388_v7 = vld [vmem:[#allocation32 + $0x310] ss:$8 sps:$4 sm:$0xff]  }
 0xad5   :  { %vm7447_vm12 = vcmp.ge.f32.partialorder %v7439_v8, 0.0  ;;  %v7455_v26 = vmul.f32 0.2, %v7439_v8  ;;  %8368 = vmatprep.subr.bf16.mxu0 %v10369_v57  ;;  %v7462_v29 = vsel %vm7446_vm11, %v7438_v6, %v7454_v12  ;;  %v10393_v12 = vld [vmem:[#allocation32 + $0x304] ss:$8 sps:$4 sm:$0xff]  }
 0xad6   :  { %v7599_v2 = vpack.c.bf16 %v7462_v29, %v7462_v29 }
 0xad7   :  { %v7463_v59 = vsel %vm7447_vm12, %v7439_v8, %v7455_v26  ;;  %v10391_v26 = vld [vmem:[#allocation32 + $0x300] ss:$8 sps:$4 sm:$0xff]  }
 0xad8   :  { %v7062_v31 = vpop.f32.mrf.mxu0  ;;  %v7600_v32 = vpack.c.bf16 %v7463_v59, %v7463_v59  ;;  %8369 = vmatpush2.bf16.msra.mxu0 %v10367_v25  ;;  %v10396_v59 = vld [vmem:[#allocation32 + $0x3f4] ss:$8 sps:$4 sm:$0xff]  }
 0xad9   :  { %v7063_v16 = vadd.f32 %v7062_v31, %v5563_v27  ;;  %v7103_v18 = vpop.f32.mrf.mxu1 }
 0xada   :  { %v7064_v13 = vpop.f32.mrf.mxu0  ;;  %8329 = vmatprep.mubr.bf16.mxu1 %v7600_v32 }
 0xadb   :  { %v7104_v60 = vadd.f32 %v7103_v18, %v7063_v16  ;;  %v7065_v20 = vadd.f32 %v7064_v13, %v5567_v15  ;;  %v7105_v23 = vpop.f32.mrf.mxu1  ;;  %8330 = vmatmul.mubr.bf16.vlgmr.msra.gmra.mxu1 %v7599_v2  ;;  %v10399_v2 = vld [vmem:[#allocation32 + $0x3e4] ss:$8 sps:$4 sm:$0xff]  }
 0xadc   :  { %v7066_v30 = vpop.f32.mrf.mxu0  ;;  %8380 = vmatpush1.bf16.msra.mxu1 %v10370_v33  ;;  %v10394_v33 = vld [vmem:[#allocation32 + $0x3f0] ss:$8 sps:$4 sm:$0xff]  }
 0xadd   :  { %v7218_v38 = vrot.slane %v7104_v60, 4  ;;  %v7106_v41 = vadd.f32 %v7105_v23, %v7065_v20  ;;  %v7107_v45 = vpop.f32.mrf.mxu1  ;;  %8381 = vmatprep.subr.bf16.mxu1 %v10375_v22  ;;  %v10402_v30 = vld [vmem:[#allocation32 + $0x3d4] ss:$8 sps:$4 sm:$0xff]  }
 0xade   :  { %v7067_v43 = vpop.f32.mrf.mxu0  ;;  %v10403_v45 = vld [vmem:[#allocation32 + $0x3c0] ss:$8 sps:$4 sm:$0xff]  }
 0xadf   :  { %v7219_v49 = vadd.f32 %v7218_v38, %v7104_v60  ;;  %v7224_v50 = vrot.slane %v7106_v41, 4  ;;  %v7108_v17 = vpop.f32.mrf.mxu1  ;;  %v10400_v38 = vld [vmem:[#allocation32 + $0x3d0] ss:$8 sps:$4 sm:$0xff]  }
 0xae0   :  { %8382 = vmatpush1.bf16.msra.mxu1 %v10373_v37  ;;  %v10406_v43 = vld [vmem:[#allocation32 + $0x3b0] ss:$8 sps:$4 sm:$0xff]  }
 0xae1   :  { %v7220_v52 = vrot.slane %v7219_v49, 2  ;;  %v7225_v55 = vadd.f32 %v7224_v50, %v7106_v41  ;;  %8383 = vmatprep.subr.bf16.mxu1 %v10378_v46  ;;  %v10408_v46 = vld [vmem:[#allocation32 + $0x3b4] ss:$8 sps:$4 sm:$0xff]   ;;  %v7366_v50 = vrot.slane %v11465_v54, %v11251_v36 }
 0xae3   :  { %v7221_v19 = vadd.f32 %v7220_v52, %v7219_v49  ;;  %v7226_v47 = vrot.slane %v7225_v55, 2  ;;  %v10411_v49 = vld [vmem:[#allocation32 + $0x3a4] ss:$8 sps:$4 sm:$0xff]  }
 0xae4   :  { %8384 = vmatpush1.bf16.msra.mxu1 %v10376_v51  ;;  %v10409_v51 = vld [vmem:[#allocation32 + $0x3a0] ss:$8 sps:$4 sm:$0xff]  }
 0xae5   :  { %v7222_v44 = vrot.slane %v7221_v19, 1  ;;  %v7227_v34 = vadd.f32 %v7226_v47, %v7225_v55  ;;  %8385 = vmatprep.subr.bf16.mxu1 %v10381_v9  ;;  %v7415_v55 = vrot.slane %v11468_v28, %v11251_v36  ;;  %v7370_v9 = vrot.slane %v11465_v54, %v11257_v40 }
 0xae7   :  { %v7223_v53 = vadd.f32 %v7222_v44, %v7221_v19  ;;  %v7228_v56 = vrot.slane %v7227_v34, 1  ;;  %v10414_v19 = vld [vmem:[#allocation32 + $0x394] ss:$8 sps:$4 sm:$0xff]  }
 0xae8   :  { %8386 = vmatpush1.bf16.msra.mxu1 %v10379_v48 }
 0xae9   :  { %v7246_v24 = vmul.f32 0.125, %v7223_v53  ;;  %v7229_v58 = vadd.f32 %v7228_v56, %v7227_v34  ;;  %8387 = vmatprep.subr.bf16.mxu1 %v10384_v21  ;;  %v7419_v34 = vrot.slane %v11468_v28, %v11257_v40  ;;  %v10412_v21 = vld [vmem:[#allocation32 + $0x390] ss:$8 sps:$4 sm:$0xff]   ;;  %v5575_v40 = vrot.slane %v11448_v0, %v11260_v42 }
 0xaeb   :  { %v7254_v62 = vsub.f32 %v7104_v60, %v7246_v24  ;;  %v7247_v63 = vmul.f32 0.125, %v7229_v58  ;;  %v10397_v60 = vld [vmem:[#allocation32 + $0x3e0] ss:$8 sps:$4 sm:$0xff]  }
 0xaec   :  { %8388 = vmatpush1.bf16.msra.mxu1 %v10382_v35  ;;  %v10417_v35 = vld [vmem:[#allocation32 + $0x384] ss:$8 sps:$4 sm:$0xff]   ;;  %v10415_v58 = vld [vmem:[#allocation32 + $0x380] ss:$8 sps:$4 sm:$0xff]  }
 0xaed   :  { %v7262_v11 = vmul.f32 %v7254_v62, %v7254_v62  ;;  %v7255_v3 = vsub.f32 %v7106_v41, %v7247_v63  ;;  %8389 = vmatprep.subr.bf16.mxu1 %v10387_v61  ;;  %v10405_v41 = vld [vmem:[#allocation32 + $0x3c4] ss:$8 sps:$4 sm:$0xff]   ;;  %v5571_v61 = vrot.slane %v11448_v0, %v11254_v39 }
 0xaef   :  { %v7290_v5 = vrot.slane %v7262_v11, 4  ;;  %v7263_v6 = vmul.f32 %v7255_v3, %v7255_v3 }
 0xaf0   :  { %8390 = vmatpush1.bf16.msra.mxu1 %v10385_v1 }
 0xaf1   :  { %v7291_v57 = vadd.f32 %v7290_v5, %v7262_v11  ;;  %v7296_v8 = vrot.slane %v7263_v6, 4  ;;  %8391 = vmatprep.subr.bf16.mxu1 %v10390_v4 }
 0xaf3   :  { %v7292_v25 = vrot.slane %v7291_v57, 2  ;;  %v7297_v27 = vadd.f32 %v7296_v8, %v7263_v6 }
 0xaf4   :  { %8392 = vmatpush1.bf16.msra.mxu1 %v10388_v7 }
 0xaf5   :  { %v7293_v29 = vadd.f32 %v7292_v25, %v7291_v57  ;;  %v7298_v15 = vrot.slane %v7297_v27, 2  ;;  %8393 = vmatprep.subr.bf16.mxu1 %v10393_v12 }
 0xaf7   :  { %v7294_v31 = vrot.slane %v7293_v29, 1  ;;  %v7299_v32 = vadd.f32 %v7298_v15, %v7297_v27 }
 0xaf8   :  { %8394 = vmatpush1.bf16.msra.mxu1 %v10391_v26 }
 0xaf9   :  { %v7295_v16 = vadd.f32 %v7294_v31, %v7293_v29  ;;  %v7300_v18 = vrot.slane %v7299_v32, 1  ;;  %8395 = vmatprep.subr.bf16.mxu1 %v10396_v59 }
 0xafb   :  { %v7318_v22 = vmul.f32 0.125, %v7295_v16  ;;  %v7301_v13 = vadd.f32 %v7300_v18, %v7299_v32 }
 0xafc   :  { %8396 = vmatpush2.bf16.msra.mxu1 %v10394_v33 }
 0xafd   :  { %v7326_v20 = vadd.f32 1e-05, %v7318_v22  ;;  %v7319_v23 = vmul.f32 0.125, %v7301_v13  ;;  %8397 = vmatprep.subr.bf16.mxu1 %v10399_v2 }
 0xaff   :  { %10452 = vrsqrt.f32 %v7326_v20  ;;  %v7327_v37 = vadd.f32 1e-05, %v7319_v23 }
 0xb00   :  { %8398 = vmatpush2.bf16.msra.mxu1 %v10397_v60 }
 0xb01   :  { %10454 = vrsqrt.f32 %v7327_v37  ;;  %8399 = vmatprep.subr.bf16.mxu1 %v10402_v30 }
 0xb04   :  { %8400 = vmatpush2.bf16.msra.mxu1 %v10400_v38 }
 0xb05   :  { %8401 = vmatprep.subr.bf16.mxu1 %v10405_v41 }
 0xb08   :  { %8402 = vmatpush2.bf16.msra.mxu1 %v10403_v45 }
 0xb09   :  { %8403 = vmatprep.subr.bf16.mxu1 %v10408_v46 }
 0xb0c   :  { %v10453_v17 = vpop.eup %10452  ;;  %8404 = vmatpush2.bf16.msra.mxu1 %v10406_v43 }
 0xb0d   :  { %v7342_v52 = vmul.f32 %v10453_v17, %v7254_v62  ;;  %8405 = vmatprep.subr.bf16.mxu1 %v10411_v49 }
 0xb0e   :  { %v10455_v47 = vpop.eup %10454 }
 0xb0f   :  { %v7391_v48 = vmul.f32 %v7366_v50, %v7342_v52  ;;  %v7343_v44 = vmul.f32 %v10455_v47, %v7255_v3 }
 0xb10   :  { %8406 = vmatpush2.bf16.msra.mxu1 %v10409_v51 }
 0xb11   :  { %v7440_v53 = vadd.f32 %v7415_v55, %v7391_v48  ;;  %v7392_v56 = vmul.f32 %v7370_v9, %v7343_v44  ;;  %8407 = vmatprep.subr.bf16.mxu1 %v10414_v19 }
 0xb13   :  { %v7441_v24 = vadd.f32 %v7419_v34, %v7392_v56  ;;  %vm7448_vm13 = vcmp.ge.f32.partialorder %v7440_v53, 0.0  ;;  %v7456_v36 = vmul.f32 0.2, %v7440_v53  ;;  %v7374_v56 = vrot.slane %v11465_v54, %v11254_v39 }
 0xb14   :  { %8408 = vmatpush2.bf16.msra.mxu1 %v10412_v21 }
 0xb15   :  { %vm7449_vm14 = vcmp.ge.f32.partialorder %v7441_v24, 0.0  ;;  %v7457_v62 = vmul.f32 0.2, %v7441_v24  ;;  %8409 = vmatprep.subr.bf16.mxu1 %v10417_v35  ;;  %v7464_v63 = vsel %vm7448_vm13, %v7440_v53, %v7456_v36  ;;  %v7423_v36 = vrot.slane %v11468_v28, %v11254_v39 }
 0xb16   :  { %v7601_v6 = vpack.c.bf16 %v7464_v63, %v7464_v63 }
 0xb17   :  { %v7465_v1 = vsel %vm7449_vm14, %v7441_v24, %v7457_v62 }
 0xb18   :  { %v7144_v11 = vpop.f32.mrf.mxu0  ;;  %v7602_v3 = vpack.c.bf16 %v7465_v1, %v7465_v1  ;;  %8410 = vmatpush2.bf16.msra.mxu1 %v10415_v58  ;;  %v7378_v58 = vrot.slane %v11465_v54, %v11260_v42 }
 0xb19   :  { %v7145_v4 = vadd.f32 %v7144_v11, %v5571_v61  ;;  %v7185_v5 = vpop.f32.mrf.mxu1 }
 0xb1a   :  { %v7146_v7 = vpop.f32.mrf.mxu0  ;;  %8370 = vmatprep.mubr.bf16.mxu0 %v7602_v3 }
 0xb1b   :  { %v7186_v57 = vadd.f32 %v7185_v5, %v7145_v4  ;;  %v7147_v8 = vadd.f32 %v7146_v7, %v5575_v40  ;;  %v7187_v12 = vpop.f32.mrf.mxu1  ;;  %8371 = vmatmul.mubr.bf16.vlgmr.msra.gmra.mxu0 %v7601_v6  ;;  %v7427_v40 = vrot.slane %v11468_v28, %v11260_v42 }
 0xb1c   :  { %v7148_v25 = vpop.f32.mrf.mxu0 }
 0xb1d   :  { %v7230_v27 = vrot.slane %v7186_v57, 4  ;;  %v7188_v26 = vadd.f32 %v7187_v12, %v7147_v8  ;;  %v7189_v29 = vpop.f32.mrf.mxu1 }
 0xb1e   :  { %v7149_v15 = vpop.f32.mrf.mxu0 }
 0xb1f   :  { %v7231_v59 = vadd.f32 %v7230_v27, %v7186_v57  ;;  %v7236_v0 = vrot.slane %v7188_v26, 4  ;;  %v7190_v31 = vpop.f32.mrf.mxu1  ;;  %v7596_v27 = vld [vmem:[%s11146_s5] sm:$0x3] }
 0xb20   :  { %v7609_v42 = vrot.slane %v7596_v27, %v11216_v10  ;;  %v7613_v28 = vrot.slane %v7596_v27, %v11225_v14 }
 0xb21   :  { %v7232_v32 = vrot.slane %v7231_v59, 2  ;;  %v7237_v33 = vadd.f32 %v7236_v0, %v7188_v26 }
 0xb23   :  { %v7233_v16 = vadd.f32 %v7232_v32, %v7231_v59  ;;  %v7238_v18 = vrot.slane %v7237_v33, 2 }
 0xb25   :  { %v7234_v2 = vrot.slane %v7233_v16, 1  ;;  %v7239_v22 = vadd.f32 %v7238_v18, %v7237_v33 }
 0xb27   :  { %v7235_v13 = vadd.f32 %v7234_v2, %v7233_v16  ;;  %v7240_v60 = vrot.slane %v7239_v22, 1 }
 0xb29   :  { %v7248_v20 = vmul.f32 0.125, %v7235_v13  ;;  %v7241_v23 = vadd.f32 %v7240_v60, %v7239_v22 }
 0xb2b   :  { %v7256_v30 = vsub.f32 %v7186_v57, %v7248_v20  ;;  %v7249_v37 = vmul.f32 0.125, %v7241_v23 }
 0xb2d   :  { %v7264_v38 = vmul.f32 %v7256_v30, %v7256_v30  ;;  %v7257_v41 = vsub.f32 %v7188_v26, %v7249_v37 }
 0xb2f   :  { %v7302_v45 = vrot.slane %v7264_v38, 4  ;;  %v7265_v46 = vmul.f32 %v7257_v41, %v7257_v41 }
 0xb31   :  { %v7303_v43 = vadd.f32 %v7302_v45, %v7264_v38  ;;  %v7308_v49 = vrot.slane %v7265_v46, 4 }
 0xb33   :  { %v7304_v50 = vrot.slane %v7303_v43, 2  ;;  %v7309_v17 = vadd.f32 %v7308_v49, %v7265_v46 }
 0xb35   :  { %v7305_v51 = vadd.f32 %v7304_v50, %v7303_v43  ;;  %v7310_v52 = vrot.slane %v7309_v17, 2 }
 0xb37   :  { %v7306_v55 = vrot.slane %v7305_v51, 1  ;;  %v7311_v9 = vadd.f32 %v7310_v52, %v7309_v17 }
 0xb39   :  { %v7307_v19 = vadd.f32 %v7306_v55, %v7305_v51  ;;  %v7312_v47 = vrot.slane %v7311_v9, 1 }
 0xb3b   :  { %v7320_v48 = vmul.f32 0.125, %v7307_v19  ;;  %v7313_v44 = vadd.f32 %v7312_v47, %v7311_v9 }
 0xb3d   :  { %v7328_v34 = vadd.f32 1e-05, %v7320_v48  ;;  %v7321_v21 = vmul.f32 0.125, %v7313_v44 }
 0xb3f   :  { %10456 = vrsqrt.f32 %v7328_v34  ;;  %v7329_v53 = vadd.f32 1e-05, %v7321_v21 }
 0xb41   :  { %10458 = vrsqrt.f32 %v7329_v53 }
 0xb4c   :  { %v10457_v35 = vpop.eup %10456 }
 0xb4d   :  { %v7344_v24 = vmul.f32 %v10457_v35, %v7256_v30 }
 0xb4e   :  { %v10459_v61 = vpop.eup %10458 }
 0xb4f   :  { %v7393_v62 = vmul.f32 %v7374_v56, %v7344_v24  ;;  %v7345_v63 = vmul.f32 %v10459_v61, %v7257_v41 }
 0xb51   :  { %v7442_v1 = vadd.f32 %v7423_v36, %v7393_v62  ;;  %v7394_v11 = vmul.f32 %v7378_v58, %v7345_v63 }
 0xb53   :  { %v7443_v3 = vadd.f32 %v7427_v40, %v7394_v11  ;;  %vm7450_vm15 = vcmp.ge.f32.partialorder %v7442_v1, 0.0  ;;  %v7458_v4 = vmul.f32 0.2, %v7442_v1 }
 0xb55   :  { %vm7451_vm0 = vcmp.ge.f32.partialorder %v7443_v3, 0.0  ;;  %v7459_v5 = vmul.f32 0.2, %v7443_v3  ;;  %v7466_v6 = vsel %vm7450_vm15, %v7442_v1, %v7458_v4 }
 0xb56   :  { %v7603_v57 = vpack.c.bf16 %v7466_v6, %v7466_v6 }
 0xb57   :  { %v7467_v7 = vsel %vm7451_vm0, %v7443_v3, %v7459_v5 }
 0xb58   :  { %v7604_v39 = vpack.c.bf16 %v7467_v7, %v7467_v7 }
 0xb5a   :  { %8411 = vmatprep.mubr.bf16.mxu1 %v7604_v39 }
 0xb5b   :  { %8412 = vmatmul.mubr.bf16.vlgmr.msra.gmra.mxu1 %v7603_v57  ;;  %v8290_v54 = vpop.f32.mrf.mxu0 }
 0xb5c   :  { %v8291_v26 = vadd.f32 %v8290_v54, %v7609_v42 }
 0xb5d   :  { %v8292_v8 = vpop.f32.mrf.mxu0 }
 0xb5e   :  { %v8293_v15 = vadd.f32 %v8292_v8, %v7613_v28 }
 0xb5f   :  { %v8294_v12 = vpop.f32.mrf.mxu0 }
 0xb61   :  { %v8295_v25 = vpop.f32.mrf.mxu0 }
 0xb9b   :  { %v8331_v29 = vpop.f32.mrf.mxu1 }
 0xb9c   :  { %v8332_v59 = vadd.f32 %v8331_v29, %v8291_v26 }
 0xb9d   :  { %v8333_v0 = vpop.f32.mrf.mxu1 }
 0xb9e   :  { %v8334_v31 = vadd.f32 %v8333_v0, %v8293_v15 }
 0xb9f   :  { %v8335_v32 = vpop.f32.mrf.mxu1 }
 0xba1   :  { %v8336_v33 = vpop.f32.mrf.mxu1 }
 0xba2   :  { %10879 = shalt.err (!%p10876_p6)
}
 0xba3   :  { %8443 = dma.vmem_to_hbm [thread:$0]  %s8441_s2, 128, %s11151_s4, [#allocation4]  }
 0xbdb   :  { %v8372_v10 = vpop.f32.mrf.mxu0 }
 0xbdc   :  { %v8373_v2 = vadd.f32 %v8372_v10, %v8332_v59 }
 0xbdd   :  { %v8374_v14 = vpop.f32.mrf.mxu0 }
 0xbde   :  { %v8375_v13 = vadd.f32 %v8374_v14, %v8334_v31 }
 0xbdf   :  { %v8376_v16 = vpop.f32.mrf.mxu0 }
 0xbe1   :  { %v8377_v18 = vpop.f32.mrf.mxu0 }
 0xc1b   :  { %v8413_v22 = vpop.f32.mrf.mxu1 }
 0xc1c   :  { %v8414_v60 = vadd.f32 %v8413_v22, %v8373_v2 }
 0xc1d   :  { %v8415_v20 = vpop.f32.mrf.mxu1 }
 0xc1e   :  { %v9446_v23 = vmul.f32 -1.442695, %v8414_v60  ;;  %v8416_v30 = vadd.f32 %v8415_v20, %v8375_v13 }
 0xc1f   :  { %v8417_v37 = vpop.f32.mrf.mxu1 }
 0xc20   :  { %10460 = vpow2.f32 %v9446_v23  ;;  %v9447_v38 = vmul.f32 -1.442695, %v8416_v30 }
 0xc21   :  { %v8418_v41 = vpop.f32.mrf.mxu1 }
 0xc22   :  { %10462 = vpow2.f32 %v9447_v38 }
 0xc2d   :  { %v10461_v45 = vpop.eup %10460 }
 0xc2e   :  { %v8426_v46 = vadd.f32 1.0, %v10461_v45 }
 0xc2f   :  { %v10463_v43 = vpop.eup %10462 }
 0xc30   :  { %10464 = vrcp.f32 %v8426_v46  ;;  %v8427_v49 = vadd.f32 1.0, %v10463_v43 }
 0xc32   :  { %10466 = vrcp.f32 %v8427_v49 }
 0xc3d   :  { %v10465_v50 = vpop.eup %10464 }
 0xc3e   :  { %8432 = vst [vmem:[%s11156_s20] sm:$0xff] %v10465_v50 }
 0xc3f   :  { %v10467_v17 = vpop.eup %10466 }
 0xc40   :  { %8433 = vst [vmem:[%s11156_s20 + $0x8] sm:$0xff] %v10467_v17 }
 0xc41   :  { %10910 = dma.done.wait [#allocation4], 128  }
 0xc42   :  { %10911 = vsyncadd [#allocation4], 4294967168 }
 0xc43   :  { %8451 = vsyncpa [#allocation3], 1 }
 0xc44   :  { %8452 = vsyncpa [#allocation6], 1 }
 0xc45   :  { %8453 = vsyncpa [#allocation9], 1 }
 0xc46   :  { %8454 = vsyncpa [#allocation12], 1 }
 0xc47   :  { %8455 = vsyncpa [#allocation15], 1 }
 0xc48   :  { %8456 = vsyncpa [#allocation18], 1 }
 0xc49   :  { %8457 = vsyncpa [#allocation21], 1 }
 0xc4a   :  { %8458 = vsyncpa [#allocation24], 1 }
 0xc4b   :  { %8459 = vsyncpa [#allocation27], 1 }
 0xc4c   :  { %8460 = vsyncpa [#allocation30], 1 }
 0xc4d   :  { %8461 = vsyncpa [#allocation33], 1 }
 0xc4e   :  { %8462 = vsyncpa [#allocation4], 1 }

</bundles_post_ra>
